<compile_context>
chip_gen: v7x
topology: tpu7x:2x2x1
jax: 0.10.0
libtpu: 0.0.40
codegen_flags: <defaults>
</compile_context>

<pallas_src>
import math
from functools import partial

import jax
import jax.numpy as jnp
from jax.experimental import pallas as pl
from jax.experimental.pallas import tpu as pltpu


def _head_perm(width, num_heads):
    """Permutation p -> original index, where new index p = position*H + head and
    original index = head*head_dim + position (torch reshape/transpose order)."""
    head_dim = width // num_heads
    p = jnp.arange(width)
    return (p % num_heads) * head_dim + (p // num_heads)


def _mhsa_fused_kernel(x_ref, w1_ref, w2_ref, wo_ref, o_ref, *,
                       num_heads, head_dim, key_size):
    H, D = num_heads, head_dim

    # ---- fused projections: two wide bf16 MXU matmuls, f32 accumulation ------
    x = x_ref[...].astype(jnp.bfloat16)
    h1 = jnp.dot(x, w1_ref[...], preferred_element_type=jnp.float32)
    qkv = jnp.dot(h1.astype(jnp.bfloat16), w2_ref[...],
                  preferred_element_type=jnp.float32)

    # Column layout (pre-permuted host-side): within each q/k/v block,
    # column index = position*H + head, and the 1/sqrt(H) scale is already
    # folded into the q_proj block.  Hence q[:, i*H:(i+1)*H] == torch q[:, i, :].
    q = qkv[:, :key_size]
    k = qkv[:, key_size:2 * key_size]
    v = qkv[:, 2 * key_size:]

    # ---- per-token attention over D positions, contracting over H heads ------
    out_cols = []
    for i in range(D):
        qi = q[:, i * H:(i + 1) * H]                                    # (tn, H)
        # scores s[n, i, j] = sum_h q[n, i, h] * k[n, j, h]   (only useful entries)
        s = [jnp.sum(qi * k[:, j * H:(j + 1) * H], axis=-1, keepdims=True)
             for j in range(D)]                                         # D x (tn, 1)
        m = s[0]
        for j in range(1, D):
            m = jnp.maximum(m, s[j])
        p = [jnp.exp(sj - m) for sj in s]
        denom = p[0]
        for j in range(1, D):
            denom = denom + p[j]
        inv = pl.reciprocal(denom, approx=True)                         # EUP
        # out[n, i, h] = sum_j softmax(s)[n, i, j] * v[n, j, h]
        oi = (p[0] * inv) * v[:, :H]
        for j in range(1, D):
            oi = oi + (p[j] * inv) * v[:, j * H:(j + 1) * H]
        out_cols.append(oi)                                             # (tn, H)

    # (tn, D*H) with column index = position*H + head; W_out rows were permuted
    # to the same order, so this equals torch's transpose(1,2).reshape(N, V).
    o_flat = jnp.concatenate(out_cols, axis=-1).astype(jnp.bfloat16)
    o_ref[...] = jnp.dot(o_flat, wo_ref[...],
                         preferred_element_type=jnp.float32).astype(o_ref.dtype)


def multi_head_self_attention(x, params, num_heads, *, block_n=256):
    """Pallas implementation of MultiHeadSelfAttention.forward (bias=False).

    Weights are stored as (in_features, out_features) == torch weight.T.
    block_n must be a multiple of 8 (only relevant when N > block_n).
    """
    wq, wk, wv, wqp, wkp, wvp, wout = params
    n_tokens, embed_dim = x.shape
    key_size = wq.shape[1]
    value_size = wv.shape[1]
    assert key_size % num_heads == 0 and value_size % num_heads == 0
    head_dim = key_size // num_heads
    # The module's att @ v matmul only type-checks when these agree.
    assert value_size // num_heads == head_dim

    scale = 1.0 / math.sqrt(num_heads)        # torch: / sqrt(k.size(-1)) == sqrt(H)
    proj_width = 2 * key_size + value_size

    # ---- one-time host-side weight packing (exact math, layout plumbing only) ----
    w1 = jnp.concatenate([wq, wk, wv], axis=1).astype(jnp.bfloat16)     # (E, 2K+V)
    w2 = jnp.zeros((proj_width, proj_width), jnp.float32)
    w2 = w2.at[:key_size, :key_size].set(wqp * scale)                   # fold softmax scale
    w2 = w2.at[key_size:2 * key_size, key_size:2 * key_size].set(wkp)
    w2 = w2.at[2 * key_size:, 2 * key_size:].set(wvp)
    perm_k = _head_perm(key_size, num_heads)
    perm_v = _head_perm(value_size, num_heads)
    col_perm = jnp.concatenate([perm_k, key_size + perm_k, 2 * key_size + perm_v])
    w2 = w2[:, col_perm].astype(jnp.bfloat16)      # output cols -> (pos*H + head) order
    wo = wout[perm_v, :].astype(jnp.bfloat16)      # input rows  -> (pos*H + head) order

    # Token tiling: full array if small, else 8-aligned tiles (tiny VMEM footprint,
    # safe for v7x's 64 MiB VMEM / 32 MiB scoped default).
    tile_n = n_tokens if n_tokens <= block_n else block_n
    grid = (pl.cdiv(n_tokens, tile_n),)

    kernel = partial(_mhsa_fused_kernel, num_heads=num_heads,
                     head_dim=head_dim, key_size=key_size)

    return pl.pallas_call(
        kernel,
        out_shape=jax.ShapeDtypeStruct((n_tokens, embed_dim), x.dtype),
        grid=grid,
        in_specs=[
            pl.BlockSpec((tile_n, embed_dim), lambda i: (i, 0)),
            pl.BlockSpec((embed_dim, proj_width), lambda i: (0, 0)),
            pl.BlockSpec((proj_width, proj_width), lambda i: (0, 0)),
            pl.BlockSpec((value_size, embed_dim), lambda i: (0, 0)),
        ],
        out_specs=pl.BlockSpec((tile_n, embed_dim), lambda i: (i, 0)),
        compiler_params=pltpu.CompilerParams(
            dimension_semantics=("parallel",)),
    )(x, w1, w2, wo)


def reference_mhsa(x, params, num_heads):
    """Pure-JAX transcription of the torch forward (correctness check)."""
    wq, wk, wv, wqp, wkp, wvp, wout = params
    hp = jax.lax.Precision.HIGHEST
    q = jnp.dot(jnp.dot(x, wq, precision=hp), wqp, precision=hp)
    k = jnp.dot(jnp.dot(x, wk, precision=hp), wkp, precision=hp)
    v = jnp.dot(jnp.dot(x, wv, precision=hp), wvp, precision=hp)
    N, value_size = v.shape
    D = q.shape[1] // num_heads
    Dv = value_size // num_heads
    q = q.reshape(N, num_heads, D).transpose(0, 2, 1)    # (N, D, H)
    k = k.reshape(N, num_heads, D).transpose(0, 2, 1)    # (N, D, H)
    v = v.reshape(N, num_heads, Dv).transpose(0, 2, 1)   # (N, Dv, H)
    att = jnp.einsum('nih,njh->nij', q, k, precision=hp) / math.sqrt(num_heads)
    att = jax.nn.softmax(att, axis=-1)
    out = jnp.einsum('nij,njh->nih', att, v, precision=hp)
    out = out.transpose(0, 2, 1).reshape(N, value_size)
    return jnp.dot(out, wout, precision=hp)


if __name__ == "__main__":
    N = 8
    embed_dim = 32
    num_heads = 4
    key_size = 32
    value_size = 32

    root = jax.random.PRNGKey(0)
    kx, k1, k2, k3, k4, k5, k6, k7 = jax.random.split(root, 8)
    x = jax.random.normal(kx, (N, embed_dim), dtype=jnp.float32)

    def init_w(k, fan_in, fan_out):
        # deterministic stand-in for nn.Linear default init; stored as (in, out) = W.T
        bound = 1.0 / math.sqrt(fan_in)
        return jax.random.uniform(k, (fan_in, fan_out), jnp.float32, -bound, bound)

    params = (
        init_w(k1, embed_dim, key_size),     # W_q
        init_w(k2, embed_dim, key_size),     # W_k
        init_w(k3, embed_dim, value_size),   # W_v
        init_w(k4, key_size, key_size),      # q_proj
        init_w(k5, key_size, key_size),      # k_proj
        init_w(k6, value_size, value_size),  # v_proj
        init_w(k7, value_size, embed_dim),   # out_proj
    )

    # single-tile run
    y = jax.block_until_ready(multi_head_self_attention(x, params, num_heads))
    y_ref = reference_mhsa(x, params, num_heads)
    assert y.shape == (N, embed_dim)
    err = float(jnp.max(jnp.abs(y - y_ref)))
    assert jnp.allclose(y, y_ref, atol=2e-2, rtol=2e-2), err

    # multi-tile run exercising the parallel token grid
    N2 = 64
    x2 = jax.random.normal(jax.random.PRNGKey(1), (N2, embed_dim), dtype=jnp.float32)
    y2 = jax.block_until_ready(
        multi_head_self_attention(x2, params, num_heads, block_n=32))
    y2_ref = reference_mhsa(x2, params, num_heads)
    err2 = float(jnp.max(jnp.abs(y2 - y2_ref)))
    assert jnp.allclose(y2, y2_ref, atol=2e-2, rtol=2e-2), err2

    print("KERNEL_OK")
</pallas_src>

<mosaic_0001>
module attributes {stable_mosaic.version = 11 : i64} {
  func.func @_mhsa_fused_kernel(%arg0: i32, %arg1: memref<8x32xf32, #tpu.memory_space<vmem>>, %arg2: memref<32x96xbf16, #tpu.memory_space<vmem>>, %arg3: memref<96x96xbf16, #tpu.memory_space<vmem>>, %arg4: memref<32x32xbf16, #tpu.memory_space<vmem>>, %arg5: memref<8x32xf32, #tpu.memory_space<vmem>>) attributes {dimension_semantics = [#tpu.dimension_semantics<parallel>], iteration_bounds = array<i64: 1>, scalar_prefetch = 0 : i64, scratch_operands = 0 : i64, tpu.core_type = #tpu.core_type<tc>, window_params = [{transform_indices = @transform_0, window_bounds = array<i64: 8, 32>}, {pipeline_mode = #tpu.pipeline_mode<synchronous>, transform_indices = @transform_1, window_bounds = array<i64: 32, 96>}, {pipeline_mode = #tpu.pipeline_mode<synchronous>, transform_indices = @transform_2, window_bounds = array<i64: 96, 96>}, {pipeline_mode = #tpu.pipeline_mode<synchronous>, transform_indices = @transform_3, window_bounds = array<i64: 32, 32>}, {transform_indices = @transform_4, window_bounds = array<i64: 8, 32>}]} {
    %c0 = arith.constant 0 : index
    %c0_0 = arith.constant 0 : index
    %0 = vector.load %arg1[%c0, %c0_0] : memref<8x32xf32, #tpu.memory_space<vmem>>, vector<8x32xf32>
    %1 = arith.truncf %0 : vector<8x32xf32> to vector<8x32xbf16>
    %c0_1 = arith.constant 0 : index
    %c0_2 = arith.constant 0 : index
    %2 = vector.load %arg2[%c0_1, %c0_2] : memref<32x96xbf16, #tpu.memory_space<vmem>>, vector<32x96xbf16>
    %cst = arith.constant dense<0.000000e+00> : vector<8x96xf32>
    %3 = tpu.matmul %1, %2, %cst {dimension_numbers = #tpu.dot_dimension_numbers<[1], [0], [0], [1], [0, 0, 1, 1], [], []>} : vector<8x32xbf16>, vector<32x96xbf16>, vector<8x96xf32> -> vector<8x96xf32>
    %4 = arith.truncf %3 : vector<8x96xf32> to vector<8x96xbf16>
    %c0_3 = arith.constant 0 : index
    %c0_4 = arith.constant 0 : index
    %5 = vector.load %arg3[%c0_3, %c0_4] : memref<96x96xbf16, #tpu.memory_space<vmem>>, vector<96x96xbf16>
    %cst_5 = arith.constant dense<0.000000e+00> : vector<8x96xf32>
    %6 = tpu.matmul %4, %5, %cst_5 {dimension_numbers = #tpu.dot_dimension_numbers<[1], [0], [0], [1], [0, 0, 1, 1], [], []>} : vector<8x96xbf16>, vector<96x96xbf16>, vector<8x96xf32> -> vector<8x96xf32>
    %7 = vector.extract_strided_slice %6 {offsets = [0, 0], sizes = [8, 32], strides = [1, 1]} : vector<8x96xf32> to vector<8x32xf32>
    %8 = vector.extract_strided_slice %6 {offsets = [0, 32], sizes = [8, 32], strides = [1, 1]} : vector<8x96xf32> to vector<8x32xf32>
    %9 = vector.extract_strided_slice %6 {offsets = [0, 64], sizes = [8, 32], strides = [1, 1]} : vector<8x96xf32> to vector<8x32xf32>
    %10 = vector.extract_strided_slice %7 {offsets = [0, 0], sizes = [8, 4], strides = [1, 1]} : vector<8x32xf32> to vector<8x4xf32>
    %11 = vector.extract_strided_slice %8 {offsets = [0, 0], sizes = [8, 4], strides = [1, 1]} : vector<8x32xf32> to vector<8x4xf32>
    %12 = arith.mulf %10, %11 : vector<8x4xf32>
    %cst_6 = arith.constant dense<0.000000e+00> : vector<8xf32>
    %13 = vector.multi_reduction <add>, %12, %cst_6 [1] : vector<8x4xf32> to vector<8xf32>
    %14 = vector.shape_cast %13 : vector<8xf32> to vector<8x1xf32>
    %15 = vector.extract_strided_slice %8 {offsets = [0, 4], sizes = [8, 4], strides = [1, 1]} : vector<8x32xf32> to vector<8x4xf32>
    %16 = arith.mulf %10, %15 : vector<8x4xf32>
    %cst_7 = arith.constant dense<0.000000e+00> : vector<8xf32>
    %17 = vector.multi_reduction <add>, %16, %cst_7 [1] : vector<8x4xf32> to vector<8xf32>
    %18 = vector.shape_cast %17 : vector<8xf32> to vector<8x1xf32>
    %19 = vector.extract_strided_slice %8 {offsets = [0, 8], sizes = [8, 4], strides = [1, 1]} : vector<8x32xf32> to vector<8x4xf32>
    %20 = arith.mulf %10, %19 : vector<8x4xf32>
    %cst_8 = arith.constant dense<0.000000e+00> : vector<8xf32>
    %21 = vector.multi_reduction <add>, %20, %cst_8 [1] : vector<8x4xf32> to vector<8xf32>
    %22 = vector.shape_cast %21 : vector<8xf32> to vector<8x1xf32>
    %23 = vector.extract_strided_slice %8 {offsets = [0, 12], sizes = [8, 4], strides = [1, 1]} : vector<8x32xf32> to vector<8x4xf32>
    %24 = arith.mulf %10, %23 : vector<8x4xf32>
    %cst_9 = arith.constant dense<0.000000e+00> : vector<8xf32>
    %25 = vector.multi_reduction <add>, %24, %cst_9 [1] : vector<8x4xf32> to vector<8xf32>
    %26 = vector.shape_cast %25 : vector<8xf32> to vector<8x1xf32>
    %27 = vector.extract_strided_slice %8 {offsets = [0, 16], sizes = [8, 4], strides = [1, 1]} : vector<8x32xf32> to vector<8x4xf32>
    %28 = arith.mulf %10, %27 : vector<8x4xf32>
    %cst_10 = arith.constant dense<0.000000e+00> : vector<8xf32>
    %29 = vector.multi_reduction <add>, %28, %cst_10 [1] : vector<8x4xf32> to vector<8xf32>
    %30 = vector.shape_cast %29 : vector<8xf32> to vector<8x1xf32>
    %31 = vector.extract_strided_slice %8 {offsets = [0, 20], sizes = [8, 4], strides = [1, 1]} : vector<8x32xf32> to vector<8x4xf32>
    %32 = arith.mulf %10, %31 : vector<8x4xf32>
    %cst_11 = arith.constant dense<0.000000e+00> : vector<8xf32>
    %33 = vector.multi_reduction <add>, %32, %cst_11 [1] : vector<8x4xf32> to vector<8xf32>
    %34 = vector.shape_cast %33 : vector<8xf32> to vector<8x1xf32>
    %35 = vector.extract_strided_slice %8 {offsets = [0, 24], sizes = [8, 4], strides = [1, 1]} : vector<8x32xf32> to vector<8x4xf32>
    %36 = arith.mulf %10, %35 : vector<8x4xf32>
    %cst_12 = arith.constant dense<0.000000e+00> : vector<8xf32>
    %37 = vector.multi_reduction <add>, %36, %cst_12 [1] : vector<8x4xf32> to vector<8xf32>
    %38 = vector.shape_cast %37 : vector<8xf32> to vector<8x1xf32>
    %39 = vector.extract_strided_slice %8 {offsets = [0, 28], sizes = [8, 4], strides = [1, 1]} : vector<8x32xf32> to vector<8x4xf32>
    %40 = arith.mulf %10, %39 : vector<8x4xf32>
    %cst_13 = arith.constant dense<0.000000e+00> : vector<8xf32>
    %41 = vector.multi_reduction <add>, %40, %cst_13 [1] : vector<8x4xf32> to vector<8xf32>
    %42 = vector.shape_cast %41 : vector<8xf32> to vector<8x1xf32>
    %43 = arith.maximumf %14, %18 : vector<8x1xf32>
    %44 = arith.maximumf %43, %22 : vector<8x1xf32>
    %45 = arith.maximumf %44, %26 : vector<8x1xf32>
    %46 = arith.maximumf %45, %30 : vector<8x1xf32>
    %47 = arith.maximumf %46, %34 : vector<8x1xf32>
    %48 = arith.maximumf %47, %38 : vector<8x1xf32>
    %49 = arith.maximumf %48, %42 : vector<8x1xf32>
    %50 = arith.subf %14, %49 : vector<8x1xf32>
    %51 = math.exp %50 : vector<8x1xf32>
    %52 = arith.subf %18, %49 : vector<8x1xf32>
    %53 = math.exp %52 : vector<8x1xf32>
    %54 = arith.subf %22, %49 : vector<8x1xf32>
    %55 = math.exp %54 : vector<8x1xf32>
    %56 = arith.subf %26, %49 : vector<8x1xf32>
    %57 = math.exp %56 : vector<8x1xf32>
    %58 = arith.subf %30, %49 : vector<8x1xf32>
    %59 = math.exp %58 : vector<8x1xf32>
    %60 = arith.subf %34, %49 : vector<8x1xf32>
    %61 = math.exp %60 : vector<8x1xf32>
    %62 = arith.subf %38, %49 : vector<8x1xf32>
    %63 = math.exp %62 : vector<8x1xf32>
    %64 = arith.subf %42, %49 : vector<8x1xf32>
    %65 = math.exp %64 : vector<8x1xf32>
    %66 = arith.addf %51, %53 : vector<8x1xf32>
    %67 = arith.addf %66, %55 : vector<8x1xf32>
    %68 = arith.addf %67, %57 : vector<8x1xf32>
    %69 = arith.addf %68, %59 : vector<8x1xf32>
    %70 = arith.addf %69, %61 : vector<8x1xf32>
    %71 = arith.addf %70, %63 : vector<8x1xf32>
    %72 = arith.addf %71, %65 : vector<8x1xf32>
    %73 = tpu.reciprocal %72 {approx = true} : vector<8x1xf32> -> vector<8x1xf32>
    %74 = arith.mulf %51, %73 : vector<8x1xf32>
    %75 = vector.extract_strided_slice %9 {offsets = [0, 0], sizes = [8, 4], strides = [1, 1]} : vector<8x32xf32> to vector<8x4xf32>
    %76 = vector.broadcast %74 : vector<8x1xf32> to vector<8x4xf32>
    %77 = arith.mulf %76, %75 : vector<8x4xf32>
    %78 = arith.mulf %53, %73 : vector<8x1xf32>
    %79 = vector.extract_strided_slice %9 {offsets = [0, 4], sizes = [8, 4], strides = [1, 1]} : vector<8x32xf32> to vector<8x4xf32>
    %80 = vector.broadcast %78 : vector<8x1xf32> to vector<8x4xf32>
    %81 = arith.mulf %80, %79 : vector<8x4xf32>
    %82 = arith.addf %77, %81 : vector<8x4xf32>
    %83 = arith.mulf %55, %73 : vector<8x1xf32>
    %84 = vector.extract_strided_slice %9 {offsets = [0, 8], sizes = [8, 4], strides = [1, 1]} : vector<8x32xf32> to vector<8x4xf32>
    %85 = vector.broadcast %83 : vector<8x1xf32> to vector<8x4xf32>
    %86 = arith.mulf %85, %84 : vector<8x4xf32>
    %87 = arith.addf %82, %86 : vector<8x4xf32>
    %88 = arith.mulf %57, %73 : vector<8x1xf32>
    %89 = vector.extract_strided_slice %9 {offsets = [0, 12], sizes = [8, 4], strides = [1, 1]} : vector<8x32xf32> to vector<8x4xf32>
    %90 = vector.broadcast %88 : vector<8x1xf32> to vector<8x4xf32>
    %91 = arith.mulf %90, %89 : vector<8x4xf32>
    %92 = arith.addf %87, %91 : vector<8x4xf32>
    %93 = arith.mulf %59, %73 : vector<8x1xf32>
    %94 = vector.extract_strided_slice %9 {offsets = [0, 16], sizes = [8, 4], strides = [1, 1]} : vector<8x32xf32> to vector<8x4xf32>
    %95 = vector.broadcast %93 : vector<8x1xf32> to vector<8x4xf32>
    %96 = arith.mulf %95, %94 : vector<8x4xf32>
    %97 = arith.addf %92, %96 : vector<8x4xf32>
    %98 = arith.mulf %61, %73 : vector<8x1xf32>
    %99 = vector.extract_strided_slice %9 {offsets = [0, 20], sizes = [8, 4], strides = [1, 1]} : vector<8x32xf32> to vector<8x4xf32>
    %100 = vector.broadcast %98 : vector<8x1xf32> to vector<8x4xf32>
    %101 = arith.mulf %100, %99 : vector<8x4xf32>
    %102 = arith.addf %97, %101 : vector<8x4xf32>
    %103 = arith.mulf %63, %73 : vector<8x1xf32>
    %104 = vector.extract_strided_slice %9 {offsets = [0, 24], sizes = [8, 4], strides = [1, 1]} : vector<8x32xf32> to vector<8x4xf32>
    %105 = vector.broadcast %103 : vector<8x1xf32> to vector<8x4xf32>
    %106 = arith.mulf %105, %104 : vector<8x4xf32>
    %107 = arith.addf %102, %106 : vector<8x4xf32>
    %108 = arith.mulf %65, %73 : vector<8x1xf32>
    %109 = vector.extract_strided_slice %9 {offsets = [0, 28], sizes = [8, 4], strides = [1, 1]} : vector<8x32xf32> to vector<8x4xf32>
    %110 = vector.broadcast %108 : vector<8x1xf32> to vector<8x4xf32>
    %111 = arith.mulf %110, %109 : vector<8x4xf32>
    %112 = arith.addf %107, %111 : vector<8x4xf32>
    %113 = vector.extract_strided_slice %7 {offsets = [0, 4], sizes = [8, 4], strides = [1, 1]} : vector<8x32xf32> to vector<8x4xf32>
    %114 = vector.extract_strided_slice %8 {offsets = [0, 0], sizes = [8, 4], strides = [1, 1]} : vector<8x32xf32> to vector<8x4xf32>
    %115 = arith.mulf %113, %114 : vector<8x4xf32>
    %cst_14 = arith.constant dense<0.000000e+00> : vector<8xf32>
    %116 = vector.multi_reduction <add>, %115, %cst_14 [1] : vector<8x4xf32> to vector<8xf32>
    %117 = vector.shape_cast %116 : vector<8xf32> to vector<8x1xf32>
    %118 = vector.extract_strided_slice %8 {offsets = [0, 4], sizes = [8, 4], strides = [1, 1]} : vector<8x32xf32> to vector<8x4xf32>
    %119 = arith.mulf %113, %118 : vector<8x4xf32>
    %cst_15 = arith.constant dense<0.000000e+00> : vector<8xf32>
    %120 = vector.multi_reduction <add>, %119, %cst_15 [1] : vector<8x4xf32> to vector<8xf32>
    %121 = vector.shape_cast %120 : vector<8xf32> to vector<8x1xf32>
    %122 = vector.extract_strided_slice %8 {offsets = [0, 8], sizes = [8, 4], strides = [1, 1]} : vector<8x32xf32> to vector<8x4xf32>
    %123 = arith.mulf %113, %122 : vector<8x4xf32>
    %cst_16 = arith.constant dense<0.000000e+00> : vector<8xf32>
    %124 = vector.multi_reduction <add>, %123, %cst_16 [1] : vector<8x4xf32> to vector<8xf32>
    %125 = vector.shape_cast %124 : vector<8xf32> to vector<8x1xf32>
    %126 = vector.extract_strided_slice %8 {offsets = [0, 12], sizes = [8, 4], strides = [1, 1]} : vector<8x32xf32> to vector<8x4xf32>
    %127 = arith.mulf %113, %126 : vector<8x4xf32>
    %cst_17 = arith.constant dense<0.000000e+00> : vector<8xf32>
    %128 = vector.multi_reduction <add>, %127, %cst_17 [1] : vector<8x4xf32> to vector<8xf32>
    %129 = vector.shape_cast %128 : vector<8xf32> to vector<8x1xf32>
    %130 = vector.extract_strided_slice %8 {offsets = [0, 16], sizes = [8, 4], strides = [1, 1]} : vector<8x32xf32> to vector<8x4xf32>
    %131 = arith.mulf %113, %130 : vector<8x4xf32>
    %cst_18 = arith.constant dense<0.000000e+00> : vector<8xf32>
    %132 = vector.multi_reduction <add>, %131, %cst_18 [1] : vector<8x4xf32> to vector<8xf32>
    %133 = vector.shape_cast %132 : vector<8xf32> to vector<8x1xf32>
    %134 = vector.extract_strided_slice %8 {offsets = [0, 20], sizes = [8, 4], strides = [1, 1]} : vector<8x32xf32> to vector<8x4xf32>
    %135 = arith.mulf %113, %134 : vector<8x4xf32>
    %cst_19 = arith.constant dense<0.000000e+00> : vector<8xf32>
    %136 = vector.multi_reduction <add>, %135, %cst_19 [1] : vector<8x4xf32> to vector<8xf32>
    %137 = vector.shape_cast %136 : vector<8xf32> to vector<8x1xf32>
    %138 = vector.extract_strided_slice %8 {offsets = [0, 24], sizes = [8, 4], strides = [1, 1]} : vector<8x32xf32> to vector<8x4xf32>
    %139 = arith.mulf %113, %138 : vector<8x4xf32>
    %cst_20 = arith.constant dense<0.000000e+00> : vector<8xf32>
    %140 = vector.multi_reduction <add>, %139, %cst_20 [1] : vector<8x4xf32> to vector<8xf32>
    %141 = vector.shape_cast %140 : vector<8xf32> to vector<8x1xf32>
    %142 = vector.extract_strided_slice %8 {offsets = [0, 28], sizes = [8, 4], strides = [1, 1]} : vector<8x32xf32> to vector<8x4xf32>
    %143 = arith.mulf %113, %142 : vector<8x4xf32>
    %cst_21 = arith.constant dense<0.000000e+00> : vector<8xf32>
    %144 = vector.multi_reduction <add>, %143, %cst_21 [1] : vector<8x4xf32> to vector<8xf32>
    %145 = vector.shape_cast %144 : vector<8xf32> to vector<8x1xf32>
    %146 = arith.maximumf %117, %121 : vector<8x1xf32>
    %147 = arith.maximumf %146, %125 : vector<8x1xf32>
    %148 = arith.maximumf %147, %129 : vector<8x1xf32>
    %149 = arith.maximumf %148, %133 : vector<8x1xf32>
    %150 = arith.maximumf %149, %137 : vector<8x1xf32>
    %151 = arith.maximumf %150, %141 : vector<8x1xf32>
    %152 = arith.maximumf %151, %145 : vector<8x1xf32>
    %153 = arith.subf %117, %152 : vector<8x1xf32>
    %154 = math.exp %153 : vector<8x1xf32>
    %155 = arith.subf %121, %152 : vector<8x1xf32>
    %156 = math.exp %155 : vector<8x1xf32>
    %157 = arith.subf %125, %152 : vector<8x1xf32>
    %158 = math.exp %157 : vector<8x1xf32>
    %159 = arith.subf %129, %152 : vector<8x1xf32>
    %160 = math.exp %159 : vector<8x1xf32>
    %161 = arith.subf %133, %152 : vector<8x1xf32>
    %162 = math.exp %161 : vector<8x1xf32>
    %163 = arith.subf %137, %152 : vector<8x1xf32>
    %164 = math.exp %163 : vector<8x1xf32>
    %165 = arith.subf %141, %152 : vector<8x1xf32>
    %166 = math.exp %165 : vector<8x1xf32>
    %167 = arith.subf %145, %152 : vector<8x1xf32>
    %168 = math.exp %167 : vector<8x1xf32>
    %169 = arith.addf %154, %156 : vector<8x1xf32>
    %170 = arith.addf %169, %158 : vector<8x1xf32>
    %171 = arith.addf %170, %160 : vector<8x1xf32>
    %172 = arith.addf %171, %162 : vector<8x1xf32>
    %173 = arith.addf %172, %164 : vector<8x1xf32>
    %174 = arith.addf %173, %166 : vector<8x1xf32>
    %175 = arith.addf %174, %168 : vector<8x1xf32>
    %176 = tpu.reciprocal %175 {approx = true} : vector<8x1xf32> -> vector<8x1xf32>
    %177 = arith.mulf %154, %176 : vector<8x1xf32>
    %178 = vector.extract_strided_slice %9 {offsets = [0, 0], sizes = [8, 4], strides = [1, 1]} : vector<8x32xf32> to vector<8x4xf32>
    %179 = vector.broadcast %177 : vector<8x1xf32> to vector<8x4xf32>
    %180 = arith.mulf %179, %178 : vector<8x4xf32>
    %181 = arith.mulf %156, %176 : vector<8x1xf32>
    %182 = vector.extract_strided_slice %9 {offsets = [0, 4], sizes = [8, 4], strides = [1, 1]} : vector<8x32xf32> to vector<8x4xf32>
    %183 = vector.broadcast %181 : vector<8x1xf32> to vector<8x4xf32>
    %184 = arith.mulf %183, %182 : vector<8x4xf32>
    %185 = arith.addf %180, %184 : vector<8x4xf32>
    %186 = arith.mulf %158, %176 : vector<8x1xf32>
    %187 = vector.extract_strided_slice %9 {offsets = [0, 8], sizes = [8, 4], strides = [1, 1]} : vector<8x32xf32> to vector<8x4xf32>
    %188 = vector.broadcast %186 : vector<8x1xf32> to vector<8x4xf32>
    %189 = arith.mulf %188, %187 : vector<8x4xf32>
    %190 = arith.addf %185, %189 : vector<8x4xf32>
    %191 = arith.mulf %160, %176 : vector<8x1xf32>
    %192 = vector.extract_strided_slice %9 {offsets = [0, 12], sizes = [8, 4], strides = [1, 1]} : vector<8x32xf32> to vector<8x4xf32>
    %193 = vector.broadcast %191 : vector<8x1xf32> to vector<8x4xf32>
    %194 = arith.mulf %193, %192 : vector<8x4xf32>
    %195 = arith.addf %190, %194 : vector<8x4xf32>
    %196 = arith.mulf %162, %176 : vector<8x1xf32>
    %197 = vector.extract_strided_slice %9 {offsets = [0, 16], sizes = [8, 4], strides = [1, 1]} : vector<8x32xf32> to vector<8x4xf32>
    %198 = vector.broadcast %196 : vector<8x1xf32> to vector<8x4xf32>
    %199 = arith.mulf %198, %197 : vector<8x4xf32>
    %200 = arith.addf %195, %199 : vector<8x4xf32>
    %201 = arith.mulf %164, %176 : vector<8x1xf32>
    %202 = vector.extract_strided_slice %9 {offsets = [0, 20], sizes = [8, 4], strides = [1, 1]} : vector<8x32xf32> to vector<8x4xf32>
    %203 = vector.broadcast %201 : vector<8x1xf32> to vector<8x4xf32>
    %204 = arith.mulf %203, %202 : vector<8x4xf32>
    %205 = arith.addf %200, %204 : vector<8x4xf32>
    %206 = arith.mulf %166, %176 : vector<8x1xf32>
    %207 = vector.extract_strided_slice %9 {offsets = [0, 24], sizes = [8, 4], strides = [1, 1]} : vector<8x32xf32> to vector<8x4xf32>
    %208 = vector.broadcast %206 : vector<8x1xf32> to vector<8x4xf32>
    %209 = arith.mulf %208, %207 : vector<8x4xf32>
    %210 = arith.addf %205, %209 : vector<8x4xf32>
    %211 = arith.mulf %168, %176 : vector<8x1xf32>
    %212 = vector.extract_strided_slice %9 {offsets = [0, 28], sizes = [8, 4], strides = [1, 1]} : vector<8x32xf32> to vector<8x4xf32>
    %213 = vector.broadcast %211 : vector<8x1xf32> to vector<8x4xf32>
    %214 = arith.mulf %213, %212 : vector<8x4xf32>
    %215 = arith.addf %210, %214 : vector<8x4xf32>
    %216 = vector.extract_strided_slice %7 {offsets = [0, 8], sizes = [8, 4], strides = [1, 1]} : vector<8x32xf32> to vector<8x4xf32>
    %217 = vector.extract_strided_slice %8 {offsets = [0, 0], sizes = [8, 4], strides = [1, 1]} : vector<8x32xf32> to vector<8x4xf32>
    %218 = arith.mulf %216, %217 : vector<8x4xf32>
    %cst_22 = arith.constant dense<0.000000e+00> : vector<8xf32>
    %219 = vector.multi_reduction <add>, %218, %cst_22 [1] : vector<8x4xf32> to vector<8xf32>
    %220 = vector.shape_cast %219 : vector<8xf32> to vector<8x1xf32>
    %221 = vector.extract_strided_slice %8 {offsets = [0, 4], sizes = [8, 4], strides = [1, 1]} : vector<8x32xf32> to vector<8x4xf32>
    %222 = arith.mulf %216, %221 : vector<8x4xf32>
    %cst_23 = arith.constant dense<0.000000e+00> : vector<8xf32>
    %223 = vector.multi_reduction <add>, %222, %cst_23 [1] : vector<8x4xf32> to vector<8xf32>
    %224 = vector.shape_cast %223 : vector<8xf32> to vector<8x1xf32>
    %225 = vector.extract_strided_slice %8 {offsets = [0, 8], sizes = [8, 4], strides = [1, 1]} : vector<8x32xf32> to vector<8x4xf32>
    %226 = arith.mulf %216, %225 : vector<8x4xf32>
    %cst_24 = arith.constant dense<0.000000e+00> : vector<8xf32>
    %227 = vector.multi_reduction <add>, %226, %cst_24 [1] : vector<8x4xf32> to vector<8xf32>
    %228 = vector.shape_cast %227 : vector<8xf32> to vector<8x1xf32>
    %229 = vector.extract_strided_slice %8 {offsets = [0, 12], sizes = [8, 4], strides = [1, 1]} : vector<8x32xf32> to vector<8x4xf32>
    %230 = arith.mulf %216, %229 : vector<8x4xf32>
    %cst_25 = arith.constant dense<0.000000e+00> : vector<8xf32>
    %231 = vector.multi_reduction <add>, %230, %cst_25 [1] : vector<8x4xf32> to vector<8xf32>
    %232 = vector.shape_cast %231 : vector<8xf32> to vector<8x1xf32>
    %233 = vector.extract_strided_slice %8 {offsets = [0, 16], sizes = [8, 4], strides = [1, 1]} : vector<8x32xf32> to vector<8x4xf32>
    %234 = arith.mulf %216, %233 : vector<8x4xf32>
    %cst_26 = arith.constant dense<0.000000e+00> : vector<8xf32>
    %235 = vector.multi_reduction <add>, %234, %cst_26 [1] : vector<8x4xf32> to vector<8xf32>
    %236 = vector.shape_cast %235 : vector<8xf32> to vector<8x1xf32>
    %237 = vector.extract_strided_slice %8 {offsets = [0, 20], sizes = [8, 4], strides = [1, 1]} : vector<8x32xf32> to vector<8x4xf32>
    %238 = arith.mulf %216, %237 : vector<8x4xf32>
    %cst_27 = arith.constant dense<0.000000e+00> : vector<8xf32>
    %239 = vector.multi_reduction <add>, %238, %cst_27 [1] : vector<8x4xf32> to vector<8xf32>
    %240 = vector.shape_cast %239 : vector<8xf32> to vector<8x1xf32>
    %241 = vector.extract_strided_slice %8 {offsets = [0, 24], sizes = [8, 4], strides = [1, 1]} : vector<8x32xf32> to vector<8x4xf32>
    %242 = arith.mulf %216, %241 : vector<8x4xf32>
    %cst_28 = arith.constant dense<0.000000e+00> : vector<8xf32>
    %243 = vector.multi_reduction <add>, %242, %cst_28 [1] : vector<8x4xf32> to vector<8xf32>
    %244 = vector.shape_cast %243 : vector<8xf32> to vector<8x1xf32>
    %245 = vector.extract_strided_slice %8 {offsets = [0, 28], sizes = [8, 4], strides = [1, 1]} : vector<8x32xf32> to vector<8x4xf32>
    %246 = arith.mulf %216, %245 : vector<8x4xf32>
    %cst_29 = arith.constant dense<0.000000e+00> : vector<8xf32>
    %247 = vector.multi_reduction <add>, %246, %cst_29 [1] : vector<8x4xf32> to vector<8xf32>
    %248 = vector.shape_cast %247 : vector<8xf32> to vector<8x1xf32>
    %249 = arith.maximumf %220, %224 : vector<8x1xf32>
    %250 = arith.maximumf %249, %228 : vector<8x1xf32>
    %251 = arith.maximumf %250, %232 : vector<8x1xf32>
    %252 = arith.maximumf %251, %236 : vector<8x1xf32>
    %253 = arith.maximumf %252, %240 : vector<8x1xf32>
    %254 = arith.maximumf %253, %244 : vector<8x1xf32>
    %255 = arith.maximumf %254, %248 : vector<8x1xf32>
    %256 = arith.subf %220, %255 : vector<8x1xf32>
    %257 = math.exp %256 : vector<8x1xf32>
    %258 = arith.subf %224, %255 : vector<8x1xf32>
    %259 = math.exp %258 : vector<8x1xf32>
    %260 = arith.subf %228, %255 : vector<8x1xf32>
    %261 = math.exp %260 : vector<8x1xf32>
    %262 = arith.subf %232, %255 : vector<8x1xf32>
    %263 = math.exp %262 : vector<8x1xf32>
    %264 = arith.subf %236, %255 : vector<8x1xf32>
    %265 = math.exp %264 : vector<8x1xf32>
    %266 = arith.subf %240, %255 : vector<8x1xf32>
    %267 = math.exp %266 : vector<8x1xf32>
    %268 = arith.subf %244, %255 : vector<8x1xf32>
    %269 = math.exp %268 : vector<8x1xf32>
    %270 = arith.subf %248, %255 : vector<8x1xf32>
    %271 = math.exp %270 : vector<8x1xf32>
    %272 = arith.addf %257, %259 : vector<8x1xf32>
    %273 = arith.addf %272, %261 : vector<8x1xf32>
    %274 = arith.addf %273, %263 : vector<8x1xf32>
    %275 = arith.addf %274, %265 : vector<8x1xf32>
    %276 = arith.addf %275, %267 : vector<8x1xf32>
    %277 = arith.addf %276, %269 : vector<8x1xf32>
    %278 = arith.addf %277, %271 : vector<8x1xf32>
    %279 = tpu.reciprocal %278 {approx = true} : vector<8x1xf32> -> vector<8x1xf32>
    %280 = arith.mulf %257, %279 : vector<8x1xf32>
    %281 = vector.extract_strided_slice %9 {offsets = [0, 0], sizes = [8, 4], strides = [1, 1]} : vector<8x32xf32> to vector<8x4xf32>
    %282 = vector.broadcast %280 : vector<8x1xf32> to vector<8x4xf32>
    %283 = arith.mulf %282, %281 : vector<8x4xf32>
    %284 = arith.mulf %259, %279 : vector<8x1xf32>
    %285 = vector.extract_strided_slice %9 {offsets = [0, 4], sizes = [8, 4], strides = [1, 1]} : vector<8x32xf32> to vector<8x4xf32>
    %286 = vector.broadcast %284 : vector<8x1xf32> to vector<8x4xf32>
    %287 = arith.mulf %286, %285 : vector<8x4xf32>
    %288 = arith.addf %283, %287 : vector<8x4xf32>
    %289 = arith.mulf %261, %279 : vector<8x1xf32>
    %290 = vector.extract_strided_slice %9 {offsets = [0, 8], sizes = [8, 4], strides = [1, 1]} : vector<8x32xf32> to vector<8x4xf32>
    %291 = vector.broadcast %289 : vector<8x1xf32> to vector<8x4xf32>
    %292 = arith.mulf %291, %290 : vector<8x4xf32>
    %293 = arith.addf %288, %292 : vector<8x4xf32>
    %294 = arith.mulf %263, %279 : vector<8x1xf32>
    %295 = vector.extract_strided_slice %9 {offsets = [0, 12], sizes = [8, 4], strides = [1, 1]} : vector<8x32xf32> to vector<8x4xf32>
    %296 = vector.broadcast %294 : vector<8x1xf32> to vector<8x4xf32>
    %297 = arith.mulf %296, %295 : vector<8x4xf32>
    %298 = arith.addf %293, %297 : vector<8x4xf32>
    %299 = arith.mulf %265, %279 : vector<8x1xf32>
    %300 = vector.extract_strided_slice %9 {offsets = [0, 16], sizes = [8, 4], strides = [1, 1]} : vector<8x32xf32> to vector<8x4xf32>
    %301 = vector.broadcast %299 : vector<8x1xf32> to vector<8x4xf32>
    %302 = arith.mulf %301, %300 : vector<8x4xf32>
    %303 = arith.addf %298, %302 : vector<8x4xf32>
    %304 = arith.mulf %267, %279 : vector<8x1xf32>
    %305 = vector.extract_strided_slice %9 {offsets = [0, 20], sizes = [8, 4], strides = [1, 1]} : vector<8x32xf32> to vector<8x4xf32>
    %306 = vector.broadcast %304 : vector<8x1xf32> to vector<8x4xf32>
    %307 = arith.mulf %306, %305 : vector<8x4xf32>
    %308 = arith.addf %303, %307 : vector<8x4xf32>
    %309 = arith.mulf %269, %279 : vector<8x1xf32>
    %310 = vector.extract_strided_slice %9 {offsets = [0, 24], sizes = [8, 4], strides = [1, 1]} : vector<8x32xf32> to vector<8x4xf32>
    %311 = vector.broadcast %309 : vector<8x1xf32> to vector<8x4xf32>
    %312 = arith.mulf %311, %310 : vector<8x4xf32>
    %313 = arith.addf %308, %312 : vector<8x4xf32>
    %314 = arith.mulf %271, %279 : vector<8x1xf32>
    %315 = vector.extract_strided_slice %9 {offsets = [0, 28], sizes = [8, 4], strides = [1, 1]} : vector<8x32xf32> to vector<8x4xf32>
    %316 = vector.broadcast %314 : vector<8x1xf32> to vector<8x4xf32>
    %317 = arith.mulf %316, %315 : vector<8x4xf32>
    %318 = arith.addf %313, %317 : vector<8x4xf32>
    %319 = vector.extract_strided_slice %7 {offsets = [0, 12], sizes = [8, 4], strides = [1, 1]} : vector<8x32xf32> to vector<8x4xf32>
    %320 = vector.extract_strided_slice %8 {offsets = [0, 0], sizes = [8, 4], strides = [1, 1]} : vector<8x32xf32> to vector<8x4xf32>
    %321 = arith.mulf %319, %320 : vector<8x4xf32>
    %cst_30 = arith.constant dense<0.000000e+00> : vector<8xf32>
    %322 = vector.multi_reduction <add>, %321, %cst_30 [1] : vector<8x4xf32> to vector<8xf32>
    %323 = vector.shape_cast %322 : vector<8xf32> to vector<8x1xf32>
    %324 = vector.extract_strided_slice %8 {offsets = [0, 4], sizes = [8, 4], strides = [1, 1]} : vector<8x32xf32> to vector<8x4xf32>
    %325 = arith.mulf %319, %324 : vector<8x4xf32>
    %cst_31 = arith.constant dense<0.000000e+00> : vector<8xf32>
    %326 = vector.multi_reduction <add>, %325, %cst_31 [1] : vector<8x4xf32> to vector<8xf32>
    %327 = vector.shape_cast %326 : vector<8xf32> to vector<8x1xf32>
    %328 = vector.extract_strided_slice %8 {offsets = [0, 8], sizes = [8, 4], strides = [1, 1]} : vector<8x32xf32> to vector<8x4xf32>
    %329 = arith.mulf %319, %328 : vector<8x4xf32>
    %cst_32 = arith.constant dense<0.000000e+00> : vector<8xf32>
    %330 = vector.multi_reduction <add>, %329, %cst_32 [1] : vector<8x4xf32> to vector<8xf32>
    %331 = vector.shape_cast %330 : vector<8xf32> to vector<8x1xf32>
    %332 = vector.extract_strided_slice %8 {offsets = [0, 12], sizes = [8, 4], strides = [1, 1]} : vector<8x32xf32> to vector<8x4xf32>
    %333 = arith.mulf %319, %332 : vector<8x4xf32>
    %cst_33 = arith.constant dense<0.000000e+00> : vector<8xf32>
    %334 = vector.multi_reduction <add>, %333, %cst_33 [1] : vector<8x4xf32> to vector<8xf32>
    %335 = vector.shape_cast %334 : vector<8xf32> to vector<8x1xf32>
    %336 = vector.extract_strided_slice %8 {offsets = [0, 16], sizes = [8, 4], strides = [1, 1]} : vector<8x32xf32> to vector<8x4xf32>
    %337 = arith.mulf %319, %336 : vector<8x4xf32>
    %cst_34 = arith.constant dense<0.000000e+00> : vector<8xf32>
    %338 = vector.multi_reduction <add>, %337, %cst_34 [1] : vector<8x4xf32> to vector<8xf32>
    %339 = vector.shape_cast %338 : vector<8xf32> to vector<8x1xf32>
    %340 = vector.extract_strided_slice %8 {offsets = [0, 20], sizes = [8, 4], strides = [1, 1]} : vector<8x32xf32> to vector<8x4xf32>
    %341 = arith.mulf %319, %340 : vector<8x4xf32>
    %cst_35 = arith.constant dense<0.000000e+00> : vector<8xf32>
    %342 = vector.multi_reduction <add>, %341, %cst_35 [1] : vector<8x4xf32> to vector<8xf32>
    %343 = vector.shape_cast %342 : vector<8xf32> to vector<8x1xf32>
    %344 = vector.extract_strided_slice %8 {offsets = [0, 24], sizes = [8, 4], strides = [1, 1]} : vector<8x32xf32> to vector<8x4xf32>
    %345 = arith.mulf %319, %344 : vector<8x4xf32>
    %cst_36 = arith.constant dense<0.000000e+00> : vector<8xf32>
    %346 = vector.multi_reduction <add>, %345, %cst_36 [1] : vector<8x4xf32> to vector<8xf32>
    %347 = vector.shape_cast %346 : vector<8xf32> to vector<8x1xf32>
    %348 = vector.extract_strided_slice %8 {offsets = [0, 28], sizes = [8, 4], strides = [1, 1]} : vector<8x32xf32> to vector<8x4xf32>
    %349 = arith.mulf %319, %348 : vector<8x4xf32>
    %cst_37 = arith.constant dense<0.000000e+00> : vector<8xf32>
    %350 = vector.multi_reduction <add>, %349, %cst_37 [1] : vector<8x4xf32> to vector<8xf32>
    %351 = vector.shape_cast %350 : vector<8xf32> to vector<8x1xf32>
    %352 = arith.maximumf %323, %327 : vector<8x1xf32>
    %353 = arith.maximumf %352, %331 : vector<8x1xf32>
    %354 = arith.maximumf %353, %335 : vector<8x1xf32>
    %355 = arith.maximumf %354, %339 : vector<8x1xf32>
    %356 = arith.maximumf %355, %343 : vector<8x1xf32>
    %357 = arith.maximumf %356, %347 : vector<8x1xf32>
    %358 = arith.maximumf %357, %351 : vector<8x1xf32>
    %359 = arith.subf %323, %358 : vector<8x1xf32>
    %360 = math.exp %359 : vector<8x1xf32>
    %361 = arith.subf %327, %358 : vector<8x1xf32>
    %362 = math.exp %361 : vector<8x1xf32>
    %363 = arith.subf %331, %358 : vector<8x1xf32>
    %364 = math.exp %363 : vector<8x1xf32>
    %365 = arith.subf %335, %358 : vector<8x1xf32>
    %366 = math.exp %365 : vector<8x1xf32>
    %367 = arith.subf %339, %358 : vector<8x1xf32>
    %368 = math.exp %367 : vector<8x1xf32>
    %369 = arith.subf %343, %358 : vector<8x1xf32>
    %370 = math.exp %369 : vector<8x1xf32>
    %371 = arith.subf %347, %358 : vector<8x1xf32>
    %372 = math.exp %371 : vector<8x1xf32>
    %373 = arith.subf %351, %358 : vector<8x1xf32>
    %374 = math.exp %373 : vector<8x1xf32>
    %375 = arith.addf %360, %362 : vector<8x1xf32>
    %376 = arith.addf %375, %364 : vector<8x1xf32>
    %377 = arith.addf %376, %366 : vector<8x1xf32>
    %378 = arith.addf %377, %368 : vector<8x1xf32>
    %379 = arith.addf %378, %370 : vector<8x1xf32>
    %380 = arith.addf %379, %372 : vector<8x1xf32>
    %381 = arith.addf %380, %374 : vector<8x1xf32>
    %382 = tpu.reciprocal %381 {approx = true} : vector<8x1xf32> -> vector<8x1xf32>
    %383 = arith.mulf %360, %382 : vector<8x1xf32>
    %384 = vector.extract_strided_slice %9 {offsets = [0, 0], sizes = [8, 4], strides = [1, 1]} : vector<8x32xf32> to vector<8x4xf32>
    %385 = vector.broadcast %383 : vector<8x1xf32> to vector<8x4xf32>
    %386 = arith.mulf %385, %384 : vector<8x4xf32>
    %387 = arith.mulf %362, %382 : vector<8x1xf32>
    %388 = vector.extract_strided_slice %9 {offsets = [0, 4], sizes = [8, 4], strides = [1, 1]} : vector<8x32xf32> to vector<8x4xf32>
    %389 = vector.broadcast %387 : vector<8x1xf32> to vector<8x4xf32>
    %390 = arith.mulf %389, %388 : vector<8x4xf32>
    %391 = arith.addf %386, %390 : vector<8x4xf32>
    %392 = arith.mulf %364, %382 : vector<8x1xf32>
    %393 = vector.extract_strided_slice %9 {offsets = [0, 8], sizes = [8, 4], strides = [1, 1]} : vector<8x32xf32> to vector<8x4xf32>
    %394 = vector.broadcast %392 : vector<8x1xf32> to vector<8x4xf32>
    %395 = arith.mulf %394, %393 : vector<8x4xf32>
    %396 = arith.addf %391, %395 : vector<8x4xf32>
    %397 = arith.mulf %366, %382 : vector<8x1xf32>
    %398 = vector.extract_strided_slice %9 {offsets = [0, 12], sizes = [8, 4], strides = [1, 1]} : vector<8x32xf32> to vector<8x4xf32>
    %399 = vector.broadcast %397 : vector<8x1xf32> to vector<8x4xf32>
    %400 = arith.mulf %399, %398 : vector<8x4xf32>
    %401 = arith.addf %396, %400 : vector<8x4xf32>
    %402 = arith.mulf %368, %382 : vector<8x1xf32>
    %403 = vector.extract_strided_slice %9 {offsets = [0, 16], sizes = [8, 4], strides = [1, 1]} : vector<8x32xf32> to vector<8x4xf32>
    %404 = vector.broadcast %402 : vector<8x1xf32> to vector<8x4xf32>
    %405 = arith.mulf %404, %403 : vector<8x4xf32>
    %406 = arith.addf %401, %405 : vector<8x4xf32>
    %407 = arith.mulf %370, %382 : vector<8x1xf32>
    %408 = vector.extract_strided_slice %9 {offsets = [0, 20], sizes = [8, 4], strides = [1, 1]} : vector<8x32xf32> to vector<8x4xf32>
    %409 = vector.broadcast %407 : vector<8x1xf32> to vector<8x4xf32>
    %410 = arith.mulf %409, %408 : vector<8x4xf32>
    %411 = arith.addf %406, %410 : vector<8x4xf32>
    %412 = arith.mulf %372, %382 : vector<8x1xf32>
    %413 = vector.extract_strided_slice %9 {offsets = [0, 24], sizes = [8, 4], strides = [1, 1]} : vector<8x32xf32> to vector<8x4xf32>
    %414 = vector.broadcast %412 : vector<8x1xf32> to vector<8x4xf32>
    %415 = arith.mulf %414, %413 : vector<8x4xf32>
    %416 = arith.addf %411, %415 : vector<8x4xf32>
    %417 = arith.mulf %374, %382 : vector<8x1xf32>
    %418 = vector.extract_strided_slice %9 {offsets = [0, 28], sizes = [8, 4], strides = [1, 1]} : vector<8x32xf32> to vector<8x4xf32>
    %419 = vector.broadcast %417 : vector<8x1xf32> to vector<8x4xf32>
    %420 = arith.mulf %419, %418 : vector<8x4xf32>
    %421 = arith.addf %416, %420 : vector<8x4xf32>
    %422 = vector.extract_strided_slice %7 {offsets = [0, 16], sizes = [8, 4], strides = [1, 1]} : vector<8x32xf32> to vector<8x4xf32>
    %423 = vector.extract_strided_slice %8 {offsets = [0, 0], sizes = [8, 4], strides = [1, 1]} : vector<8x32xf32> to vector<8x4xf32>
    %424 = arith.mulf %422, %423 : vector<8x4xf32>
    %cst_38 = arith.constant dense<0.000000e+00> : vector<8xf32>
    %425 = vector.multi_reduction <add>, %424, %cst_38 [1] : vector<8x4xf32> to vector<8xf32>
    %426 = vector.shape_cast %425 : vector<8xf32> to vector<8x1xf32>
    %427 = vector.extract_strided_slice %8 {offsets = [0, 4], sizes = [8, 4], strides = [1, 1]} : vector<8x32xf32> to vector<8x4xf32>
    %428 = arith.mulf %422, %427 : vector<8x4xf32>
    %cst_39 = arith.constant dense<0.000000e+00> : vector<8xf32>
    %429 = vector.multi_reduction <add>, %428, %cst_39 [1] : vector<8x4xf32> to vector<8xf32>
    %430 = vector.shape_cast %429 : vector<8xf32> to vector<8x1xf32>
    %431 = vector.extract_strided_slice %8 {offsets = [0, 8], sizes = [8, 4], strides = [1, 1]} : vector<8x32xf32> to vector<8x4xf32>
    %432 = arith.mulf %422, %431 : vector<8x4xf32>
    %cst_40 = arith.constant dense<0.000000e+00> : vector<8xf32>
    %433 = vector.multi_reduction <add>, %432, %cst_40 [1] : vector<8x4xf32> to vector<8xf32>
    %434 = vector.shape_cast %433 : vector<8xf32> to vector<8x1xf32>
    %435 = vector.extract_strided_slice %8 {offsets = [0, 12], sizes = [8, 4], strides = [1, 1]} : vector<8x32xf32> to vector<8x4xf32>
    %436 = arith.mulf %422, %435 : vector<8x4xf32>
    %cst_41 = arith.constant dense<0.000000e+00> : vector<8xf32>
    %437 = vector.multi_reduction <add>, %436, %cst_41 [1] : vector<8x4xf32> to vector<8xf32>
    %438 = vector.shape_cast %437 : vector<8xf32> to vector<8x1xf32>
    %439 = vector.extract_strided_slice %8 {offsets = [0, 16], sizes = [8, 4], strides = [1, 1]} : vector<8x32xf32> to vector<8x4xf32>
    %440 = arith.mulf %422, %439 : vector<8x4xf32>
    %cst_42 = arith.constant dense<0.000000e+00> : vector<8xf32>
    %441 = vector.multi_reduction <add>, %440, %cst_42 [1] : vector<8x4xf32> to vector<8xf32>
    %442 = vector.shape_cast %441 : vector<8xf32> to vector<8x1xf32>
    %443 = vector.extract_strided_slice %8 {offsets = [0, 20], sizes = [8, 4], strides = [1, 1]} : vector<8x32xf32> to vector<8x4xf32>
    %444 = arith.mulf %422, %443 : vector<8x4xf32>
    %cst_43 = arith.constant dense<0.000000e+00> : vector<8xf32>
    %445 = vector.multi_reduction <add>, %444, %cst_43 [1] : vector<8x4xf32> to vector<8xf32>
    %446 = vector.shape_cast %445 : vector<8xf32> to vector<8x1xf32>
    %447 = vector.extract_strided_slice %8 {offsets = [0, 24], sizes = [8, 4], strides = [1, 1]} : vector<8x32xf32> to vector<8x4xf32>
    %448 = arith.mulf %422, %447 : vector<8x4xf32>
    %cst_44 = arith.constant dense<0.000000e+00> : vector<8xf32>
    %449 = vector.multi_reduction <add>, %448, %cst_44 [1] : vector<8x4xf32> to vector<8xf32>
    %450 = vector.shape_cast %449 : vector<8xf32> to vector<8x1xf32>
    %451 = vector.extract_strided_slice %8 {offsets = [0, 28], sizes = [8, 4], strides = [1, 1]} : vector<8x32xf32> to vector<8x4xf32>
    %452 = arith.mulf %422, %451 : vector<8x4xf32>
    %cst_45 = arith.constant dense<0.000000e+00> : vector<8xf32>
    %453 = vector.multi_reduction <add>, %452, %cst_45 [1] : vector<8x4xf32> to vector<8xf32>
    %454 = vector.shape_cast %453 : vector<8xf32> to vector<8x1xf32>
    %455 = arith.maximumf %426, %430 : vector<8x1xf32>
    %456 = arith.maximumf %455, %434 : vector<8x1xf32>
    %457 = arith.maximumf %456, %438 : vector<8x1xf32>
    %458 = arith.maximumf %457, %442 : vector<8x1xf32>
    %459 = arith.maximumf %458, %446 : vector<8x1xf32>
    %460 = arith.maximumf %459, %450 : vector<8x1xf32>
    %461 = arith.maximumf %460, %454 : vector<8x1xf32>
    %462 = arith.subf %426, %461 : vector<8x1xf32>
    %463 = math.exp %462 : vector<8x1xf32>
    %464 = arith.subf %430, %461 : vector<8x1xf32>
    %465 = math.exp %464 : vector<8x1xf32>
    %466 = arith.subf %434, %461 : vector<8x1xf32>
    %467 = math.exp %466 : vector<8x1xf32>
    %468 = arith.subf %438, %461 : vector<8x1xf32>
    %469 = math.exp %468 : vector<8x1xf32>
    %470 = arith.subf %442, %461 : vector<8x1xf32>
    %471 = math.exp %470 : vector<8x1xf32>
    %472 = arith.subf %446, %461 : vector<8x1xf32>
    %473 = math.exp %472 : vector<8x1xf32>
    %474 = arith.subf %450, %461 : vector<8x1xf32>
    %475 = math.exp %474 : vector<8x1xf32>
    %476 = arith.subf %454, %461 : vector<8x1xf32>
    %477 = math.exp %476 : vector<8x1xf32>
    %478 = arith.addf %463, %465 : vector<8x1xf32>
    %479 = arith.addf %478, %467 : vector<8x1xf32>
    %480 = arith.addf %479, %469 : vector<8x1xf32>
    %481 = arith.addf %480, %471 : vector<8x1xf32>
    %482 = arith.addf %481, %473 : vector<8x1xf32>
    %483 = arith.addf %482, %475 : vector<8x1xf32>
    %484 = arith.addf %483, %477 : vector<8x1xf32>
    %485 = tpu.reciprocal %484 {approx = true} : vector<8x1xf32> -> vector<8x1xf32>
    %486 = arith.mulf %463, %485 : vector<8x1xf32>
    %487 = vector.extract_strided_slice %9 {offsets = [0, 0], sizes = [8, 4], strides = [1, 1]} : vector<8x32xf32> to vector<8x4xf32>
    %488 = vector.broadcast %486 : vector<8x1xf32> to vector<8x4xf32>
    %489 = arith.mulf %488, %487 : vector<8x4xf32>
    %490 = arith.mulf %465, %485 : vector<8x1xf32>
    %491 = vector.extract_strided_slice %9 {offsets = [0, 4], sizes = [8, 4], strides = [1, 1]} : vector<8x32xf32> to vector<8x4xf32>
    %492 = vector.broadcast %490 : vector<8x1xf32> to vector<8x4xf32>
    %493 = arith.mulf %492, %491 : vector<8x4xf32>
    %494 = arith.addf %489, %493 : vector<8x4xf32>
    %495 = arith.mulf %467, %485 : vector<8x1xf32>
    %496 = vector.extract_strided_slice %9 {offsets = [0, 8], sizes = [8, 4], strides = [1, 1]} : vector<8x32xf32> to vector<8x4xf32>
    %497 = vector.broadcast %495 : vector<8x1xf32> to vector<8x4xf32>
    %498 = arith.mulf %497, %496 : vector<8x4xf32>
    %499 = arith.addf %494, %498 : vector<8x4xf32>
    %500 = arith.mulf %469, %485 : vector<8x1xf32>
    %501 = vector.extract_strided_slice %9 {offsets = [0, 12], sizes = [8, 4], strides = [1, 1]} : vector<8x32xf32> to vector<8x4xf32>
    %502 = vector.broadcast %500 : vector<8x1xf32> to vector<8x4xf32>
    %503 = arith.mulf %502, %501 : vector<8x4xf32>
    %504 = arith.addf %499, %503 : vector<8x4xf32>
    %505 = arith.mulf %471, %485 : vector<8x1xf32>
    %506 = vector.extract_strided_slice %9 {offsets = [0, 16], sizes = [8, 4], strides = [1, 1]} : vector<8x32xf32> to vector<8x4xf32>
    %507 = vector.broadcast %505 : vector<8x1xf32> to vector<8x4xf32>
    %508 = arith.mulf %507, %506 : vector<8x4xf32>
    %509 = arith.addf %504, %508 : vector<8x4xf32>
    %510 = arith.mulf %473, %485 : vector<8x1xf32>
    %511 = vector.extract_strided_slice %9 {offsets = [0, 20], sizes = [8, 4], strides = [1, 1]} : vector<8x32xf32> to vector<8x4xf32>
    %512 = vector.broadcast %510 : vector<8x1xf32> to vector<8x4xf32>
    %513 = arith.mulf %512, %511 : vector<8x4xf32>
    %514 = arith.addf %509, %513 : vector<8x4xf32>
    %515 = arith.mulf %475, %485 : vector<8x1xf32>
    %516 = vector.extract_strided_slice %9 {offsets = [0, 24], sizes = [8, 4], strides = [1, 1]} : vector<8x32xf32> to vector<8x4xf32>
    %517 = vector.broadcast %515 : vector<8x1xf32> to vector<8x4xf32>
    %518 = arith.mulf %517, %516 : vector<8x4xf32>
    %519 = arith.addf %514, %518 : vector<8x4xf32>
    %520 = arith.mulf %477, %485 : vector<8x1xf32>
    %521 = vector.extract_strided_slice %9 {offsets = [0, 28], sizes = [8, 4], strides = [1, 1]} : vector<8x32xf32> to vector<8x4xf32>
    %522 = vector.broadcast %520 : vector<8x1xf32> to vector<8x4xf32>
    %523 = arith.mulf %522, %521 : vector<8x4xf32>
    %524 = arith.addf %519, %523 : vector<8x4xf32>
    %525 = vector.extract_strided_slice %7 {offsets = [0, 20], sizes = [8, 4], strides = [1, 1]} : vector<8x32xf32> to vector<8x4xf32>
    %526 = vector.extract_strided_slice %8 {offsets = [0, 0], sizes = [8, 4], strides = [1, 1]} : vector<8x32xf32> to vector<8x4xf32>
    %527 = arith.mulf %525, %526 : vector<8x4xf32>
    %cst_46 = arith.constant dense<0.000000e+00> : vector<8xf32>
    %528 = vector.multi_reduction <add>, %527, %cst_46 [1] : vector<8x4xf32> to vector<8xf32>
    %529 = vector.shape_cast %528 : vector<8xf32> to vector<8x1xf32>
    %530 = vector.extract_strided_slice %8 {offsets = [0, 4], sizes = [8, 4], strides = [1, 1]} : vector<8x32xf32> to vector<8x4xf32>
    %531 = arith.mulf %525, %530 : vector<8x4xf32>
    %cst_47 = arith.constant dense<0.000000e+00> : vector<8xf32>
    %532 = vector.multi_reduction <add>, %531, %cst_47 [1] : vector<8x4xf32> to vector<8xf32>
    %533 = vector.shape_cast %532 : vector<8xf32> to vector<8x1xf32>
    %534 = vector.extract_strided_slice %8 {offsets = [0, 8], sizes = [8, 4], strides = [1, 1]} : vector<8x32xf32> to vector<8x4xf32>
    %535 = arith.mulf %525, %534 : vector<8x4xf32>
    %cst_48 = arith.constant dense<0.000000e+00> : vector<8xf32>
    %536 = vector.multi_reduction <add>, %535, %cst_48 [1] : vector<8x4xf32> to vector<8xf32>
    %537 = vector.shape_cast %536 : vector<8xf32> to vector<8x1xf32>
    %538 = vector.extract_strided_slice %8 {offsets = [0, 12], sizes = [8, 4], strides = [1, 1]} : vector<8x32xf32> to vector<8x4xf32>
    %539 = arith.mulf %525, %538 : vector<8x4xf32>
    %cst_49 = arith.constant dense<0.000000e+00> : vector<8xf32>
    %540 = vector.multi_reduction <add>, %539, %cst_49 [1] : vector<8x4xf32> to vector<8xf32>
    %541 = vector.shape_cast %540 : vector<8xf32> to vector<8x1xf32>
    %542 = vector.extract_strided_slice %8 {offsets = [0, 16], sizes = [8, 4], strides = [1, 1]} : vector<8x32xf32> to vector<8x4xf32>
    %543 = arith.mulf %525, %542 : vector<8x4xf32>
    %cst_50 = arith.constant dense<0.000000e+00> : vector<8xf32>
    %544 = vector.multi_reduction <add>, %543, %cst_50 [1] : vector<8x4xf32> to vector<8xf32>
    %545 = vector.shape_cast %544 : vector<8xf32> to vector<8x1xf32>
    %546 = vector.extract_strided_slice %8 {offsets = [0, 20], sizes = [8, 4], strides = [1, 1]} : vector<8x32xf32> to vector<8x4xf32>
    %547 = arith.mulf %525, %546 : vector<8x4xf32>
    %cst_51 = arith.constant dense<0.000000e+00> : vector<8xf32>
    %548 = vector.multi_reduction <add>, %547, %cst_51 [1] : vector<8x4xf32> to vector<8xf32>
    %549 = vector.shape_cast %548 : vector<8xf32> to vector<8x1xf32>
    %550 = vector.extract_strided_slice %8 {offsets = [0, 24], sizes = [8, 4], strides = [1, 1]} : vector<8x32xf32> to vector<8x4xf32>
    %551 = arith.mulf %525, %550 : vector<8x4xf32>
    %cst_52 = arith.constant dense<0.000000e+00> : vector<8xf32>
    %552 = vector.multi_reduction <add>, %551, %cst_52 [1] : vector<8x4xf32> to vector<8xf32>
    %553 = vector.shape_cast %552 : vector<8xf32> to vector<8x1xf32>
    %554 = vector.extract_strided_slice %8 {offsets = [0, 28], sizes = [8, 4], strides = [1, 1]} : vector<8x32xf32> to vector<8x4xf32>
    %555 = arith.mulf %525, %554 : vector<8x4xf32>
    %cst_53 = arith.constant dense<0.000000e+00> : vector<8xf32>
    %556 = vector.multi_reduction <add>, %555, %cst_53 [1] : vector<8x4xf32> to vector<8xf32>
    %557 = vector.shape_cast %556 : vector<8xf32> to vector<8x1xf32>
    %558 = arith.maximumf %529, %533 : vector<8x1xf32>
    %559 = arith.maximumf %558, %537 : vector<8x1xf32>
    %560 = arith.maximumf %559, %541 : vector<8x1xf32>
    %561 = arith.maximumf %560, %545 : vector<8x1xf32>
    %562 = arith.maximumf %561, %549 : vector<8x1xf32>
    %563 = arith.maximumf %562, %553 : vector<8x1xf32>
    %564 = arith.maximumf %563, %557 : vector<8x1xf32>
    %565 = arith.subf %529, %564 : vector<8x1xf32>
    %566 = math.exp %565 : vector<8x1xf32>
    %567 = arith.subf %533, %564 : vector<8x1xf32>
    %568 = math.exp %567 : vector<8x1xf32>
    %569 = arith.subf %537, %564 : vector<8x1xf32>
    %570 = math.exp %569 : vector<8x1xf32>
    %571 = arith.subf %541, %564 : vector<8x1xf32>
    %572 = math.exp %571 : vector<8x1xf32>
    %573 = arith.subf %545, %564 : vector<8x1xf32>
    %574 = math.exp %573 : vector<8x1xf32>
    %575 = arith.subf %549, %564 : vector<8x1xf32>
    %576 = math.exp %575 : vector<8x1xf32>
    %577 = arith.subf %553, %564 : vector<8x1xf32>
    %578 = math.exp %577 : vector<8x1xf32>
    %579 = arith.subf %557, %564 : vector<8x1xf32>
    %580 = math.exp %579 : vector<8x1xf32>
    %581 = arith.addf %566, %568 : vector<8x1xf32>
    %582 = arith.addf %581, %570 : vector<8x1xf32>
    %583 = arith.addf %582, %572 : vector<8x1xf32>
    %584 = arith.addf %583, %574 : vector<8x1xf32>
    %585 = arith.addf %584, %576 : vector<8x1xf32>
    %586 = arith.addf %585, %578 : vector<8x1xf32>
    %587 = arith.addf %586, %580 : vector<8x1xf32>
    %588 = tpu.reciprocal %587 {approx = true} : vector<8x1xf32> -> vector<8x1xf32>
    %589 = arith.mulf %566, %588 : vector<8x1xf32>
    %590 = vector.extract_strided_slice %9 {offsets = [0, 0], sizes = [8, 4], strides = [1, 1]} : vector<8x32xf32> to vector<8x4xf32>
    %591 = vector.broadcast %589 : vector<8x1xf32> to vector<8x4xf32>
    %592 = arith.mulf %591, %590 : vector<8x4xf32>
    %593 = arith.mulf %568, %588 : vector<8x1xf32>
    %594 = vector.extract_strided_slice %9 {offsets = [0, 4], sizes = [8, 4], strides = [1, 1]} : vector<8x32xf32> to vector<8x4xf32>
    %595 = vector.broadcast %593 : vector<8x1xf32> to vector<8x4xf32>
    %596 = arith.mulf %595, %594 : vector<8x4xf32>
    %597 = arith.addf %592, %596 : vector<8x4xf32>
    %598 = arith.mulf %570, %588 : vector<8x1xf32>
    %599 = vector.extract_strided_slice %9 {offsets = [0, 8], sizes = [8, 4], strides = [1, 1]} : vector<8x32xf32> to vector<8x4xf32>
    %600 = vector.broadcast %598 : vector<8x1xf32> to vector<8x4xf32>
    %601 = arith.mulf %600, %599 : vector<8x4xf32>
    %602 = arith.addf %597, %601 : vector<8x4xf32>
    %603 = arith.mulf %572, %588 : vector<8x1xf32>
    %604 = vector.extract_strided_slice %9 {offsets = [0, 12], sizes = [8, 4], strides = [1, 1]} : vector<8x32xf32> to vector<8x4xf32>
    %605 = vector.broadcast %603 : vector<8x1xf32> to vector<8x4xf32>
    %606 = arith.mulf %605, %604 : vector<8x4xf32>
    %607 = arith.addf %602, %606 : vector<8x4xf32>
    %608 = arith.mulf %574, %588 : vector<8x1xf32>
    %609 = vector.extract_strided_slice %9 {offsets = [0, 16], sizes = [8, 4], strides = [1, 1]} : vector<8x32xf32> to vector<8x4xf32>
    %610 = vector.broadcast %608 : vector<8x1xf32> to vector<8x4xf32>
    %611 = arith.mulf %610, %609 : vector<8x4xf32>
    %612 = arith.addf %607, %611 : vector<8x4xf32>
    %613 = arith.mulf %576, %588 : vector<8x1xf32>
    %614 = vector.extract_strided_slice %9 {offsets = [0, 20], sizes = [8, 4], strides = [1, 1]} : vector<8x32xf32> to vector<8x4xf32>
    %615 = vector.broadcast %613 : vector<8x1xf32> to vector<8x4xf32>
    %616 = arith.mulf %615, %614 : vector<8x4xf32>
    %617 = arith.addf %612, %616 : vector<8x4xf32>
    %618 = arith.mulf %578, %588 : vector<8x1xf32>
    %619 = vector.extract_strided_slice %9 {offsets = [0, 24], sizes = [8, 4], strides = [1, 1]} : vector<8x32xf32> to vector<8x4xf32>
    %620 = vector.broadcast %618 : vector<8x1xf32> to vector<8x4xf32>
    %621 = arith.mulf %620, %619 : vector<8x4xf32>
    %622 = arith.addf %617, %621 : vector<8x4xf32>
    %623 = arith.mulf %580, %588 : vector<8x1xf32>
    %624 = vector.extract_strided_slice %9 {offsets = [0, 28], sizes = [8, 4], strides = [1, 1]} : vector<8x32xf32> to vector<8x4xf32>
    %625 = vector.broadcast %623 : vector<8x1xf32> to vector<8x4xf32>
    %626 = arith.mulf %625, %624 : vector<8x4xf32>
    %627 = arith.addf %622, %626 : vector<8x4xf32>
    %628 = vector.extract_strided_slice %7 {offsets = [0, 24], sizes = [8, 4], strides = [1, 1]} : vector<8x32xf32> to vector<8x4xf32>
    %629 = vector.extract_strided_slice %8 {offsets = [0, 0], sizes = [8, 4], strides = [1, 1]} : vector<8x32xf32> to vector<8x4xf32>
    %630 = arith.mulf %628, %629 : vector<8x4xf32>
    %cst_54 = arith.constant dense<0.000000e+00> : vector<8xf32>
    %631 = vector.multi_reduction <add>, %630, %cst_54 [1] : vector<8x4xf32> to vector<8xf32>
    %632 = vector.shape_cast %631 : vector<8xf32> to vector<8x1xf32>
    %633 = vector.extract_strided_slice %8 {offsets = [0, 4], sizes = [8, 4], strides = [1, 1]} : vector<8x32xf32> to vector<8x4xf32>
    %634 = arith.mulf %628, %633 : vector<8x4xf32>
    %cst_55 = arith.constant dense<0.000000e+00> : vector<8xf32>
    %635 = vector.multi_reduction <add>, %634, %cst_55 [1] : vector<8x4xf32> to vector<8xf32>
    %636 = vector.shape_cast %635 : vector<8xf32> to vector<8x1xf32>
    %637 = vector.extract_strided_slice %8 {offsets = [0, 8], sizes = [8, 4], strides = [1, 1]} : vector<8x32xf32> to vector<8x4xf32>
    %638 = arith.mulf %628, %637 : vector<8x4xf32>
    %cst_56 = arith.constant dense<0.000000e+00> : vector<8xf32>
    %639 = vector.multi_reduction <add>, %638, %cst_56 [1] : vector<8x4xf32> to vector<8xf32>
    %640 = vector.shape_cast %639 : vector<8xf32> to vector<8x1xf32>
    %641 = vector.extract_strided_slice %8 {offsets = [0, 12], sizes = [8, 4], strides = [1, 1]} : vector<8x32xf32> to vector<8x4xf32>
    %642 = arith.mulf %628, %641 : vector<8x4xf32>
    %cst_57 = arith.constant dense<0.000000e+00> : vector<8xf32>
    %643 = vector.multi_reduction <add>, %642, %cst_57 [1] : vector<8x4xf32> to vector<8xf32>
    %644 = vector.shape_cast %643 : vector<8xf32> to vector<8x1xf32>
    %645 = vector.extract_strided_slice %8 {offsets = [0, 16], sizes = [8, 4], strides = [1, 1]} : vector<8x32xf32> to vector<8x4xf32>
    %646 = arith.mulf %628, %645 : vector<8x4xf32>
    %cst_58 = arith.constant dense<0.000000e+00> : vector<8xf32>
    %647 = vector.multi_reduction <add>, %646, %cst_58 [1] : vector<8x4xf32> to vector<8xf32>
    %648 = vector.shape_cast %647 : vector<8xf32> to vector<8x1xf32>
    %649 = vector.extract_strided_slice %8 {offsets = [0, 20], sizes = [8, 4], strides = [1, 1]} : vector<8x32xf32> to vector<8x4xf32>
    %650 = arith.mulf %628, %649 : vector<8x4xf32>
    %cst_59 = arith.constant dense<0.000000e+00> : vector<8xf32>
    %651 = vector.multi_reduction <add>, %650, %cst_59 [1] : vector<8x4xf32> to vector<8xf32>
    %652 = vector.shape_cast %651 : vector<8xf32> to vector<8x1xf32>
    %653 = vector.extract_strided_slice %8 {offsets = [0, 24], sizes = [8, 4], strides = [1, 1]} : vector<8x32xf32> to vector<8x4xf32>
    %654 = arith.mulf %628, %653 : vector<8x4xf32>
    %cst_60 = arith.constant dense<0.000000e+00> : vector<8xf32>
    %655 = vector.multi_reduction <add>, %654, %cst_60 [1] : vector<8x4xf32> to vector<8xf32>
    %656 = vector.shape_cast %655 : vector<8xf32> to vector<8x1xf32>
    %657 = vector.extract_strided_slice %8 {offsets = [0, 28], sizes = [8, 4], strides = [1, 1]} : vector<8x32xf32> to vector<8x4xf32>
    %658 = arith.mulf %628, %657 : vector<8x4xf32>
    %cst_61 = arith.constant dense<0.000000e+00> : vector<8xf32>
    %659 = vector.multi_reduction <add>, %658, %cst_61 [1] : vector<8x4xf32> to vector<8xf32>
    %660 = vector.shape_cast %659 : vector<8xf32> to vector<8x1xf32>
    %661 = arith.maximumf %632, %636 : vector<8x1xf32>
    %662 = arith.maximumf %661, %640 : vector<8x1xf32>
    %663 = arith.maximumf %662, %644 : vector<8x1xf32>
    %664 = arith.maximumf %663, %648 : vector<8x1xf32>
    %665 = arith.maximumf %664, %652 : vector<8x1xf32>
    %666 = arith.maximumf %665, %656 : vector<8x1xf32>
    %667 = arith.maximumf %666, %660 : vector<8x1xf32>
    %668 = arith.subf %632, %667 : vector<8x1xf32>
    %669 = math.exp %668 : vector<8x1xf32>
    %670 = arith.subf %636, %667 : vector<8x1xf32>
    %671 = math.exp %670 : vector<8x1xf32>
    %672 = arith.subf %640, %667 : vector<8x1xf32>
    %673 = math.exp %672 : vector<8x1xf32>
    %674 = arith.subf %644, %667 : vector<8x1xf32>
    %675 = math.exp %674 : vector<8x1xf32>
    %676 = arith.subf %648, %667 : vector<8x1xf32>
    %677 = math.exp %676 : vector<8x1xf32>
    %678 = arith.subf %652, %667 : vector<8x1xf32>
    %679 = math.exp %678 : vector<8x1xf32>
    %680 = arith.subf %656, %667 : vector<8x1xf32>
    %681 = math.exp %680 : vector<8x1xf32>
    %682 = arith.subf %660, %667 : vector<8x1xf32>
    %683 = math.exp %682 : vector<8x1xf32>
    %684 = arith.addf %669, %671 : vector<8x1xf32>
    %685 = arith.addf %684, %673 : vector<8x1xf32>
    %686 = arith.addf %685, %675 : vector<8x1xf32>
    %687 = arith.addf %686, %677 : vector<8x1xf32>
    %688 = arith.addf %687, %679 : vector<8x1xf32>
    %689 = arith.addf %688, %681 : vector<8x1xf32>
    %690 = arith.addf %689, %683 : vector<8x1xf32>
    %691 = tpu.reciprocal %690 {approx = true} : vector<8x1xf32> -> vector<8x1xf32>
    %692 = arith.mulf %669, %691 : vector<8x1xf32>
    %693 = vector.extract_strided_slice %9 {offsets = [0, 0], sizes = [8, 4], strides = [1, 1]} : vector<8x32xf32> to vector<8x4xf32>
    %694 = vector.broadcast %692 : vector<8x1xf32> to vector<8x4xf32>
    %695 = arith.mulf %694, %693 : vector<8x4xf32>
    %696 = arith.mulf %671, %691 : vector<8x1xf32>
    %697 = vector.extract_strided_slice %9 {offsets = [0, 4], sizes = [8, 4], strides = [1, 1]} : vector<8x32xf32> to vector<8x4xf32>
    %698 = vector.broadcast %696 : vector<8x1xf32> to vector<8x4xf32>
    %699 = arith.mulf %698, %697 : vector<8x4xf32>
    %700 = arith.addf %695, %699 : vector<8x4xf32>
    %701 = arith.mulf %673, %691 : vector<8x1xf32>
    %702 = vector.extract_strided_slice %9 {offsets = [0, 8], sizes = [8, 4], strides = [1, 1]} : vector<8x32xf32> to vector<8x4xf32>
    %703 = vector.broadcast %701 : vector<8x1xf32> to vector<8x4xf32>
    %704 = arith.mulf %703, %702 : vector<8x4xf32>
    %705 = arith.addf %700, %704 : vector<8x4xf32>
    %706 = arith.mulf %675, %691 : vector<8x1xf32>
    %707 = vector.extract_strided_slice %9 {offsets = [0, 12], sizes = [8, 4], strides = [1, 1]} : vector<8x32xf32> to vector<8x4xf32>
    %708 = vector.broadcast %706 : vector<8x1xf32> to vector<8x4xf32>
    %709 = arith.mulf %708, %707 : vector<8x4xf32>
    %710 = arith.addf %705, %709 : vector<8x4xf32>
    %711 = arith.mulf %677, %691 : vector<8x1xf32>
    %712 = vector.extract_strided_slice %9 {offsets = [0, 16], sizes = [8, 4], strides = [1, 1]} : vector<8x32xf32> to vector<8x4xf32>
    %713 = vector.broadcast %711 : vector<8x1xf32> to vector<8x4xf32>
    %714 = arith.mulf %713, %712 : vector<8x4xf32>
    %715 = arith.addf %710, %714 : vector<8x4xf32>
    %716 = arith.mulf %679, %691 : vector<8x1xf32>
    %717 = vector.extract_strided_slice %9 {offsets = [0, 20], sizes = [8, 4], strides = [1, 1]} : vector<8x32xf32> to vector<8x4xf32>
    %718 = vector.broadcast %716 : vector<8x1xf32> to vector<8x4xf32>
    %719 = arith.mulf %718, %717 : vector<8x4xf32>
    %720 = arith.addf %715, %719 : vector<8x4xf32>
    %721 = arith.mulf %681, %691 : vector<8x1xf32>
    %722 = vector.extract_strided_slice %9 {offsets = [0, 24], sizes = [8, 4], strides = [1, 1]} : vector<8x32xf32> to vector<8x4xf32>
    %723 = vector.broadcast %721 : vector<8x1xf32> to vector<8x4xf32>
    %724 = arith.mulf %723, %722 : vector<8x4xf32>
    %725 = arith.addf %720, %724 : vector<8x4xf32>
    %726 = arith.mulf %683, %691 : vector<8x1xf32>
    %727 = vector.extract_strided_slice %9 {offsets = [0, 28], sizes = [8, 4], strides = [1, 1]} : vector<8x32xf32> to vector<8x4xf32>
    %728 = vector.broadcast %726 : vector<8x1xf32> to vector<8x4xf32>
    %729 = arith.mulf %728, %727 : vector<8x4xf32>
    %730 = arith.addf %725, %729 : vector<8x4xf32>
    %731 = vector.extract_strided_slice %7 {offsets = [0, 28], sizes = [8, 4], strides = [1, 1]} : vector<8x32xf32> to vector<8x4xf32>
    %732 = vector.extract_strided_slice %8 {offsets = [0, 0], sizes = [8, 4], strides = [1, 1]} : vector<8x32xf32> to vector<8x4xf32>
    %733 = arith.mulf %731, %732 : vector<8x4xf32>
    %cst_62 = arith.constant dense<0.000000e+00> : vector<8xf32>
    %734 = vector.multi_reduction <add>, %733, %cst_62 [1] : vector<8x4xf32> to vector<8xf32>
    %735 = vector.shape_cast %734 : vector<8xf32> to vector<8x1xf32>
    %736 = vector.extract_strided_slice %8 {offsets = [0, 4], sizes = [8, 4], strides = [1, 1]} : vector<8x32xf32> to vector<8x4xf32>
    %737 = arith.mulf %731, %736 : vector<8x4xf32>
    %cst_63 = arith.constant dense<0.000000e+00> : vector<8xf32>
    %738 = vector.multi_reduction <add>, %737, %cst_63 [1] : vector<8x4xf32> to vector<8xf32>
    %739 = vector.shape_cast %738 : vector<8xf32> to vector<8x1xf32>
    %740 = vector.extract_strided_slice %8 {offsets = [0, 8], sizes = [8, 4], strides = [1, 1]} : vector<8x32xf32> to vector<8x4xf32>
    %741 = arith.mulf %731, %740 : vector<8x4xf32>
    %cst_64 = arith.constant dense<0.000000e+00> : vector<8xf32>
    %742 = vector.multi_reduction <add>, %741, %cst_64 [1] : vector<8x4xf32> to vector<8xf32>
    %743 = vector.shape_cast %742 : vector<8xf32> to vector<8x1xf32>
    %744 = vector.extract_strided_slice %8 {offsets = [0, 12], sizes = [8, 4], strides = [1, 1]} : vector<8x32xf32> to vector<8x4xf32>
    %745 = arith.mulf %731, %744 : vector<8x4xf32>
    %cst_65 = arith.constant dense<0.000000e+00> : vector<8xf32>
    %746 = vector.multi_reduction <add>, %745, %cst_65 [1] : vector<8x4xf32> to vector<8xf32>
    %747 = vector.shape_cast %746 : vector<8xf32> to vector<8x1xf32>
    %748 = vector.extract_strided_slice %8 {offsets = [0, 16], sizes = [8, 4], strides = [1, 1]} : vector<8x32xf32> to vector<8x4xf32>
    %749 = arith.mulf %731, %748 : vector<8x4xf32>
    %cst_66 = arith.constant dense<0.000000e+00> : vector<8xf32>
    %750 = vector.multi_reduction <add>, %749, %cst_66 [1] : vector<8x4xf32> to vector<8xf32>
    %751 = vector.shape_cast %750 : vector<8xf32> to vector<8x1xf32>
    %752 = vector.extract_strided_slice %8 {offsets = [0, 20], sizes = [8, 4], strides = [1, 1]} : vector<8x32xf32> to vector<8x4xf32>
    %753 = arith.mulf %731, %752 : vector<8x4xf32>
    %cst_67 = arith.constant dense<0.000000e+00> : vector<8xf32>
    %754 = vector.multi_reduction <add>, %753, %cst_67 [1] : vector<8x4xf32> to vector<8xf32>
    %755 = vector.shape_cast %754 : vector<8xf32> to vector<8x1xf32>
    %756 = vector.extract_strided_slice %8 {offsets = [0, 24], sizes = [8, 4], strides = [1, 1]} : vector<8x32xf32> to vector<8x4xf32>
    %757 = arith.mulf %731, %756 : vector<8x4xf32>
    %cst_68 = arith.constant dense<0.000000e+00> : vector<8xf32>
    %758 = vector.multi_reduction <add>, %757, %cst_68 [1] : vector<8x4xf32> to vector<8xf32>
    %759 = vector.shape_cast %758 : vector<8xf32> to vector<8x1xf32>
    %760 = vector.extract_strided_slice %8 {offsets = [0, 28], sizes = [8, 4], strides = [1, 1]} : vector<8x32xf32> to vector<8x4xf32>
    %761 = arith.mulf %731, %760 : vector<8x4xf32>
    %cst_69 = arith.constant dense<0.000000e+00> : vector<8xf32>
    %762 = vector.multi_reduction <add>, %761, %cst_69 [1] : vector<8x4xf32> to vector<8xf32>
    %763 = vector.shape_cast %762 : vector<8xf32> to vector<8x1xf32>
    %764 = arith.maximumf %735, %739 : vector<8x1xf32>
    %765 = arith.maximumf %764, %743 : vector<8x1xf32>
    %766 = arith.maximumf %765, %747 : vector<8x1xf32>
    %767 = arith.maximumf %766, %751 : vector<8x1xf32>
    %768 = arith.maximumf %767, %755 : vector<8x1xf32>
    %769 = arith.maximumf %768, %759 : vector<8x1xf32>
    %770 = arith.maximumf %769, %763 : vector<8x1xf32>
    %771 = arith.subf %735, %770 : vector<8x1xf32>
    %772 = math.exp %771 : vector<8x1xf32>
    %773 = arith.subf %739, %770 : vector<8x1xf32>
    %774 = math.exp %773 : vector<8x1xf32>
    %775 = arith.subf %743, %770 : vector<8x1xf32>
    %776 = math.exp %775 : vector<8x1xf32>
    %777 = arith.subf %747, %770 : vector<8x1xf32>
    %778 = math.exp %777 : vector<8x1xf32>
    %779 = arith.subf %751, %770 : vector<8x1xf32>
    %780 = math.exp %779 : vector<8x1xf32>
    %781 = arith.subf %755, %770 : vector<8x1xf32>
    %782 = math.exp %781 : vector<8x1xf32>
    %783 = arith.subf %759, %770 : vector<8x1xf32>
    %784 = math.exp %783 : vector<8x1xf32>
    %785 = arith.subf %763, %770 : vector<8x1xf32>
    %786 = math.exp %785 : vector<8x1xf32>
    %787 = arith.addf %772, %774 : vector<8x1xf32>
    %788 = arith.addf %787, %776 : vector<8x1xf32>
    %789 = arith.addf %788, %778 : vector<8x1xf32>
    %790 = arith.addf %789, %780 : vector<8x1xf32>
    %791 = arith.addf %790, %782 : vector<8x1xf32>
    %792 = arith.addf %791, %784 : vector<8x1xf32>
    %793 = arith.addf %792, %786 : vector<8x1xf32>
    %794 = tpu.reciprocal %793 {approx = true} : vector<8x1xf32> -> vector<8x1xf32>
    %795 = arith.mulf %772, %794 : vector<8x1xf32>
    %796 = vector.extract_strided_slice %9 {offsets = [0, 0], sizes = [8, 4], strides = [1, 1]} : vector<8x32xf32> to vector<8x4xf32>
    %797 = vector.broadcast %795 : vector<8x1xf32> to vector<8x4xf32>
    %798 = arith.mulf %797, %796 : vector<8x4xf32>
    %799 = arith.mulf %774, %794 : vector<8x1xf32>
    %800 = vector.extract_strided_slice %9 {offsets = [0, 4], sizes = [8, 4], strides = [1, 1]} : vector<8x32xf32> to vector<8x4xf32>
    %801 = vector.broadcast %799 : vector<8x1xf32> to vector<8x4xf32>
    %802 = arith.mulf %801, %800 : vector<8x4xf32>
    %803 = arith.addf %798, %802 : vector<8x4xf32>
    %804 = arith.mulf %776, %794 : vector<8x1xf32>
    %805 = vector.extract_strided_slice %9 {offsets = [0, 8], sizes = [8, 4], strides = [1, 1]} : vector<8x32xf32> to vector<8x4xf32>
    %806 = vector.broadcast %804 : vector<8x1xf32> to vector<8x4xf32>
    %807 = arith.mulf %806, %805 : vector<8x4xf32>
    %808 = arith.addf %803, %807 : vector<8x4xf32>
    %809 = arith.mulf %778, %794 : vector<8x1xf32>
    %810 = vector.extract_strided_slice %9 {offsets = [0, 12], sizes = [8, 4], strides = [1, 1]} : vector<8x32xf32> to vector<8x4xf32>
    %811 = vector.broadcast %809 : vector<8x1xf32> to vector<8x4xf32>
    %812 = arith.mulf %811, %810 : vector<8x4xf32>
    %813 = arith.addf %808, %812 : vector<8x4xf32>
    %814 = arith.mulf %780, %794 : vector<8x1xf32>
    %815 = vector.extract_strided_slice %9 {offsets = [0, 16], sizes = [8, 4], strides = [1, 1]} : vector<8x32xf32> to vector<8x4xf32>
    %816 = vector.broadcast %814 : vector<8x1xf32> to vector<8x4xf32>
    %817 = arith.mulf %816, %815 : vector<8x4xf32>
    %818 = arith.addf %813, %817 : vector<8x4xf32>
    %819 = arith.mulf %782, %794 : vector<8x1xf32>
    %820 = vector.extract_strided_slice %9 {offsets = [0, 20], sizes = [8, 4], strides = [1, 1]} : vector<8x32xf32> to vector<8x4xf32>
    %821 = vector.broadcast %819 : vector<8x1xf32> to vector<8x4xf32>
    %822 = arith.mulf %821, %820 : vector<8x4xf32>
    %823 = arith.addf %818, %822 : vector<8x4xf32>
    %824 = arith.mulf %784, %794 : vector<8x1xf32>
    %825 = vector.extract_strided_slice %9 {offsets = [0, 24], sizes = [8, 4], strides = [1, 1]} : vector<8x32xf32> to vector<8x4xf32>
    %826 = vector.broadcast %824 : vector<8x1xf32> to vector<8x4xf32>
    %827 = arith.mulf %826, %825 : vector<8x4xf32>
    %828 = arith.addf %823, %827 : vector<8x4xf32>
    %829 = arith.mulf %786, %794 : vector<8x1xf32>
    %830 = vector.extract_strided_slice %9 {offsets = [0, 28], sizes = [8, 4], strides = [1, 1]} : vector<8x32xf32> to vector<8x4xf32>
    %831 = vector.broadcast %829 : vector<8x1xf32> to vector<8x4xf32>
    %832 = arith.mulf %831, %830 : vector<8x4xf32>
    %833 = arith.addf %828, %832 : vector<8x4xf32>
    %834 = tpu.concatenate %112, %215, %318, %421, %524, %627, %730, %833 in 1 : vector<8x4xf32>, vector<8x4xf32>, vector<8x4xf32>, vector<8x4xf32>, vector<8x4xf32>, vector<8x4xf32>, vector<8x4xf32>, vector<8x4xf32> -> vector<8x32xf32>
    %835 = arith.truncf %834 : vector<8x32xf32> to vector<8x32xbf16>
    %c0_70 = arith.constant 0 : index
    %c0_71 = arith.constant 0 : index
    %836 = vector.load %arg4[%c0_70, %c0_71] : memref<32x32xbf16, #tpu.memory_space<vmem>>, vector<32x32xbf16>
    %cst_72 = arith.constant dense<0.000000e+00> : vector<8x32xf32>
    %837 = tpu.matmul %835, %836, %cst_72 {dimension_numbers = #tpu.dot_dimension_numbers<[1], [0], [0], [1], [0, 0, 1, 1], [], []>} : vector<8x32xbf16>, vector<32x32xbf16>, vector<8x32xf32> -> vector<8x32xf32>
    %c0_73 = arith.constant 0 : index
    %c0_74 = arith.constant 0 : index
    %838 = vector.load %arg5[%c0_73, %c0_74] : memref<8x32xf32, #tpu.memory_space<vmem>>, vector<8x32xf32>
    tpu.vector_store %arg5[%c0_73, %c0_74], %837 {strides = array<i32>} : memref<8x32xf32, #tpu.memory_space<vmem>>, vector<8x32xf32>,
    return
  }
  func.func @transform_0(%arg0: i32) -> (i32, i32) {
    %c0_i32 = arith.constant 0 : i32
    %c0_i32_0 = arith.constant 0 : i32
    return %arg0, %c0_i32 : i32, i32
  }
  func.func @transform_1(%arg0: i32) -> (i32, i32) {
    %c0_i32 = arith.constant 0 : i32
    %c0_i32_0 = arith.constant 0 : i32
    %c0_i32_1 = arith.constant 0 : i32
    return %c0_i32, %c0_i32_0 : i32, i32
  }
  func.func @transform_2(%arg0: i32) -> (i32, i32) {
    %c0_i32 = arith.constant 0 : i32
    %c0_i32_0 = arith.constant 0 : i32
    %c0_i32_1 = arith.constant 0 : i32
    return %c0_i32, %c0_i32_0 : i32, i32
  }
  func.func @transform_3(%arg0: i32) -> (i32, i32) {
    %c0_i32 = arith.constant 0 : i32
    %c0_i32_0 = arith.constant 0 : i32
    %c0_i32_1 = arith.constant 0 : i32
    return %c0_i32, %c0_i32_0 : i32, i32
  }
  func.func @transform_4(%arg0: i32) -> (i32, i32) {
    %c0_i32 = arith.constant 0 : i32
    %c0_i32_0 = arith.constant 0 : i32
    return %arg0, %c0_i32 : i32, i32
  }
}

</mosaic_0001>

<bundles_post_ra>
// kernel: tpu_custom_call.1
= control target key start
LH: loop header
LB: loop body
LE: loop exit
PB: predicated region body
PF: predicated region fallthrough
CT: control target
= control target key end

     0   :  { %9 = vsyncpa [#allocation3], 0  ;;  %s2759_s0 = inlined_call_operand.hbm [shape: f32[8,32], index: 0, kind: input, shape index: {}]   ;;  %s2760_s1 = inlined_call_operand.hbm [shape: bf16[32,96], index: 1, kind: input, shape index: {}]   ;;  %s2761_s2 = inlined_call_operand.hbm [shape: bf16[96,96], index: 2, kind: input, shape index: {}]   ;;  %s2762_s3 = inlined_call_operand.hbm [shape: bf16[32,32], index: 3, kind: input, shape index: {}]   ;;  %s2763_s4 = inlined_call_operand.hbm [shape: f32[8,32], index: 4, kind: output, shape index: {}]  }
   0x1   :  { %10 = vsyncpa [#allocation6], 0 }
   0x2   :  { %11 = vsyncpa [#allocation9], 0 }
   0x3   :  { %12 = vsyncpa [#allocation4], 0  ;;  %s1860_s15 = smov [#allocation5]   ;;  %s1742_s19 = scalar_lea.hbm %s2760_s1, 256 }
   0x4   :  { %s28_s16 = sshll.u32 %s1860_s15, 4  ;;  %p1743_p0 = scmp.ne.s32.totalorder %s2760_s1, %s1742_s19  ;;  %s29_s16 = int_to_ptr.vmem [resolvable:$true] %s28_s16 }
   0x5   :  { %p1746_p1 = scmp.lt.u32.totalorder %s1742_s19, %s2760_s1 }
   0x7   :  { %p1748_p2 = pnand %p1746_p1, %p1743_p0 }
   0x9   :  { %1751 = shalt.err (!%p1748_p2)
}
   0xa   :  { %s1752_s24 = scalar_lea.vmem %s29_s16, 256  ;;  %p1757_p4 = scmp.lt.s32.totalorder %s29_s16, %s29_s16 }
   0xb   :  { %p1753_p3 = scmp.ne.s32.totalorder %s29_s16, %s1752_s24  ;;  %p1758_p5 = scmp.lt.s32.totalorder %s1752_s24, %s1752_s24 }
   0xd   :  { %p1759_p6 = por %p1758_p5, %p1757_p4 }
   0xf   :  { %p1760_p7 = pnand %p1759_p6, %p1753_p3 }
  0x11   :  { %1763 = shalt.err (!%p1760_p7)
}
  0x12   :  { %s1861_s25 = smov 64   ;;  %s1862_s26 = smov 4  }
  0x13   :  { %34 = dma.hbm_to_vmem [thread:$0]  %s2760_s1, 256, %s29_s16, [#allocation6], %s1861_s25, %s1861_s25, %s1862_s26  }
  0x14   :  { %s1863_s29 = smov [#allocation2]   ;;  %s1864_s5 = smov [#allocation7]  }
  0x15   :  { %s19_s30 = sshll.u32 %s1863_s29, 4  ;;  %s40_s6 = sshll.u32 %s1864_s5, 4  ;;  %s20_s30 = int_to_ptr.vmem [resolvable:$true] %s19_s30  ;;  %s41_s6 = int_to_ptr.vmem [resolvable:$true] %s40_s6 }
  0x16   :  { %s1764_s9 = scalar_lea.hbm %s2759_s0, 128 }
  0x17   :  { %p1765_p8 = scmp.ne.s32.totalorder %s2759_s0, %s1764_s9  ;;  %p1768_p9 = scmp.lt.u32.totalorder %s1764_s9, %s2759_s0 }
  0x19   :  { %p1770_p10 = pnand %p1768_p9, %p1765_p8 }
  0x1b   :  { %1773 = shalt.err (!%p1770_p10)
}
  0x1c   :  { %s1774_s1 = scalar_lea.vmem %s20_s30, 128  ;;  %p1779_p12 = scmp.lt.s32.totalorder %s20_s30, %s20_s30 }
  0x1d   :  { %p1775_p11 = scmp.ne.s32.totalorder %s20_s30, %s1774_s1  ;;  %p1780_p13 = scmp.lt.s32.totalorder %s1774_s1, %s1774_s1 }
  0x1f   :  { %p1781_p0 = por %p1780_p13, %p1779_p12 }
  0x21   :  { %p1782_p1 = pnand %p1781_p0, %p1775_p11 }
  0x23   :  { %1785 = shalt.err (!%p1782_p1)
}
  0x24   :  { %22 = dma.hbm_to_vmem [thread:$0]  %s2759_s0, 128, %s20_s30, [#allocation3]  }
  0x25   :  { %s1786_s18 = scalar_lea.hbm %s2761_s2, 768 }
  0x26   :  { %p1787_p2 = scmp.ne.s32.totalorder %s2761_s2, %s1786_s18  ;;  %p1790_p3 = scmp.lt.u32.totalorder %s1786_s18, %s2761_s2 }
  0x28   :  { %p1792_p4 = pnand %p1790_p3, %p1787_p2 }
  0x2a   :  { %1795 = shalt.err (!%p1792_p4)
}
  0x2b   :  { %s1796_s23 = scalar_lea.vmem %s41_s6, 768  ;;  %p1801_p6 = scmp.lt.s32.totalorder %s41_s6, %s41_s6 }
  0x2c   :  { %p1797_p5 = scmp.ne.s32.totalorder %s41_s6, %s1796_s23  ;;  %p1802_p7 = scmp.lt.s32.totalorder %s1796_s23, %s1796_s23 }
  0x2e   :  { %p1803_p8 = por %p1802_p7, %p1801_p6 }
  0x30   :  { %p1804_p9 = pnand %p1803_p8, %p1797_p5 }
  0x32   :  { %1807 = shalt.err (!%p1804_p9)
}
  0x33   :  { %46 = dma.hbm_to_vmem [thread:$0]  %s2761_s2, 768, %s41_s6, [#allocation6], %s1861_s25, %s1861_s25, %s1862_s26  }
  0x34   :  { %s1865_s27 = smov [#allocation8]   ;;  %s1808_s5 = scalar_lea.hbm %s2762_s3, 256 }
  0x35   :  { %s52_s28 = sshll.u32 %s1865_s27, 4  ;;  %p1809_p10 = scmp.ne.s32.totalorder %s2762_s3, %s1808_s5  ;;  %s53_s28 = int_to_ptr.vmem [resolvable:$true] %s52_s28 }
  0x36   :  { %p1812_p11 = scmp.lt.u32.totalorder %s1808_s5, %s2762_s3 }
  0x38   :  { %p1814_p12 = pnand %p1812_p11, %p1809_p10 }
  0x3a   :  { %1817 = shalt.err (!%p1814_p12)
}
  0x3b   :  { %s1818_s11 = scalar_lea.vmem %s53_s28, 256  ;;  %p1823_p0 = scmp.lt.s32.totalorder %s53_s28, %s53_s28 }
  0x3c   :  { %p1819_p13 = scmp.ne.s32.totalorder %s53_s28, %s1818_s11  ;;  %p1824_p1 = scmp.lt.s32.totalorder %s1818_s11, %s1818_s11 }
  0x3e   :  { %p1825_p2 = por %p1824_p1, %p1823_p0 }
  0x40   :  { %p1826_p3 = pnand %p1825_p2, %p1819_p13 }
  0x42   :  { %1829 = shalt.err (!%p1826_p3)
}
  0x43   :  { %58 = dma.hbm_to_vmem [thread:$0]  %s2762_s3, 256, %s53_s28, [#allocation9], %s1861_s25, %s1861_s25, %s1862_s26  }
  0x44   :  { %1852 = dma.done.wait [#allocation3], 128  }
  0x45   :  { %1853 = vsyncadd [#allocation3], 4294967168 }
  0x46   :  { %1854 = dma.done.wait [#allocation6], 1024  }
  0x47   :  { %1855 = vsyncadd [#allocation6], 4294966272 }
  0x48   :  { %1856 = dma.done.wait [#allocation9], 256  }
  0x49   :  { %1857 = vsyncadd [#allocation9], 4294967040  ;;  %v1866_v0 = vmov 0.0   ;;  %vm1867_vm0 = vmmov 0   ;;  %v1588_v1 = vld [vmem:[#allocation5] sm:$0xff]   ;;  %v1589_v2 = vld [vmem:[#allocation5 + $0x8] sm:$0xff]  }
  0x4a   :  { %1532 = vmatprep.subr.bf16.mxu0 %v1866_v0  ;;  %1536 = vmatprep.mubr.msk.bf16.mxu0 %vm1867_vm0, %v1866_v0  ;;  %v72_v3 = vld [vmem:[#allocation2] sm:$0xff]  ;;  %v1590_v4 = vld [vmem:[#allocation7] sm:$0xff]   ;;  %vm90_vm1 = vcmask 261120   ;;  %v1592_v7 = vld [vmem:[#allocation7 + $0x10] sm:$0xff]   ;;  %vm183_vm2 = vcmask 785408   ;;  %s1868_s3 = smov 92  }
  0x4b   :  { %1540 = vmatprep.subr.bf16.mxu1 %v1866_v0  ;;  %1552 = vmatprep.mubr.msk.bf16.mxu1 %vm1867_vm0, %v1866_v0  ;;  %v73_v5 = vpack.c.bf16 %v72_v3, %v72_v3  ;;  %v1591_v6 = vld [vmem:[#allocation7 + $0x8] sm:$0xff]   ;;  %v1593_v8 = vld [vmem:[#allocation7 + $0x18] sm:$0xff]   ;;  %v1594_v9 = vld [vmem:[#allocation7 + $0x20] sm:$0xff]   ;;  %s1869_s26 = smov 96   ;;  %s1870_s12 = smov 84   ;;  %vm232_vm3 = vcmask 31744  }
  0x4c   :  { %1533 = vmatpush3.bf16.msra.mxu0 %v1588_v1  ;;  %1541 = vmatpush3.bf16.msra.mxu1 %v1590_v4  ;;  %v1595_v10 = vld [vmem:[#allocation7 + $0x28] sm:$0xff]   ;;  %s1871_s13 = smov 88   ;;  %s1872_s1 = smov 80   ;;  %vm1416_vm4 = vcmask 64512   ;;  %vm1418_vm5 = vcmask 97280   ;;  %vm1420_vm6 = vcmask 130048  }
  0x4d   :  { %1534 = vmatprep.subr.bf16.mxu0 %v1866_v0  ;;  %1542 = vmatprep.subr.bf16.mxu1 %v1866_v0  ;;  %s1873_s14 = smov 76   ;;  %s1874_s15 = smov 72   ;;  %vm1422_vm7 = vcmask 162816   ;;  %vm1424_vm8 = vcmask 195584   ;;  %vm1426_vm9 = vcmask 228352  }
  0x4e   :  { %s1875_s16 = smov 68   ;;  %s1876_s17 = smov 100  }
  0x4f   :  { %s1877_s18 = smov 104   ;;  %s1878_s19 = smov 108  }
  0x50   :  { %1535 = vmatpush3.bf16.msra.mxu0 %v1589_v2  ;;  %1543 = vmatpush3.bf16.msra.mxu1 %v1591_v6  ;;  %s1879_s20 = smov 112   ;;  %s1880_s21 = smov 124  }
  0x51   :  { %1556 = vmatprep.subr.bf16.mxu0 %v1866_v0  ;;  %1544 = vmatprep.subr.bf16.mxu1 %v1866_v0  ;;  %s1881_s22 = smov 120   ;;  %s1882_s23 = smov 116  }
  0x53   :  { %1537 = vmatmul.mubr.msk.bf16.vlgmr.msra.gmra.mrb[0].mxu0 %vm90_vm1, %v73_v5 }
  0x54   :  { %1560 = vmatprep.mubr.msk.bf16.mxu0 %vm1867_vm0, %v1866_v0  ;;  %1545 = vmatpush3.bf16.msra.mxu1 %v1592_v7 }
  0x55   :  { %1546 = vmatprep.subr.bf16.mxu1 %v1866_v0 }
  0x58   :  { %1547 = vmatpush3.bf16.msra.mxu1 %v1593_v8 }
  0x59   :  { %1548 = vmatprep.subr.bf16.mxu1 %v1866_v0 }
  0x5c   :  { %1549 = vmatpush3.bf16.msra.mxu1 %v1594_v9 }
  0x5d   :  { %1550 = vmatprep.subr.bf16.mxu1 %v1866_v0 }
  0x60   :  { %1551 = vmatpush3.bf16.msra.mxu1 %v1595_v10 }
 0x126   :  { %v128_v11 = vpop.f32.mrb[0].mxu0 }
 0x127   :  { %v134_v12 = vpack.c.bf16 %v128_v11, %v128_v11  ;;  %v1538_v13 = vpop.f32.mrb[1].mxu0 }
 0x128   :  { %v131_v14 = vpop.f32.mrb[2].mxu0 }
 0x129   :  { %v1539_v15 = vpop.f32.mrb[3].mxu0  ;;  %1553 = vmatmul.mubr.msk.bf16.vlgmr.msra.gmra.mrb[0].mxu1 %vm183_vm2, %v134_v12 }
 0x1fc   :  { %v1982_v16 = vpop.f32.mrb[0].mxu1 }
 0x1fd   :  { %236 = vrot.lane.b32.xlu1 %v1982_v16, %s1868_s3  ;;  %228 = vrot.lane.b32.xlu0 %v1982_v16, %s1869_s26  ;;  %v1554_v17 = vpop.f32.mrb[1].mxu1 }
 0x1fe   :  { %v224_v18 = vpop.f32.mrb[2].mxu1 }
 0x1ff   :  { %v1555_v19 = vpop.f32.mrb[3].mxu1 }
 0x201   :  { %250 = vrot.lane.b32.xlu1 %v1982_v16, %s1870_s12  ;;  %243 = vrot.lane.b32.xlu0 %v1982_v16, %s1871_s13 }
 0x205   :  { %257 = vrot.lane.b32.xlu1 %v1982_v16, %s1872_s1  ;;  %264 = vrot.lane.b32.xlu0 %v1982_v16, %s1873_s14 }
 0x209   :  { %271 = vrot.lane.b32.xlu1 %v1982_v16, %s1874_s15 }
 0x20d   :  { %278 = vrot.lane.b32.xlu1 %v1982_v16, %s1875_s16 }
 0x211   :  { %375 = vrot.lane.b32.xlu1 %v1982_v16, %s1876_s17 }
 0x215   :  { %525 = vrot.lane.b32.xlu1 %v1982_v16, %s1877_s18 }
 0x219   :  { %668 = vrot.lane.b32.xlu1 %v1982_v16, %s1878_s19 }
 0x21d   :  { %811 = vrot.lane.b32.xlu1 %v1982_v16, %s1879_s20 }
 0x26f   :  { %v237_v20 = vpop.permute.xlu1 %236  ;;  %v229_v25 = vpop.permute.xlu0 %228 }
 0x270   :  { %v2008_v21 = vmul.f32 %v237_v20, %v1982_v16  ;;  %v2015_v27 = vmul.f32 %v229_v25, %v1982_v16 }
 0x272   :  { %394 = vrot.lane.b32.xlu1 %v2008_v21, %s1880_s21  ;;  %v240_v40 = vsel %vm232_vm3, %v2008_v21, 0.0  ;;  %v233_v49 = vsel %vm232_vm3, %v2015_v27, 0.0 }
 0x273   :  { %v251_v22 = vpop.permute.xlu1 %250  ;;  %v244_v32 = vpop.permute.xlu0 %243 }
 0x274   :  { %v2020_v29 = vmul.f32 %v251_v22, %v1982_v16  ;;  %v2032_v33 = vmul.f32 %v244_v32, %v1982_v16 }
 0x276   :  { %v247_v42 = vsel %vm232_vm3, %v2032_v33, 0.0  ;;  %v254_v50 = vsel %vm232_vm3, %v2020_v29, 0.0 }
 0x277   :  { %v258_v23 = vpop.permute.xlu1 %257  ;;  %v265_v36 = vpop.permute.xlu0 %264 }
 0x278   :  { %v260_v24 = vmul.f32 %v258_v23, %v1982_v16  ;;  %v267_v37 = vmul.f32 %v265_v36, %v1982_v16 }
 0x27a   :  { %415 = vrot.lane.b32.xlu1 %v260_v24, %s1880_s21  ;;  %v261_v43 = vsel %vm232_vm3, %v260_v24, 0.0  ;;  %v268_v45 = vsel %vm232_vm3, %v267_v37, 0.0 }
 0x27b   :  { %v272_v26 = vpop.permute.xlu1 %271 }
 0x27c   :  { %v274_v38 = vmul.f32 %v272_v26, %v1982_v16 }
 0x27e   :  { %542 = vrot.lane.b32.xlu1 %v2015_v27, %s1881_s22  ;;  %v275_v52 = vsel %vm232_vm3, %v274_v38, 0.0 }
 0x27f   :  { %v279_v28 = vpop.permute.xlu1 %278 }
 0x280   :  { %v281_v44 = vmul.f32 %v279_v28, %v1982_v16 }
 0x282   :  { %560 = vrot.lane.b32.xlu1 %v2020_v29, %s1881_s22  ;;  %v282_v46 = vsel %vm232_vm3, %v281_v44, 0.0 }
 0x283   :  { %v376_v30 = vpop.permute.xlu1 %375 }
 0x284   :  { %v2025_v31 = vmul.f32 %v376_v30, %v1982_v16 }
 0x286   :  { %380 = vrot.lane.b32.xlu0 %v2025_v31, %s1880_s21  ;;  %685 = vrot.lane.b32.xlu1 %v2025_v31, %s1882_s23 }
 0x287   :  { %v526_v34 = vpop.permute.xlu1 %525 }
 0x288   :  { %v2039_v35 = vmul.f32 %v526_v34, %v1982_v16 }
 0x28a   :  { %387 = vrot.lane.b32.xlu0 %v2015_v27, %s1880_s21  ;;  %703 = vrot.lane.b32.xlu1 %v2032_v33, %s1882_s23 }
 0x28b   :  { %v669_v39 = vpop.permute.xlu1 %668 }
 0x28c   :  { %v2064_v41 = vmul.f32 %v669_v39, %v1982_v16 }
 0x28e   :  { %828 = vrot.lane.b32.xlu1 %v2039_v35, %s1879_s20  ;;  %401 = vrot.lane.b32.xlu0 %v2032_v33, %s1880_s21 }
 0x28f   :  { %v812_v47 = vpop.permute.xlu1 %811 }
 0x290   :  { %v2084_v48 = vmul.f32 %v812_v47, %v1982_v16 }
 0x292   :  { %408 = vrot.lane.b32.xlu0 %v2020_v29, %s1880_s21 }
 0x296   :  { %422 = vrot.lane.b32.xlu0 %v267_v37, %s1880_s21 }
 0x29a   :  { %429 = vrot.lane.b32.xlu0 %v274_v38, %s1880_s21 }
 0x29e   :  { %530 = vrot.lane.b32.xlu0 %v2039_v35, %s1881_s22 }
 0x2a2   :  { %536 = vrot.lane.b32.xlu0 %v2025_v31, %s1881_s22 }
 0x2a6   :  { %548 = vrot.lane.b32.xlu0 %v2008_v21, %s1881_s22 }
 0x2aa   :  { %554 = vrot.lane.b32.xlu0 %v2032_v33, %s1881_s22 }
 0x2ae   :  { %566 = vrot.lane.b32.xlu0 %v260_v24, %s1881_s22 }
 0x2b2   :  { %241 = vadd.xlane.f32.xlu1 %v240_v40  ;;  %572 = vrot.lane.b32.xlu0 %v267_v37, %s1881_s22 }
 0x2b6   :  { %248 = vadd.xlane.f32.xlu1 %v247_v42  ;;  %673 = vrot.lane.b32.xlu0 %v2064_v41, %s1882_s23 }
 0x2ba   :  { %262 = vadd.xlane.f32.xlu1 %v261_v43  ;;  %679 = vrot.lane.b32.xlu0 %v2039_v35, %s1882_s23 }
 0x2be   :  { %691 = vrot.lane.b32.xlu0 %v2015_v27, %s1882_s23  ;;  %269 = vadd.xlane.f32.xlu1 %v268_v45 }
 0x2c2   :  { %697 = vrot.lane.b32.xlu0 %v2008_v21, %s1882_s23  ;;  %283 = vadd.xlane.f32.xlu1 %v282_v46 }
 0x2c6   :  { %709 = vrot.lane.b32.xlu0 %v2020_v29, %s1882_s23 }
 0x2ca   :  { %715 = vrot.lane.b32.xlu0 %v260_v24, %s1882_s23 }
 0x2ce   :  { %816 = vrot.lane.b32.xlu0 %v2084_v48, %s1879_s20 }
 0x2d2   :  { %822 = vrot.lane.b32.xlu0 %v2064_v41, %s1879_s20 }
 0x2e4   :  { %v395_v56 = vpop.permute.xlu1 %394 }
 0x2e5   :  { %v397_v58 = vsel %vm232_vm3, %v395_v56, 0.0 }
 0x2ec   :  { %v416_v62 = vpop.permute.xlu1 %415 }
 0x2ed   :  { %v418_v1 = vsel %vm232_vm3, %v416_v62, 0.0 }
 0x2f0   :  { %v543_v9 = vpop.permute.xlu1 %542 }
 0x2f1   :  { %234 = vadd.xlane.f32.xlu0 %v233_v49  ;;  %v545_v11 = vsel %vm232_vm3, %v543_v9, 0.0 }
 0x2f4   :  { %v561_v15 = vpop.permute.xlu1 %560 }
 0x2f5   :  { %255 = vadd.xlane.f32.xlu0 %v254_v50  ;;  %v563_v18 = vsel %vm232_vm3, %v561_v15, 0.0 }
 0x2f8   :  { %v381_v51 = vpop.permute.xlu0 %380  ;;  %v686_v28 = vpop.permute.xlu1 %685 }
 0x2f9   :  { %276 = vadd.xlane.f32.xlu0 %v275_v52  ;;  %v383_v53 = vsel %vm232_vm3, %v381_v51, 0.0  ;;  %v688_v32 = vsel %vm232_vm3, %v686_v28, 0.0 }
 0x2fa   :  { %384 = vadd.xlane.f32.xlu1 %v383_v53 }
 0x2fc   :  { %v388_v54 = vpop.permute.xlu0 %387  ;;  %v704_v38 = vpop.permute.xlu1 %703 }
 0x2fd   :  { %v390_v55 = vsel %vm232_vm3, %v388_v54, 0.0  ;;  %v706_v40 = vsel %vm232_vm3, %v704_v38, 0.0 }
 0x2fe   :  { %391 = vadd.xlane.f32.xlu0 %v390_v55 }
 0x300   :  { %v402_v57 = vpop.permute.xlu0 %401  ;;  %v829_v50 = vpop.permute.xlu1 %828 }
 0x301   :  { %v404_v59 = vsel %vm232_vm3, %v402_v57, 0.0  ;;  %v831_v51 = vsel %vm232_vm3, %v829_v50, 0.0 }
 0x302   :  { %398 = vadd.xlane.f32.xlu0 %v397_v58  ;;  %405 = vadd.xlane.f32.xlu1 %v404_v59 }
 0x304   :  { %v409_v60 = vpop.permute.xlu0 %408 }
 0x305   :  { %v411_v61 = vsel %vm232_vm3, %v409_v60, 0.0 }
 0x306   :  { %412 = vadd.xlane.f32.xlu0 %v411_v61 }
 0x308   :  { %v423_v63 = vpop.permute.xlu0 %422 }
 0x309   :  { %v425_v2 = vsel %vm232_vm3, %v423_v63, 0.0 }
 0x30a   :  { %419 = vadd.xlane.f32.xlu0 %v418_v1  ;;  %426 = vadd.xlane.f32.xlu1 %v425_v2 }
 0x30c   :  { %v430_v3 = vpop.permute.xlu0 %429 }
 0x30d   :  { %v432_v4 = vsel %vm232_vm3, %v430_v3, 0.0 }
 0x30e   :  { %433 = vadd.xlane.f32.xlu0 %v432_v4 }
 0x310   :  { %v531_v5 = vpop.permute.xlu0 %530 }
 0x311   :  { %v533_v6 = vsel %vm232_vm3, %v531_v5, 0.0 }
 0x312   :  { %534 = vadd.xlane.f32.xlu1 %v533_v6 }
 0x314   :  { %v537_v7 = vpop.permute.xlu0 %536 }
 0x315   :  { %v539_v8 = vsel %vm232_vm3, %v537_v7, 0.0 }
 0x316   :  { %540 = vadd.xlane.f32.xlu0 %v539_v8 }
 0x318   :  { %v549_v10 = vpop.permute.xlu0 %548 }
 0x319   :  { %v551_v12 = vsel %vm232_vm3, %v549_v10, 0.0 }
 0x31a   :  { %546 = vadd.xlane.f32.xlu0 %v545_v11  ;;  %552 = vadd.xlane.f32.xlu1 %v551_v12 }
 0x31c   :  { %v555_v13 = vpop.permute.xlu0 %554 }
 0x31d   :  { %v557_v14 = vsel %vm232_vm3, %v555_v13, 0.0 }
 0x31e   :  { %558 = vadd.xlane.f32.xlu0 %v557_v14 }
 0x320   :  { %v567_v17 = vpop.permute.xlu0 %566 }
 0x321   :  { %v569_v19 = vsel %vm232_vm3, %v567_v17, 0.0 }
 0x322   :  { %564 = vadd.xlane.f32.xlu0 %v563_v18  ;;  %570 = vadd.xlane.f32.xlu1 %v569_v19 }
 0x324   :  { %v573_v20 = vpop.permute.xlu0 %572 }
 0x325   :  { %v575_v22 = vsel %vm232_vm3, %v573_v20, 0.0 }
 0x326   :  { %576 = vadd.xlane.f32.xlu0 %v575_v22 }
 0x328   :  { %v674_v23 = vpop.permute.xlu0 %673 }
 0x329   :  { %v676_v24 = vsel %vm232_vm3, %v674_v23, 0.0 }
 0x32a   :  { %677 = vadd.xlane.f32.xlu1 %v676_v24 }
 0x32c   :  { %v680_v25 = vpop.permute.xlu0 %679 }
 0x32d   :  { %v682_v26 = vsel %vm232_vm3, %v680_v25, 0.0 }
 0x32e   :  { %683 = vadd.xlane.f32.xlu0 %v682_v26 }
 0x330   :  { %v692_v30 = vpop.permute.xlu0 %691 }
 0x331   :  { %v694_v34 = vsel %vm232_vm3, %v692_v30, 0.0 }
 0x332   :  { %689 = vadd.xlane.f32.xlu0 %v688_v32  ;;  %695 = vadd.xlane.f32.xlu1 %v694_v34 }
 0x334   :  { %v698_v36 = vpop.permute.xlu0 %697 }
 0x335   :  { %v700_v37 = vsel %vm232_vm3, %v698_v36, 0.0 }
 0x336   :  { %701 = vadd.xlane.f32.xlu0 %v700_v37 }
 0x338   :  { %v710_v39 = vpop.permute.xlu0 %709 }
 0x339   :  { %v712_v42 = vsel %vm232_vm3, %v710_v39, 0.0 }
 0x33a   :  { %707 = vadd.xlane.f32.xlu0 %v706_v40  ;;  %713 = vadd.xlane.f32.xlu1 %v712_v42 }
 0x33c   :  { %v716_v43 = vpop.permute.xlu0 %715 }
 0x33d   :  { %v718_v44 = vsel %vm232_vm3, %v716_v43, 0.0 }
 0x33e   :  { %719 = vadd.xlane.f32.xlu0 %v718_v44 }
 0x33f   :  { %v242_v52 = vpop.xlane.xlu1 %241 }
 0x340   :  { %v817_v45 = vpop.permute.xlu0 %816 }
 0x341   :  { %v819_v46 = vsel %vm232_vm3, %v817_v45, 0.0 }
 0x342   :  { %820 = vadd.xlane.f32.xlu1 %v819_v46 }
 0x343   :  { %v249_v53 = vpop.xlane.xlu1 %248 }
 0x344   :  { %v823_v47 = vpop.permute.xlu0 %822 }
 0x345   :  { %v825_v49 = vsel %vm232_vm3, %v823_v47, 0.0 }
 0x346   :  { %826 = vadd.xlane.f32.xlu0 %v825_v49 }
 0x347   :  { %v263_v54 = vpop.xlane.xlu1 %262 }
 0x34a   :  { %832 = vadd.xlane.f32.xlu0 %v831_v51 }
 0x34b   :  { %v270_v59 = vpop.xlane.xlu1 %269 }
 0x34f   :  { %v284_v1 = vpop.xlane.xlu1 %283 }
 0x360   :  { %834 = vrot.lane.b32.xlu0 %v2025_v31, %s1879_s20 }
 0x364   :  { %840 = vrot.lane.b32.xlu0 %v2015_v27, %s1879_s20 }
 0x37e   :  { %v235_v55 = vpop.xlane.xlu0 %234 }
 0x37f   :  { %v285_v56 = vmax.f32 %v235_v55, %v242_v52 }
 0x381   :  { %v286_v57 = vmax.f32 %v285_v56, %v249_v53 }
 0x382   :  { %v256_v58 = vpop.xlane.xlu0 %255 }
 0x383   :  { %v287_v60 = vmax.f32 %v286_v57, %v256_v58 }
 0x385   :  { %v288_v61 = vmax.f32 %v287_v60, %v263_v54 }
 0x386   :  { %v277_v62 = vpop.xlane.xlu0 %276 }
 0x387   :  { %v289_v63 = vmax.f32 %v288_v61, %v270_v59  ;;  %v385_v8 = vpop.xlane.xlu1 %384 }
 0x389   :  { %v290_v2 = vmax.f32 %v289_v63, %v277_v62 }
 0x38b   :  { %v291_v3 = vmax.f32 %v290_v2, %v284_v1  ;;  %v392_v4 = vpop.xlane.xlu0 %391 }
 0x38c   :  { %v435_v10 = vmax.f32 %v385_v8, %v392_v4 }
 0x38d   :  { %v292_v5 = vsub.f32 %v235_v55, %v291_v3  ;;  %v295_v6 = vsub.f32 %v242_v52, %v291_v3  ;;  %v298_v7 = vsub.f32 %v249_v53, %v291_v3  ;;  %v301_v9 = vsub.f32 %v256_v58, %v291_v3 }
 0x38e   :  { %v304_v15 = vsub.f32 %v263_v54, %v291_v3  ;;  %v307_v20 = vsub.f32 %v270_v59, %v291_v3  ;;  %v310_v25 = vsub.f32 %v277_v62, %v291_v3  ;;  %v313_v28 = vsub.f32 %v284_v1, %v291_v3 }
 0x38f   :  { %v293_v11 = vmul.f32 1.442695, %v292_v5  ;;  %v296_v12 = vmul.f32 1.442695, %v295_v6  ;;  %v399_v13 = vpop.xlane.xlu0 %398  ;;  %v299_v14 = vmul.f32 1.442695, %v298_v7  ;;  %v406_v18 = vpop.xlane.xlu1 %405 }
 0x390   :  { %v436_v17 = vmax.f32 %v435_v10, %v399_v13  ;;  %v302_v19 = vmul.f32 1.442695, %v301_v9  ;;  %v305_v24 = vmul.f32 1.442695, %v304_v15  ;;  %v308_v26 = vmul.f32 1.442695, %v307_v20 }
 0x391   :  { %1598 = vpow2.f32 %v293_v11  ;;  %v311_v34 = vmul.f32 1.442695, %v310_v25  ;;  %v314_v38 = vmul.f32 1.442695, %v313_v28 }
 0x392   :  { %1600 = vpow2.f32 %v296_v12  ;;  %v437_v22 = vmax.f32 %v436_v17, %v406_v18 }
 0x393   :  { %v413_v23 = vpop.xlane.xlu0 %412  ;;  %1602 = vpow2.f32 %v299_v14 }
 0x394   :  { %1604 = vpow2.f32 %v302_v19  ;;  %v438_v30 = vmax.f32 %v437_v22, %v413_v23 }
 0x395   :  { %1606 = vpow2.f32 %v305_v24 }
 0x396   :  { %1608 = vpow2.f32 %v308_v26 }
 0x397   :  { %v420_v32 = vpop.xlane.xlu0 %419  ;;  %v427_v37 = vpop.xlane.xlu1 %426  ;;  %1610 = vpow2.f32 %v311_v34 }
 0x398   :  { %v439_v36 = vmax.f32 %v438_v30, %v420_v32  ;;  %1612 = vpow2.f32 %v314_v38 }
 0x39a   :  { %v440_v39 = vmax.f32 %v439_v36, %v427_v37 }
 0x39b   :  { %v2126_v40 = vpop.eup %1598  ;;  %v434_v42 = vpop.xlane.xlu0 %433 }
 0x39c   :  { %v2128_v43 = vpop.eup %1600  ;;  %v441_v44 = vmax.f32 %v440_v39, %v434_v42 }
 0x39d   :  { %v316_v45 = vadd.f32 %v2128_v43, %v2126_v40  ;;  %v2132_v46 = vpop.eup %1602 }
 0x39e   :  { %v442_v47 = vsub.f32 %v385_v8, %v441_v44  ;;  %v445_v49 = vsub.f32 %v392_v4, %v441_v44  ;;  %v448_v50 = vsub.f32 %v399_v13, %v441_v44  ;;  %v451_v52 = vsub.f32 %v406_v18, %v441_v44  ;;  %v2135_v53 = vpop.eup %1604 }
 0x39f   :  { %v317_v51 = vadd.f32 %v2132_v46, %v316_v45  ;;  %v454_v58 = vsub.f32 %v413_v23, %v441_v44  ;;  %v2138_v59 = vpop.eup %1606  ;;  %v457_v62 = vsub.f32 %v420_v32, %v441_v44  ;;  %v460_v2 = vsub.f32 %v427_v37, %v441_v44  ;;  %v535_v5 = vpop.xlane.xlu1 %534 }
 0x3a0   :  { %v443_v54 = vmul.f32 1.442695, %v442_v47  ;;  %v446_v55 = vmul.f32 1.442695, %v445_v49  ;;  %v449_v57 = vmul.f32 1.442695, %v448_v50  ;;  %v2141_v1 = vpop.eup %1608  ;;  %v463_v10 = vsub.f32 %v434_v42, %v441_v44 }
 0x3a1   :  { %v318_v56 = vadd.f32 %v2135_v53, %v317_v51  ;;  %v452_v61 = vmul.f32 1.442695, %v451_v52  ;;  %v455_v4 = vmul.f32 1.442695, %v454_v58  ;;  %v2144_v6 = vpop.eup %1610  ;;  %v458_v9 = vmul.f32 1.442695, %v457_v62 }
 0x3a2   :  { %1614 = vpow2.f32 %v443_v54  ;;  %v2147_v12 = vpop.eup %1612  ;;  %v461_v13 = vmul.f32 1.442695, %v460_v2  ;;  %v464_v19 = vmul.f32 1.442695, %v463_v10 }
 0x3a3   :  { %v319_v60 = vadd.f32 %v2138_v59, %v318_v56  ;;  %1616 = vpow2.f32 %v446_v55  ;;  %v541_v63 = vpop.xlane.xlu0 %540 }
 0x3a4   :  { %1618 = vpow2.f32 %v449_v57  ;;  %v578_v7 = vmax.f32 %v535_v5, %v541_v63 }
 0x3a5   :  { %v320_v3 = vadd.f32 %v2141_v1, %v319_v60  ;;  %1620 = vpow2.f32 %v452_v61 }
 0x3a6   :  { %1622 = vpow2.f32 %v455_v4 }
 0x3a7   :  { %v321_v8 = vadd.f32 %v2144_v6, %v320_v3  ;;  %v547_v11 = vpop.xlane.xlu0 %546  ;;  %v553_v17 = vpop.xlane.xlu1 %552  ;;  %1624 = vpow2.f32 %v458_v9 }
 0x3a8   :  { %v579_v14 = vmax.f32 %v578_v7, %v547_v11  ;;  %1626 = vpow2.f32 %v461_v13 }
 0x3a9   :  { %v322_v15 = vadd.f32 %v2147_v12, %v321_v8 }
 0x3aa   :  { %v580_v18 = vmax.f32 %v579_v14, %v553_v17 }
 0x3ab   :  { %v559_v20 = vpop.xlane.xlu0 %558  ;;  %1628 = vrcp.f32 %v322_v15 }
 0x3ac   :  { %v2150_v22 = vpop.eup %1614  ;;  %v581_v25 = vmax.f32 %v580_v18, %v559_v20  ;;  %1630 = vpow2.f32 %v464_v19 }
 0x3ad   :  { %v2152_v23 = vpop.eup %1616 }
 0x3ae   :  { %v466_v24 = vadd.f32 %v2152_v23, %v2150_v22  ;;  %v2156_v26 = vpop.eup %1618 }
 0x3af   :  { %v565_v28 = vpop.xlane.xlu0 %564  ;;  %v2159_v34 = vpop.eup %1620 }
 0x3b0   :  { %v467_v30 = vadd.f32 %v2156_v26, %v466_v24  ;;  %v582_v32 = vmax.f32 %v581_v25, %v565_v28  ;;  %v571_v36 = vpop.xlane.xlu1 %570  ;;  %v2162_v39 = vpop.eup %1622 }
 0x3b1   :  { %v2165_v47 = vpop.eup %1624 }
 0x3b2   :  { %v468_v37 = vadd.f32 %v2159_v34, %v467_v30  ;;  %v583_v38 = vmax.f32 %v582_v32, %v571_v36  ;;  %v2167_v49 = vpop.eup %1626 }
 0x3b3   :  { %v577_v42 = vpop.xlane.xlu0 %576 }
 0x3b4   :  { %v469_v44 = vadd.f32 %v2162_v39, %v468_v37  ;;  %v584_v45 = vmax.f32 %v583_v38, %v577_v42 }
 0x3b5   :  { %v2170_v55 = vpop.eup %1628 }
 0x3b6   :  { %v470_v50 = vadd.f32 %v2165_v47, %v469_v44  ;;  %v585_v51 = vsub.f32 %v535_v5, %v584_v45  ;;  %v588_v52 = vsub.f32 %v541_v63, %v584_v45  ;;  %v591_v54 = vsub.f32 %v547_v11, %v584_v45  ;;  %v2173_v61 = vpop.eup %1630 }
 0x3b7   :  { %v594_v56 = vsub.f32 %v553_v17, %v584_v45  ;;  %v597_v2 = vsub.f32 %v559_v20, %v584_v45  ;;  %v326_v4 = vmul.f32 %v2170_v55, %v2128_v43  ;;  %v600_v5 = vsub.f32 %v565_v28, %v584_v45  ;;  %v2183_v13 = vpop.xlane.xlu1 %677 }
 0x3b8   :  { %v471_v57 = vadd.f32 %v2167_v49, %v470_v50  ;;  %v586_v58 = vmul.f32 1.442695, %v585_v51  ;;  %v589_v60 = vmul.f32 1.442695, %v588_v52  ;;  %v592_v62 = vmul.f32 1.442695, %v591_v54 }
 0x3b9   :  { %v595_v63 = vmul.f32 1.442695, %v594_v56  ;;  %v327_v8 = vmul.f32 %v326_v4, %v1982_v16  ;;  %v340_v9 = vmul.f32 %v2170_v55, %v2135_v53  ;;  %v598_v10 = vmul.f32 1.442695, %v597_v2 }
 0x3ba   :  { %v472_v3 = vadd.f32 %v2173_v61, %v471_v57  ;;  %1632 = vpow2.f32 %v586_v58  ;;  %v603_v11 = vsub.f32 %v571_v36, %v584_v45  ;;  %v333_v14 = vmul.f32 %v2170_v55, %v2132_v46 }
 0x3bb   :  { %1634 = vpow2.f32 %v589_v60  ;;  %v2178_v7 = vpop.xlane.xlu0 %683  ;;  %329 = vrot.lane.b32.xlu0 %v327_v8, %s1880_s21  ;;  %v601_v15 = vmul.f32 1.442695, %v600_v5  ;;  %v606_v17 = vsub.f32 %v577_v42, %v584_v45  ;;  %v324_v53 = vmul.f32 %v2170_v55, %v2126_v40 }
 0x3bc   :  { %1636 = vrcp.f32 %v472_v3  ;;  %v721_v43 = vmax.f32 %v2183_v13, %v2178_v7  ;;  %v341_v19 = vmul.f32 %v340_v9, %v1982_v16  ;;  %v347_v24 = vmul.f32 %v2170_v55, %v2138_v59 }
 0x3bd   :  { %1638 = vpow2.f32 %v592_v62  ;;  %v2199_v25 = vmul.f32 %v333_v14, %v1982_v16  ;;  %v604_v46 = vmul.f32 1.442695, %v603_v11  ;;  %v2204_v30 = vmul.f32 %v324_v53, %v1982_v16 }
 0x3be   :  { %1640 = vpow2.f32 %v595_v63  ;;  %v354_v32 = vmul.f32 %v2170_v55, %v2141_v1  ;;  %v607_v36 = vmul.f32 1.442695, %v606_v17  ;;  %v348_v38 = vmul.f32 %v347_v24, %v1982_v16 }
 0x3bf   :  { %v2190_v18 = vpop.xlane.xlu0 %689  ;;  %1642 = vpow2.f32 %v598_v10  ;;  %v2201_v28 = vpop.xlane.xlu1 %695  ;;  %343 = vrot.lane.b32.xlu0 %v341_v19, %s1882_s23  ;;  %v361_v51 = vmul.f32 %v2170_v55, %v2144_v6  ;;  %v368_v17 = vmul.f32 %v2170_v55, %v2147_v12 }
 0x3c0   :  { %v722_v20 = vmax.f32 %v721_v43, %v2190_v18  ;;  %1644 = vpow2.f32 %v601_v15  ;;  %v355_v50 = vmul.f32 %v354_v32, %v1982_v16 }
 0x3c1   :  { %1646 = vpow2.f32 %v604_v46  ;;  %v362_v14 = vmul.f32 %v361_v51, %v1982_v16 }
 0x3c2   :  { %v723_v40 = vmax.f32 %v722_v20, %v2201_v28  ;;  %1648 = vpow2.f32 %v607_v36 }
 0x3c3   :  { %v2210_v59 = vpop.xlane.xlu0 %701  ;;  %350 = vrot.lane.b32.xlu0 %v348_v38, %s1879_s20  ;;  %v369_v38 = vmul.f32 %v368_v17, %v1982_v16 }
 0x3c4   :  { %v2212_v37 = vpop.eup %1632  ;;  %v724_v1 = vmax.f32 %v723_v40, %v2210_v59 }
 0x3c5   :  { %v2215_v42 = vpop.eup %1634 }
 0x3c6   :  { %v2217_v44 = vpop.eup %1636  ;;  %v609_v45 = vadd.f32 %v2215_v42, %v2212_v37 }
 0x3c7   :  { %v2226_v52 = vpop.eup %1638  ;;  %v708_v54 = vpop.xlane.xlu0 %707  ;;  %v476_v56 = vmul.f32 %v2217_v44, %v2152_v23  ;;  %v483_v57 = vmul.f32 %v2217_v44, %v2156_v26  ;;  %v497_v58 = vmul.f32 %v2217_v44, %v2162_v39  ;;  %v504_v2 = vmul.f32 %v2217_v44, %v2165_v47  ;;  %357 = vrot.lane.b32.xlu0 %v355_v50, %s1878_s19 }
 0x3c8   :  { %v610_v60 = vadd.f32 %v2226_v52, %v609_v45  ;;  %v725_v62 = vmax.f32 %v724_v1, %v708_v54  ;;  %v511_v6 = vmul.f32 %v2217_v44, %v2167_v49  ;;  %v2239_v3 = vpop.eup %1640  ;;  %v714_v4 = vpop.xlane.xlu1 %713  ;;  %v518_v10 = vmul.f32 %v2217_v44, %v2173_v61 }
 0x3c9   :  { %v2242_v23 = vmul.f32 %v476_v56, %v1982_v16  ;;  %v2245_v26 = vmul.f32 %v483_v57, %v1982_v16  ;;  %v2248_v39 = vmul.f32 %v497_v58, %v1982_v16  ;;  %v2253_v5 = vmul.f32 %v504_v2, %v1982_v16  ;;  %v1643_v8 = vpop.eup %1642 }
 0x3ca   :  { %v611_v63 = vadd.f32 %v2239_v3, %v610_v60  ;;  %v726_v47 = vmax.f32 %v725_v62, %v714_v4  ;;  %v2256_v49 = vmul.f32 %v511_v6, %v1982_v16  ;;  %v474_v11 = vmul.f32 %v2217_v44, %v2150_v22  ;;  %v1645_v53 = vpop.eup %1644 }
 0x3cb   :  { %v720_v9 = vpop.xlane.xlu0 %719  ;;  %v2266_v19 = vmul.f32 %v518_v10, %v1982_v16  ;;  %364 = vrot.lane.b32.xlu0 %v362_v14, %s1877_s18  ;;  %v1647_v40 = vpop.eup %1646 }
 0x3cc   :  { %v612_v43 = vadd.f32 %v1643_v8, %v611_v63  ;;  %v727_v15 = vmax.f32 %v726_v47, %v720_v9  ;;  %v2269_v20 = vmul.f32 %v474_v11, %v1982_v16  ;;  %v1649_v45 = vpop.eup %1648 }
 0x3ce   :  { %v613_v24 = vadd.f32 %v1645_v53, %v612_v43  ;;  %v728_v61 = vsub.f32 %v2183_v13, %v727_v15  ;;  %v731_v22 = vsub.f32 %v2178_v7, %v727_v15  ;;  %v734_v46 = vsub.f32 %v2190_v18, %v727_v15 }
 0x3cf   :  { %v737_v32 = vsub.f32 %v2201_v28, %v727_v15  ;;  %v740_v50 = vsub.f32 %v2210_v59, %v727_v15  ;;  %371 = vrot.lane.b32.xlu0 %v369_v38, %s1876_s17  ;;  %v743_v13 = vsub.f32 %v708_v54, %v727_v15  ;;  %v746_v56 = vsub.f32 %v714_v4, %v727_v15 }
 0x3d0   :  { %v614_v12 = vadd.f32 %v1647_v40, %v613_v24  ;;  %v729_v55 = vmul.f32 1.442695, %v728_v61  ;;  %v732_v36 = vmul.f32 1.442695, %v731_v22  ;;  %v735_v1 = vmul.f32 1.442695, %v734_v46 }
 0x3d1   :  { %v738_v7 = vmul.f32 1.442695, %v737_v32  ;;  %v741_v28 = vmul.f32 1.442695, %v740_v50  ;;  %v744_v57 = vmul.f32 1.442695, %v743_v13  ;;  %v749_v58 = vsub.f32 %v720_v9, %v727_v15 }
 0x3d2   :  { %v615_v51 = vadd.f32 %v1649_v45, %v614_v12  ;;  %1650 = vpow2.f32 %v729_v55  ;;  %v747_v59 = vmul.f32 1.442695, %v746_v56 }
 0x3d3   :  { %1652 = vpow2.f32 %v732_v36  ;;  %v2279_v18 = vpop.xlane.xlu0 %826  ;;  %v750_v62 = vmul.f32 1.442695, %v749_v58 }
 0x3d4   :  { %1654 = vrcp.f32 %v615_v51 }
 0x3d5   :  { %1656 = vpow2.f32 %v735_v1 }
 0x3d6   :  { %1658 = vpow2.f32 %v738_v7 }
 0x3d7   :  { %v2281_v60 = vpop.xlane.xlu0 %832  ;;  %1660 = vpow2.f32 %v741_v28 }
 0x3d8   :  { %1662 = vpow2.f32 %v744_v57 }
 0x3d9   :  { %1664 = vpow2.f32 %v747_v59 }
 0x3da   :  { %1666 = vpow2.f32 %v750_v62 }
 0x3db   :  { %v835_v2 = vpop.permute.xlu0 %834 }
 0x3dc   :  { %v1651_v6 = vpop.eup %1650  ;;  %v837_v63 = vsel %vm232_vm3, %v835_v2, 0.0 }
 0x3dd   :  { %v1653_v54 = vpop.eup %1652  ;;  %838 = vadd.xlane.f32.xlu1 %v837_v63 }
 0x3de   :  { %v1655_v47 = vpop.eup %1654  ;;  %v752_v10 = vadd.f32 %v1653_v54, %v1651_v6 }
 0x3df   :  { %v1657_v11 = vpop.eup %1656  ;;  %v619_v4 = vmul.f32 %v1655_v47, %v2215_v42  ;;  %v626_v9 = vmul.f32 %v1655_v47, %v2226_v52  ;;  %v640_v43 = vmul.f32 %v1655_v47, %v1643_v8  ;;  %v647_v15 = vmul.f32 %v1655_v47, %v1645_v53  ;;  %v841_v28 = vpop.permute.xlu0 %840 }
 0x3e0   :  { %v753_v14 = vadd.f32 %v1657_v11, %v752_v10  ;;  %v654_v17 = vmul.f32 %v1655_v47, %v1647_v40  ;;  %v1659_v24 = vpop.eup %1658  ;;  %v661_v52 = vmul.f32 %v1655_v47, %v1649_v45  ;;  %v617_v53 = vmul.f32 %v1655_v47, %v2212_v37 }
 0x3e1   :  { %v2287_v61 = vmul.f32 %v619_v4, %v1982_v16  ;;  %v2290_v22 = vmul.f32 %v626_v9, %v1982_v16  ;;  %v2293_v46 = vmul.f32 %v640_v43, %v1982_v16  ;;  %v2296_v12 = vmul.f32 %v647_v15, %v1982_v16  ;;  %v1661_v8 = vpop.eup %1660 }
 0x3e2   :  { %v754_v32 = vadd.f32 %v1659_v24, %v753_v14  ;;  %v2299_v42 = vmul.f32 %v654_v17, %v1982_v16  ;;  %v2303_v55 = vmul.f32 %v661_v52, %v1982_v16  ;;  %v1663_v36 = vpop.eup %1662  ;;  %v2306_v38 = vmul.f32 %v617_v53, %v1982_v16 }
 0x3e3   :  { %v1665_v50 = vpop.eup %1664  ;;  %v843_v37 = vsel %vm232_vm3, %v841_v28, 0.0  ;;  %v490_v52 = vmul.f32 %v2217_v44, %v2159_v34  ;;  %v633_v53 = vmul.f32 %v1655_v47, %v2239_v3 }
 0x3e4   :  { %v755_v40 = vadd.f32 %v1661_v8, %v754_v32  ;;  %v1667_v7 = vpop.eup %1666 }
 0x3e6   :  { %v756_v1 = vadd.f32 %v1663_v36, %v755_v40  ;;  %v634_v40 = vmul.f32 %v633_v53, %v1982_v16 }
 0x3e8   :  { %v757_v51 = vadd.f32 %v1665_v50, %v756_v1 }
 0x3ea   :  { %v758_v13 = vadd.f32 %v1667_v7, %v757_v51 }
 0x3ec   :  { %1668 = vrcp.f32 %v758_v13 }
 0x3ee   :  { %336 = vrot.lane.b32.xlu1 %v2199_v25, %s1881_s22  ;;  %844 = vadd.xlane.f32.xlu0 %v843_v37 }
 0x3f2   :  { %846 = vrot.lane.b32.xlu1 %v2008_v21, %s1879_s20 }
 0x3f6   :  { %v1669_v45 = vpop.eup %1668 }
 0x3f7   :  { %v762_v56 = vmul.f32 %v1669_v45, %v1653_v54  ;;  %v769_v57 = vmul.f32 %v1669_v45, %v1657_v11  ;;  %v783_v58 = vmul.f32 %v1669_v45, %v1661_v8  ;;  %v790_v59 = vmul.f32 %v1669_v45, %v1663_v36  ;;  %v2322_v11 = vpop.xlane.xlu1 %820 }
 0x3f8   :  { %v797_v62 = vmul.f32 %v1669_v45, %v1665_v50  ;;  %v804_v2 = vmul.f32 %v1669_v45, %v1667_v7  ;;  %v760_v63 = vmul.f32 %v1669_v45, %v1651_v6  ;;  %v491_v8 = vmul.f32 %v490_v52, %v1982_v16 }
 0x3f9   :  { %v763_v10 = vmul.f32 %v762_v56, %v1982_v16  ;;  %v770_v4 = vmul.f32 %v769_v57, %v1982_v16  ;;  %v784_v25 = vmul.f32 %v783_v58, %v1982_v16  ;;  %v791_v9 = vmul.f32 %v790_v59, %v1982_v16 }
 0x3fa   :  { %v798_v43 = vmul.f32 %v797_v62, %v1982_v16  ;;  %v805_v14 = vmul.f32 %v804_v2, %v1982_v16  ;;  %v2320_v54 = vmul.f32 %v760_v63, %v1982_v16  ;;  %v776_v36 = vmul.f32 %v1669_v45, %v1659_v24 }
 0x3fc   :  { %v777_v1 = vmul.f32 %v776_v36, %v1982_v16 }
 0x42d   :  { %v2342_v50 = vpop.permute.xlu0 %329 }
 0x431   :  { %v2344_v34 = vpop.permute.xlu0 %343 }
 0x46a   :  { %v2324_v15 = vpop.xlane.xlu1 %838 }
 0x46e   :  { %v2326_v6 = vpop.permute.xlu1 %336 }
 0x472   :  { %v847_v17 = vpop.permute.xlu1 %846 }
 0x473   :  { %v849_v32 = vsel %vm232_vm3, %v847_v17, 0.0 }
 0x474   :  { %850 = vadd.xlane.f32.xlu0 %v849_v32 }
 0x48a   :  { %852 = vrot.lane.b32.xlu0 %v2032_v33, %s1879_s20 }
 0x48e   :  { %858 = vrot.lane.b32.xlu0 %v2020_v29, %s1879_s20  ;;  %v2346_v29 = vpop.permute.xlu0 %350 }
 0x492   :  { %493 = vrot.lane.b32.xlu0 %v491_v8, %s1882_s23  ;;  %v2348_v44 = vpop.permute.xlu0 %357 }
 0x496   :  { %636 = vrot.lane.b32.xlu0 %v634_v40, %s1882_s23  ;;  %v2350_v3 = vpop.permute.xlu0 %364 }
 0x49a   :  { %779 = vrot.lane.b32.xlu0 %v777_v1, %s1882_s23  ;;  %v2352_v47 = vpop.permute.xlu0 %371 }
 0x49e   :  { %v845_v51 = vpop.xlane.xlu0 %844 }
 0x501   :  { %v851_v24 = vpop.xlane.xlu0 %850 }
 0x505   :  { %v853_v7 = vpop.permute.xlu0 %852 }
 0x506   :  { %v855_v13 = vsel %vm232_vm3, %v853_v7, 0.0 }
 0x507   :  { %856 = vadd.xlane.f32.xlu1 %v855_v13 }
 0x509   :  { %v859_v28 = vpop.permute.xlu0 %858 }
 0x50a   :  { %v861_v37 = vsel %vm232_vm3, %v859_v28, 0.0 }
 0x50b   :  { %862 = vadd.xlane.f32.xlu0 %v861_v37 }
 0x518   :  { %479 = vrot.lane.b32.xlu1 %v2242_v23, %s1880_s21  ;;  %v2386_v23 = vpop.permute.xlu0 %493 }
 0x51c   :  { %486 = vrot.lane.b32.xlu1 %v2245_v26, %s1881_s22  ;;  %v864_v26 = vmax.f32 %v2322_v11, %v2279_v18 }
 0x520   :  { %500 = vrot.lane.b32.xlu1 %v2248_v39, %s1879_s20  ;;  %v2390_v39 = vpop.permute.xlu0 %636 }
 0x524   :  { %507 = vrot.lane.b32.xlu1 %v2253_v5, %s1878_s19  ;;  %v865_v5 = vmax.f32 %v864_v26, %v2281_v60 }
 0x528   :  { %514 = vrot.lane.b32.xlu1 %v2256_v49, %s1877_s18  ;;  %v866_v49 = vmax.f32 %v865_v5, %v2324_v15 }
 0x52c   :  { %521 = vrot.lane.b32.xlu1 %v2266_v19, %s1876_s17  ;;  %v867_v19 = vmax.f32 %v866_v49, %v845_v51 }
 0x530   :  { %622 = vrot.lane.b32.xlu1 %v2287_v61, %s1880_s21  ;;  %v2394_v61 = vpop.permute.xlu0 %779 }
 0x534   :  { %629 = vrot.lane.b32.xlu1 %v2290_v22, %s1881_s22 }
 0x538   :  { %643 = vrot.lane.b32.xlu1 %v2293_v46, %s1879_s20  ;;  %v868_v46 = vmax.f32 %v867_v19, %v851_v24 }
 0x53c   :  { %650 = vrot.lane.b32.xlu1 %v2296_v12, %s1878_s19 }
 0x540   :  { %657 = vrot.lane.b32.xlu1 %v2299_v42, %s1877_s18 }
 0x544   :  { %664 = vrot.lane.b32.xlu1 %v2303_v55, %s1876_s17 }
 0x548   :  { %765 = vrot.lane.b32.xlu1 %v763_v10, %s1880_s21 }
 0x54c   :  { %772 = vrot.lane.b32.xlu1 %v770_v4, %s1881_s22 }
 0x550   :  { %786 = vrot.lane.b32.xlu1 %v784_v25, %s1879_s20 }
 0x554   :  { %793 = vrot.lane.b32.xlu1 %v791_v9, %s1878_s19 }
 0x558   :  { %800 = vrot.lane.b32.xlu1 %v798_v43, %s1877_s18 }
 0x55c   :  { %807 = vrot.lane.b32.xlu1 %v805_v14, %s1876_s17 }
 0x594   :  { %v857_v22 = vpop.xlane.xlu1 %856 }
 0x595   :  { %v869_v12 = vmax.f32 %v868_v46, %v857_v22 }
 0x598   :  { %v2396_v42 = vpop.permute.xlu1 %479  ;;  %v863_v55 = vpop.xlane.xlu0 %862 }
 0x599   :  { %v870_v45 = vmax.f32 %v869_v12, %v863_v55 }
 0x59b   :  { %v871_v56 = vsub.f32 %v2322_v11, %v870_v45  ;;  %v874_v57 = vsub.f32 %v2279_v18, %v870_v45  ;;  %v877_v58 = vsub.f32 %v2281_v60, %v870_v45  ;;  %v880_v59 = vsub.f32 %v2324_v15, %v870_v45 }
 0x59c   :  { %v2402_v62 = vpop.permute.xlu1 %486  ;;  %v883_v4 = vsub.f32 %v845_v51, %v870_v45  ;;  %v886_v9 = vsub.f32 %v851_v24, %v870_v45  ;;  %v889_v11 = vsub.f32 %v857_v22, %v870_v45  ;;  %v892_v60 = vsub.f32 %v863_v55, %v870_v45 }
 0x59d   :  { %v872_v2 = vmul.f32 1.442695, %v871_v56  ;;  %v875_v63 = vmul.f32 1.442695, %v874_v57  ;;  %v878_v10 = vmul.f32 1.442695, %v877_v58 }
 0x59e   :  { %v881_v25 = vmul.f32 1.442695, %v880_v59  ;;  %v884_v14 = vmul.f32 1.442695, %v883_v4  ;;  %v887_v18 = vmul.f32 1.442695, %v886_v9 }
 0x59f   :  { %1670 = vpow2.f32 %v872_v2  ;;  %v890_v15 = vmul.f32 1.442695, %v889_v11  ;;  %v893_v32 = vmul.f32 1.442695, %v892_v60 }
 0x5a0   :  { %1672 = vpow2.f32 %v875_v63  ;;  %v2404_v43 = vpop.permute.xlu1 %500 }
 0x5a1   :  { %1674 = vpow2.f32 %v878_v10 }
 0x5a2   :  { %1676 = vpow2.f32 %v881_v25 }
 0x5a3   :  { %1678 = vpow2.f32 %v884_v14 }
 0x5a4   :  { %v2406_v17 = vpop.permute.xlu1 %507  ;;  %1680 = vpow2.f32 %v887_v18 }
 0x5a5   :  { %1682 = vpow2.f32 %v890_v15 }
 0x5a6   :  { %1684 = vpow2.f32 %v893_v32 }
 0x5a8   :  { %v2408_v52 = vpop.permute.xlu1 %514 }
 0x5a9   :  { %v1671_v8 = vpop.eup %1670 }
 0x5aa   :  { %v1673_v53 = vpop.eup %1672 }
 0x5ab   :  { %v895_v40 = vadd.f32 %v1673_v53, %v1671_v8  ;;  %v1675_v36 = vpop.eup %1674 }
 0x5ac   :  { %v2410_v1 = vpop.permute.xlu1 %521  ;;  %v1677_v24 = vpop.eup %1676 }
 0x5ad   :  { %v896_v51 = vadd.f32 %v1675_v36, %v895_v40  ;;  %v1679_v13 = vpop.eup %1678 }
 0x5ae   :  { %v1681_v26 = vpop.eup %1680 }
 0x5af   :  { %v897_v7 = vadd.f32 %v1677_v24, %v896_v51  ;;  %v1683_v49 = vpop.eup %1682 }
 0x5b0   :  { %v2412_v28 = vpop.permute.xlu1 %622  ;;  %v1685_v46 = vpop.eup %1684 }
 0x5b1   :  { %v898_v37 = vadd.f32 %v1679_v13, %v897_v7 }
 0x5b3   :  { %v899_v5 = vadd.f32 %v1681_v26, %v898_v37 }
 0x5b4   :  { %v2414_v19 = vpop.permute.xlu1 %629 }
 0x5b5   :  { %v900_v22 = vadd.f32 %v1683_v49, %v899_v5 }
 0x5b7   :  { %v901_v12 = vadd.f32 %v1685_v46, %v900_v22 }
 0x5b8   :  { %v2416_v55 = vpop.permute.xlu1 %643 }
 0x5b9   :  { %1686 = vrcp.f32 %v901_v12 }
 0x5bc   :  { %v2418_v45 = vpop.permute.xlu1 %650 }
 0x5c0   :  { %v2420_v56 = vpop.permute.xlu1 %657 }
 0x5c3   :  { %v1687_v57 = vpop.eup %1686 }
 0x5c4   :  { %v2422_v58 = vpop.permute.xlu1 %664  ;;  %v919_v59 = vmul.f32 %v1687_v57, %v1677_v24  ;;  %v905_v2 = vmul.f32 %v1687_v57, %v1673_v53  ;;  %v912_v4 = vmul.f32 %v1687_v57, %v1675_v36  ;;  %v903_v25 = vmul.f32 %v1687_v57, %v1671_v8 }
 0x5c5   :  { %v926_v18 = vmul.f32 %v1687_v57, %v1679_v13  ;;  %v933_v40 = vmul.f32 %v1687_v57, %v1681_v26  ;;  %v940_v24 = vmul.f32 %v1687_v57, %v1683_v49  ;;  %v947_v5 = vmul.f32 %v1687_v57, %v1685_v46 }
 0x5c6   :  { %v920_v63 = vmul.f32 %v919_v59, %v1982_v16  ;;  %v906_v10 = vmul.f32 %v905_v2, %v1982_v16  ;;  %v904_v14 = vmul.f32 %v903_v25, %v1982_v16  ;;  %v913_v11 = vmul.f32 %v912_v4, %v1982_v16 }
 0x5c7   :  { %v927_v53 = vmul.f32 %v926_v18, %v1982_v16  ;;  %v934_v51 = vmul.f32 %v933_v40, %v1982_v16  ;;  %v941_v37 = vmul.f32 %v940_v24, %v1982_v16 }
 0x5c8   :  { %922 = vrot.lane.b32.xlu0 %v920_v63, %s1882_s23  ;;  %908 = vrot.lane.b32.xlu1 %v906_v10, %s1880_s21  ;;  %v766_v9 = vpop.permute.xlu1 %765 }
 0x5c9   :  { %v768_v60 = vadd.f32 %v766_v9, %v2320_v54 }
 0x5cc   :  { %915 = vrot.lane.b32.xlu1 %v913_v11, %s1881_s22  ;;  %v773_v15 = vpop.permute.xlu1 %772 }
 0x5cd   :  { %v775_v32 = vadd.f32 %v773_v15, %v768_v60 }
 0x5cf   :  { %v782_v8 = vadd.f32 %v2394_v61, %v775_v32  ;;  %v948_v61 = vmul.f32 %v947_v5, %v1982_v16 }
 0x5d0   :  { %929 = vrot.lane.b32.xlu1 %v927_v53, %s1879_s20  ;;  %v787_v36 = vpop.permute.xlu1 %786 }
 0x5d1   :  { %v789_v7 = vadd.f32 %v787_v36, %v782_v8 }
 0x5d4   :  { %936 = vrot.lane.b32.xlu1 %v934_v51, %s1878_s19  ;;  %v794_v13 = vpop.permute.xlu1 %793 }
 0x5d5   :  { %v796_v54 = vadd.f32 %v794_v13, %v789_v7 }
 0x5d8   :  { %943 = vrot.lane.b32.xlu1 %v941_v37, %s1877_s18  ;;  %v801_v22 = vpop.permute.xlu1 %800 }
 0x5d9   :  { %v2439_v26 = vadd.f32 %v801_v22, %v796_v54 }
 0x5dc   :  { %950 = vrot.lane.b32.xlu1 %v948_v61, %s1876_s17  ;;  %v2445_v49 = vpop.permute.xlu1 %807 }
 0x5e0   :  { %954 = vrot.lane.b32.xlu1 %v1982_v16, %s1882_s23 }
 0x63a   :  { %v909_v12 = vpop.permute.xlu1 %908  ;;  %v923_v10 = vpop.permute.xlu0 %922 }
 0x63b   :  { %v911_v59 = vadd.f32 %v909_v12, %v904_v14 }
 0x63e   :  { %v916_v2 = vpop.permute.xlu1 %915 }
 0x63f   :  { %v918_v63 = vadd.f32 %v916_v2, %v911_v59 }
 0x641   :  { %v925_v46 = vadd.f32 %v923_v10, %v918_v63 }
 0x642   :  { %v930_v57 = vpop.permute.xlu1 %929 }
 0x643   :  { %v932_v4 = vadd.f32 %v930_v57, %v925_v46 }
 0x646   :  { %v937_v25 = vpop.permute.xlu1 %936 }
 0x647   :  { %v939_v9 = vadd.f32 %v937_v25, %v932_v4 }
 0x64a   :  { %v944_v11 = vpop.permute.xlu1 %943 }
 0x64b   :  { %v946_v18 = vadd.f32 %v944_v11, %v939_v9 }
 0x64e   :  { %v951_v60 = vpop.permute.xlu1 %950 }
 0x64f   :  { %v2447_v15 = vadd.f32 %v951_v60, %v946_v18 }
 0x652   :  { %v955_v32 = vpop.permute.xlu1 %954 }
 0x653   :  { %v957_v53 = vmul.f32 %v955_v32, %v1982_v16 }
 0x655   :  { %959 = vrot.lane.b32.xlu0 %v957_v53, %s1878_s19 }
 0x659   :  { %965 = vrot.lane.b32.xlu0 %v2084_v48, %s1878_s19 }
 0x6c7   :  { %v960_v14 = vpop.permute.xlu0 %959 }
 0x6c8   :  { %v962_v40 = vsel %vm232_vm3, %v960_v14, 0.0 }
 0x6c9   :  { %963 = vadd.xlane.f32.xlu1 %v962_v40 }
 0x6cb   :  { %v966_v8 = vpop.permute.xlu0 %965 }
 0x6cc   :  { %v968_v36 = vsel %vm232_vm3, %v966_v8, 0.0 }
 0x6cd   :  { %969 = vadd.xlane.f32.xlu0 %v968_v36 }
 0x6da   :  { %971 = vrot.lane.b32.xlu1 %v2064_v41, %s1878_s19 }
 0x756   :  { %v2457_v51 = vpop.xlane.xlu1 %963 }
 0x75a   :  { %v972_v24 = vpop.permute.xlu1 %971  ;;  %v2464_v13 = vpop.xlane.xlu0 %969 }
 0x75b   :  { %v974_v7 = vsel %vm232_vm3, %v972_v24, 0.0 }
 0x75c   :  { %975 = vadd.xlane.f32.xlu0 %v974_v7 }
 0x772   :  { %977 = vrot.lane.b32.xlu0 %v2039_v35, %s1878_s19 }
 0x776   :  { %983 = vrot.lane.b32.xlu0 %v2025_v31, %s1878_s19 }
 0x7e9   :  { %v2466_v54 = vpop.xlane.xlu0 %975 }
 0x7ed   :  { %v978_v37 = vpop.permute.xlu0 %977 }
 0x7ee   :  { %v980_v5 = vsel %vm232_vm3, %v978_v37, 0.0 }
 0x7ef   :  { %981 = vadd.xlane.f32.xlu1 %v980_v5 }
 0x7f1   :  { %v984_v22 = vpop.permute.xlu0 %983 }
 0x7f2   :  { %v986_v61 = vsel %vm232_vm3, %v984_v22, 0.0 }
 0x7f3   :  { %987 = vadd.xlane.f32.xlu0 %v986_v61 }
 0x800   :  { %1097 = vrot.lane.b32.xlu1 %v1982_v16, %s1881_s22 }
 0x804   :  { %989 = vrot.lane.b32.xlu1 %v2015_v27, %s1878_s19 }
 0x809   :  { %1240 = vrot.lane.b32.xlu0 %v1982_v16, %s1880_s21 }
 0x80d   :  { %995 = vrot.lane.b32.xlu0 %v2008_v21, %s1878_s19 }
 0x87c   :  { %v2478_v12 = vpop.xlane.xlu1 %981 }
 0x880   :  { %v1098_v59 = vpop.permute.xlu1 %1097  ;;  %v2480_v2 = vpop.xlane.xlu0 %987 }
 0x881   :  { %v1100_v25 = vmul.f32 %v1098_v59, %v1982_v16 }
 0x884   :  { %v990_v63 = vpop.permute.xlu1 %989  ;;  %v1241_v10 = vpop.permute.xlu0 %1240 }
 0x885   :  { %v992_v46 = vsel %vm232_vm3, %v990_v63, 0.0  ;;  %v1243_v9 = vmul.f32 %v1241_v10, %v1982_v16 }
 0x886   :  { %993 = vadd.xlane.f32.xlu1 %v992_v46 }
 0x888   :  { %v996_v57 = vpop.permute.xlu0 %995 }
 0x889   :  { %v998_v4 = vsel %vm232_vm3, %v996_v57, 0.0 }
 0x88a   :  { %999 = vadd.xlane.f32.xlu0 %v998_v4 }
 0x897   :  { %1102 = vrot.lane.b32.xlu1 %v1100_v25, %s1877_s18 }
 0x89b   :  { %1245 = vrot.lane.b32.xlu1 %v1243_v9, %s1876_s17 }
 0x89f   :  { %1251 = vrot.lane.b32.xlu1 %v1100_v25, %s1876_s17 }
 0x8a0   :  { %1108 = vrot.lane.b32.xlu0 %v957_v53, %s1877_s18 }
 0x8a3   :  { %1114 = vrot.lane.b32.xlu1 %v2084_v48, %s1877_s18 }
 0x8a4   :  { %1120 = vrot.lane.b32.xlu0 %v2064_v41, %s1877_s18 }
 0x8a7   :  { %1257 = vrot.lane.b32.xlu1 %v957_v53, %s1876_s17 }
 0x8a8   :  { %1126 = vrot.lane.b32.xlu0 %v2039_v35, %s1877_s18 }
 0x8ab   :  { %1263 = vrot.lane.b32.xlu1 %v2084_v48, %s1876_s17 }
 0x8ac   :  { %1132 = vrot.lane.b32.xlu0 %v2025_v31, %s1877_s18 }
 0x8af   :  { %1269 = vrot.lane.b32.xlu1 %v2064_v41, %s1876_s17 }
 0x8b0   :  { %1138 = vrot.lane.b32.xlu0 %v2015_v27, %s1877_s18 }
 0x8b3   :  { %1275 = vrot.lane.b32.xlu1 %v2039_v35, %s1876_s17 }
 0x8b4   :  { %1281 = vrot.lane.b32.xlu0 %v2025_v31, %s1876_s17 }
 0x8b7   :  { %1001 = vrot.lane.b32.xlu1 %v2032_v33, %s1878_s19 }
 0x8b8   :  { %1287 = vrot.lane.b32.xlu0 %v2015_v27, %s1876_s17 }
 0x8bb   :  { %1144 = vrot.lane.b32.xlu1 %v2008_v21, %s1877_s18 }
 0x913   :  { %v2515_v48 = vpop.xlane.xlu1 %993 }
 0x917   :  { %v1103_v41 = vpop.permute.xlu1 %1102  ;;  %v2517_v11 = vpop.xlane.xlu0 %999 }
 0x918   :  { %v1105_v18 = vsel %vm232_vm3, %v1103_v41, 0.0 }
 0x919   :  { %1106 = vadd.xlane.f32.xlu0 %v1105_v18 }
 0x91b   :  { %v1246_v35 = vpop.permute.xlu1 %1245  ;;  %v1109_v60 = vpop.permute.xlu0 %1108 }
 0x91c   :  { %v1111_v31 = vsel %vm232_vm3, %v1109_v60, 0.0  ;;  %v1248_v4 = vsel %vm232_vm3, %v1246_v35, 0.0 }
 0x91d   :  { %1112 = vadd.xlane.f32.xlu0 %v1111_v31 }
 0x91f   :  { %v1252_v33 = vpop.permute.xlu1 %1251  ;;  %v1121_v32 = vpop.permute.xlu0 %1120 }
 0x920   :  { %v1254_v27 = vsel %vm232_vm3, %v1252_v33, 0.0  ;;  %v1123_v41 = vsel %vm232_vm3, %v1121_v32, 0.0 }
 0x921   :  { %1255 = vadd.xlane.f32.xlu0 %v1254_v27 }
 0x923   :  { %v1115_v53 = vpop.permute.xlu1 %1114  ;;  %v1127_v21 = vpop.permute.xlu0 %1126 }
 0x924   :  { %v1117_v9 = vsel %vm232_vm3, %v1115_v53, 0.0  ;;  %v1129_v18 = vsel %vm232_vm3, %v1127_v21, 0.0  ;;  %v1007_v21 = vmax.f32 %v2457_v51, %v2464_v13 }
 0x927   :  { %v1258_v14 = vpop.permute.xlu1 %1257  ;;  %v1133_v40 = vpop.permute.xlu0 %1132 }
 0x928   :  { %v1260_v8 = vsel %vm232_vm3, %v1258_v14, 0.0  ;;  %v1135_v60 = vsel %vm232_vm3, %v1133_v40, 0.0  ;;  %v1008_v40 = vmax.f32 %v1007_v21, %v2466_v54 }
 0x929   :  { %1261 = vadd.xlane.f32.xlu0 %v1260_v8 }
 0x92b   :  { %v1264_v36 = vpop.permute.xlu1 %1263  ;;  %v1139_v7 = vpop.permute.xlu0 %1138 }
 0x92c   :  { %v1266_v24 = vsel %vm232_vm3, %v1264_v36, 0.0  ;;  %v1141_v31 = vsel %vm232_vm3, %v1139_v7, 0.0  ;;  %v1009_v36 = vmax.f32 %v1008_v40, %v2478_v12 }
 0x92d   :  { %1267 = vadd.xlane.f32.xlu0 %v1266_v24 }
 0x92e   :  { %v1010_v24 = vmax.f32 %v1009_v36, %v2480_v2 }
 0x92f   :  { %v1270_v37 = vpop.permute.xlu1 %1269  ;;  %v1282_v22 = vpop.permute.xlu0 %1281 }
 0x930   :  { %v1272_v5 = vsel %vm232_vm3, %v1270_v37, 0.0  ;;  %v1284_v10 = vsel %vm232_vm3, %v1282_v22, 0.0  ;;  %v1011_v7 = vmax.f32 %v1010_v24, %v2515_v48 }
 0x931   :  { %1273 = vadd.xlane.f32.xlu0 %v1272_v5 }
 0x932   :  { %v1012_v5 = vmax.f32 %v1011_v7, %v2517_v11 }
 0x933   :  { %v1276_v61 = vpop.permute.xlu1 %1275  ;;  %v1288_v57 = vpop.permute.xlu0 %1287 }
 0x934   :  { %v1278_v59 = vsel %vm232_vm3, %v1276_v61, 0.0  ;;  %v1290_v25 = vsel %vm232_vm3, %v1288_v57, 0.0 }
 0x935   :  { %1279 = vadd.xlane.f32.xlu0 %v1278_v59 }
 0x937   :  { %v1002_v63 = vpop.permute.xlu1 %1001 }
 0x938   :  { %v1004_v46 = vsel %vm232_vm3, %v1002_v63, 0.0 }
 0x939   :  { %1005 = vadd.xlane.f32.xlu1 %v1004_v46  ;;  %1285 = vadd.xlane.f32.xlu0 %v1284_v10 }
 0x93b   :  { %v1145_v33 = vpop.permute.xlu1 %1144 }
 0x93c   :  { %v1147_v35 = vsel %vm232_vm3, %v1145_v33, 0.0 }
 0x93d   :  { %1249 = vadd.xlane.f32.xlu1 %v1248_v4  ;;  %1291 = vadd.xlane.f32.xlu0 %v1290_v25 }
 0x941   :  { %1118 = vadd.xlane.f32.xlu1 %v1117_v9 }
 0x945   :  { %1124 = vadd.xlane.f32.xlu1 %v1123_v41 }
 0x949   :  { %1130 = vadd.xlane.f32.xlu1 %v1129_v18 }
 0x94d   :  { %1136 = vadd.xlane.f32.xlu1 %v1135_v60 }
 0x951   :  { %1142 = vadd.xlane.f32.xlu1 %v1141_v31 }
 0x955   :  { %1148 = vadd.xlane.f32.xlu1 %v1147_v35 }
 0x9a6   :  { %v2536_v27 = vpop.xlane.xlu0 %1106 }
 0x9aa   :  { %v2538_v53 = vpop.xlane.xlu0 %1112 }
 0x9ae   :  { %v2540_v14 = vpop.xlane.xlu0 %1255 }
 0x9b6   :  { %v2542_v32 = vpop.xlane.xlu0 %1261 }
 0x9ba   :  { %v2547_v8 = vpop.xlane.xlu0 %1267 }
 0x9be   :  { %v2552_v37 = vpop.xlane.xlu0 %1273 }
 0x9c2   :  { %v2558_v46 = vpop.xlane.xlu0 %1279 }
 0x9c6   :  { %v1006_v22 = vpop.xlane.xlu1 %1005  ;;  %v1286_v21 = vpop.xlane.xlu0 %1285 }
 0x9c7   :  { %v1013_v61 = vmax.f32 %v1012_v5, %v1006_v22 }
 0x9c9   :  { %v1014_v59 = vsub.f32 %v2457_v51, %v1013_v61  ;;  %v1017_v63 = vsub.f32 %v2464_v13, %v1013_v61  ;;  %v1020_v10 = vsub.f32 %v2466_v54, %v1013_v61  ;;  %v1023_v57 = vsub.f32 %v2478_v12, %v1013_v61 }
 0x9ca   :  { %v1250_v4 = vpop.xlane.xlu1 %1249  ;;  %v1026_v60 = vsub.f32 %v2480_v2, %v1013_v61  ;;  %v1029_v13 = vsub.f32 %v2515_v48, %v1013_v61  ;;  %v1032_v35 = vsub.f32 %v2517_v11, %v1013_v61  ;;  %v1035_v36 = vsub.f32 %v1006_v22, %v1013_v61 }
 0x9cb   :  { %v1015_v25 = vmul.f32 1.442695, %v1014_v59  ;;  %v1018_v9 = vmul.f32 1.442695, %v1017_v63  ;;  %v1293_v41 = vmax.f32 %v1250_v4, %v2540_v14  ;;  %v1021_v18 = vmul.f32 1.442695, %v1020_v10  ;;  %v1292_v10 = vpop.xlane.xlu0 %1291 }
 0x9cc   :  { %v1024_v51 = vmul.f32 1.442695, %v1023_v57  ;;  %v1027_v12 = vmul.f32 1.442695, %v1026_v60  ;;  %v1030_v2 = vmul.f32 1.442695, %v1029_v13  ;;  %v1150_v59 = vmax.f32 %v2536_v27, %v2538_v53 }
 0x9cd   :  { %1688 = vpow2.f32 %v1015_v25  ;;  %v1294_v31 = vmax.f32 %v1293_v41, %v2542_v32  ;;  %v1033_v48 = vmul.f32 1.442695, %v1032_v35  ;;  %v1036_v63 = vmul.f32 1.442695, %v1035_v36 }
 0x9ce   :  { %1690 = vpow2.f32 %v1018_v9  ;;  %v2565_v54 = vpop.xlane.xlu1 %1118 }
 0x9cf   :  { %v1295_v33 = vmax.f32 %v1294_v31, %v2547_v8  ;;  %1692 = vpow2.f32 %v1021_v18  ;;  %v1151_v22 = vmax.f32 %v1150_v59, %v2565_v54 }
 0x9d0   :  { %1694 = vpow2.f32 %v1024_v51 }
 0x9d1   :  { %v1296_v40 = vmax.f32 %v1295_v33, %v2552_v37  ;;  %1696 = vpow2.f32 %v1027_v12 }
 0x9d2   :  { %v2570_v24 = vpop.xlane.xlu1 %1124  ;;  %1698 = vpow2.f32 %v1030_v2 }
 0x9d3   :  { %v1297_v7 = vmax.f32 %v1296_v40, %v2558_v46  ;;  %1700 = vpow2.f32 %v1033_v48  ;;  %v1152_v13 = vmax.f32 %v1151_v22, %v2570_v24 }
 0x9d4   :  { %1702 = vpow2.f32 %v1036_v63 }
 0x9d5   :  { %v1298_v5 = vmax.f32 %v1297_v7, %v1286_v21 }
 0x9d6   :  { %v2575_v11 = vpop.xlane.xlu1 %1130 }
 0x9d7   :  { %v2577_v57 = vpop.eup %1688  ;;  %v1299_v25 = vmax.f32 %v1298_v5, %v1292_v10 }
 0x9d8   :  { %v2579_v9 = vpop.eup %1690 }
 0x9d9   :  { %v1038_v61 = vadd.f32 %v2579_v9, %v2577_v57  ;;  %v1300_v41 = vsub.f32 %v1250_v4, %v1299_v25  ;;  %v1303_v18 = vsub.f32 %v2540_v14, %v1299_v25  ;;  %v1306_v60 = vsub.f32 %v2542_v32, %v1299_v25  ;;  %v2586_v31 = vpop.eup %1692 }
 0x9da   :  { %v1309_v51 = vsub.f32 %v2547_v8, %v1299_v25  ;;  %v2590_v33 = vpop.xlane.xlu1 %1136  ;;  %v1312_v2 = vsub.f32 %v2552_v37, %v1299_v25  ;;  %v2594_v4 = vpop.eup %1694  ;;  %v1315_v32 = vsub.f32 %v2558_v46, %v1299_v25  ;;  %v1153_v8 = vmax.f32 %v1152_v13, %v2575_v11 }
 0x9db   :  { %v1039_v12 = vadd.f32 %v2586_v31, %v1038_v61  ;;  %v1301_v35 = vmul.f32 1.442695, %v1300_v41  ;;  %v1304_v40 = vmul.f32 1.442695, %v1303_v18  ;;  %v1307_v14 = vmul.f32 1.442695, %v1306_v60  ;;  %v2599_v7 = vpop.eup %1696 }
 0x9dc   :  { %v1310_v48 = vmul.f32 1.442695, %v1309_v51  ;;  %v1318_v5 = vsub.f32 %v1286_v21, %v1299_v25  ;;  %v1313_v22 = vmul.f32 1.442695, %v1312_v2  ;;  %v1154_v37 = vmax.f32 %v1153_v8, %v2590_v33  ;;  %v2603_v61 = vpop.eup %1698 }
 0x9dd   :  { %v1040_v36 = vadd.f32 %v2594_v4, %v1039_v12  ;;  %1704 = vpow2.f32 %v1301_v35  ;;  %v1316_v46 = vmul.f32 1.442695, %v1315_v32  ;;  %v1321_v41 = vsub.f32 %v1292_v10, %v1299_v25  ;;  %v2606_v13 = vpop.eup %1700 }
 0x9de   :  { %1706 = vpow2.f32 %v1304_v40  ;;  %v1143_v59 = vpop.xlane.xlu1 %1142  ;;  %v1319_v12 = vmul.f32 1.442695, %v1318_v5  ;;  %v1703_v40 = vpop.eup %1702 }
 0x9df   :  { %v1041_v63 = vadd.f32 %v2599_v7, %v1040_v36  ;;  %1708 = vpow2.f32 %v1307_v14  ;;  %v1155_v60 = vmax.f32 %v1154_v37, %v1143_v59  ;;  %v1322_v2 = vmul.f32 1.442695, %v1321_v41 }
 0x9e0   :  { %1710 = vpow2.f32 %v1310_v48 }
 0x9e1   :  { %v1042_v18 = vadd.f32 %v2603_v61, %v1041_v63  ;;  %1712 = vpow2.f32 %v1313_v22 }
 0x9e2   :  { %v1149_v51 = vpop.xlane.xlu1 %1148  ;;  %1714 = vpow2.f32 %v1316_v46 }
 0x9e3   :  { %v1043_v21 = vadd.f32 %v2606_v13, %v1042_v18  ;;  %v1156_v35 = vmax.f32 %v1155_v60, %v1149_v51  ;;  %1716 = vpow2.f32 %v1319_v12 }
 0x9e5   :  { %v1044_v36 = vadd.f32 %v1703_v40, %v1043_v21  ;;  %v1157_v14 = vsub.f32 %v2536_v27, %v1156_v35  ;;  %v1160_v10 = vsub.f32 %v2538_v53, %v1156_v35  ;;  %v1163_v25 = vsub.f32 %v2565_v54, %v1156_v35 }
 0x9e6   :  { %v1166_v32 = vsub.f32 %v2570_v24, %v1156_v35  ;;  %v1169_v37 = vsub.f32 %v2575_v11, %v1156_v35  ;;  %v1172_v24 = vsub.f32 %v2590_v33, %v1156_v35  ;;  %v1175_v41 = vsub.f32 %v1143_v59, %v1156_v35 }
 0x9e7   :  { %v2613_v8 = vpop.eup %1704  ;;  %1718 = vrcp.f32 %v1044_v36  ;;  %v1158_v48 = vmul.f32 1.442695, %v1157_v14  ;;  %v1161_v5 = vmul.f32 1.442695, %v1160_v10  ;;  %v1164_v22 = vmul.f32 1.442695, %v1163_v25 }
 0x9e8   :  { %v2615_v63 = vpop.eup %1706  ;;  %1720 = vpow2.f32 %v1322_v2  ;;  %v1167_v54 = vmul.f32 1.442695, %v1166_v32  ;;  %v1170_v60 = vmul.f32 1.442695, %v1169_v37  ;;  %v1173_v2 = vmul.f32 1.442695, %v1172_v24 }
 0x9e9   :  { %v1324_v27 = vadd.f32 %v2615_v63, %v2613_v8  ;;  %1722 = vpow2.f32 %v1158_v48  ;;  %v2620_v53 = vpop.eup %1708  ;;  %v1178_v36 = vsub.f32 %v1149_v51, %v1156_v35  ;;  %v1176_v10 = vmul.f32 1.442695, %v1175_v41 }
 0x9ea   :  { %1724 = vpow2.f32 %v1161_v5  ;;  %v2624_v18 = vpop.eup %1710 }
 0x9eb   :  { %v1325_v46 = vadd.f32 %v2620_v53, %v1324_v27  ;;  %1726 = vpow2.f32 %v1164_v22  ;;  %v2626_v12 = vpop.eup %1712  ;;  %v1179_v48 = vmul.f32 1.442695, %v1178_v36 }
 0x9ec   :  { %v2629_v21 = vpop.eup %1714  ;;  %1728 = vpow2.f32 %v1167_v54 }
 0x9ed   :  { %v1326_v11 = vadd.f32 %v2624_v18, %v1325_v46  ;;  %v2632_v33 = vpop.eup %1716  ;;  %1730 = vpow2.f32 %v1170_v60 }
 0x9ee   :  { %1732 = vpow2.f32 %v1173_v2 }
 0x9ef   :  { %v1327_v14 = vadd.f32 %v2626_v12, %v1326_v11  ;;  %1734 = vpow2.f32 %v1176_v10 }
 0x9f0   :  { %1736 = vpow2.f32 %v1179_v48 }
 0x9f1   :  { %v1719_v59 = vpop.eup %1718  ;;  %v1328_v25 = vadd.f32 %v2629_v21, %v1327_v14 }
 0x9f2   :  { %v2635_v32 = vpop.eup %1720  ;;  %v1048_v5 = vmul.f32 %v1719_v59, %v2579_v9  ;;  %v1055_v22 = vmul.f32 %v1719_v59, %v2586_v31  ;;  %v1062_v24 = vmul.f32 %v1719_v59, %v2594_v4  ;;  %v1076_v46 = vmul.f32 %v1719_v59, %v2603_v61 }
 0x9f3   :  { %v1723_v37 = vpop.eup %1722  ;;  %v1329_v51 = vadd.f32 %v2632_v33, %v1328_v25  ;;  %v1046_v9 = vmul.f32 %v1719_v59, %v2577_v57  ;;  %v1069_v2 = vmul.f32 %v1719_v59, %v2599_v7  ;;  %v1090_v36 = vmul.f32 %v1719_v59, %v1703_v40 }
 0x9f4   :  { %v1725_v35 = vpop.eup %1724  ;;  %v1049_v27 = vmul.f32 %v1048_v5, %v1982_v16  ;;  %v1056_v54 = vmul.f32 %v1055_v22, %v1982_v16  ;;  %v1063_v4 = vmul.f32 %v1062_v24, %v1982_v16  ;;  %v1077_v61 = vmul.f32 %v1076_v46, %v1982_v16 }
 0x9f5   :  { %v1330_v41 = vadd.f32 %v2635_v32, %v1329_v51  ;;  %v1181_v60 = vadd.f32 %v1725_v35, %v1723_v37  ;;  %v1727_v11 = vpop.eup %1726  ;;  %v2652_v10 = vmul.f32 %v1046_v9, %v1982_v16  ;;  %v1070_v7 = vmul.f32 %v1069_v2, %v1982_v16 }
 0x9f6   :  { %1051 = vrot.lane.b32.xlu1 %v1049_v27, %s1880_s21  ;;  %1058 = vrot.lane.b32.xlu0 %v1056_v54, %s1881_s22  ;;  %v1729_v14 = vpop.eup %1728  ;;  %v1091_v40 = vmul.f32 %v1090_v36, %v1982_v16  ;;  %v1083_v22 = vmul.f32 %v1719_v59, %v2606_v13 }
 0x9f7   :  { %v1182_v31 = vadd.f32 %v1727_v11, %v1181_v60  ;;  %1738 = vrcp.f32 %v1330_v41  ;;  %v1731_v48 = vpop.eup %1730 }
 0x9f8   :  { %v1733_v5 = vpop.eup %1732  ;;  %v1084_v46 = vmul.f32 %v1083_v22, %v1982_v16 }
 0x9f9   :  { %v1183_v25 = vadd.f32 %v1729_v14, %v1182_v31  ;;  %v1735_v51 = vpop.eup %1734 }
 0x9fa   :  { %1065 = vrot.lane.b32.xlu1 %v1063_v4, %s1882_s23  ;;  %1079 = vrot.lane.b32.xlu0 %v1077_v61, %s1878_s19  ;;  %v1737_v24 = vpop.eup %1736 }
 0x9fb   :  { %v1184_v57 = vadd.f32 %v1731_v48, %v1183_v25 }
 0x9fd   :  { %v1185_v27 = vadd.f32 %v1733_v5, %v1184_v57 }
 0x9fe   :  { %1072 = vrot.lane.b32.xlu1 %v1070_v7, %s1879_s20  ;;  %1093 = vrot.lane.b32.xlu0 %v1091_v40, %s1876_s17 }
 0x9ff   :  { %v1186_v54 = vadd.f32 %v1735_v51, %v1185_v27 }
 0xa01   :  { %v1187_v41 = vadd.f32 %v1737_v24, %v1186_v54  ;;  %v1739_v60 = vpop.eup %1738 }
 0xa02   :  { %1086 = vrot.lane.b32.xlu1 %v1084_v46, %s1877_s18  ;;  %v1332_v9 = vmul.f32 %v1739_v60, %v2613_v8  ;;  %v1334_v54 = vmul.f32 %v1739_v60, %v2615_v63  ;;  %v1348_v46 = vmul.f32 %v1739_v60, %v2624_v18 }
 0xa03   :  { %1740 = vrcp.f32 %v1187_v41  ;;  %v1355_v41 = vmul.f32 %v1739_v60, %v2626_v12  ;;  %v1376_v12 = vmul.f32 %v1739_v60, %v2635_v32 }
 0xa04   :  { %v2665_v31 = vmul.f32 %v1332_v9, %v1982_v16  ;;  %v1369_v9 = vmul.f32 %v1739_v60, %v2632_v33 }
 0xa0d   :  { %v1741_v13 = vpop.eup %1740 }
 0xa0e   :  { %v1198_v59 = vmul.f32 %v1741_v13, %v1727_v11  ;;  %v1191_v2 = vmul.f32 %v1741_v13, %v1725_v35  ;;  %v1189_v36 = vmul.f32 %v1741_v13, %v1723_v37  ;;  %v1212_v25 = vmul.f32 %v1741_v13, %v1731_v48 }
 0xa0f   :  { %v1205_v57 = vmul.f32 %v1741_v13, %v1729_v14  ;;  %v1226_v11 = vmul.f32 %v1741_v13, %v1735_v51  ;;  %v1219_v35 = vmul.f32 %v1741_v13, %v1733_v5  ;;  %v332_v37 = vadd.f32 %v2342_v50, %v2204_v30 }
 0xa10   :  { %v1199_v4 = vmul.f32 %v1198_v59, %v1982_v16  ;;  %v1192_v61 = vmul.f32 %v1191_v2, %v1982_v16  ;;  %v2670_v7 = vmul.f32 %v1189_v36, %v1982_v16  ;;  %v1213_v8 = vmul.f32 %v1212_v25, %v1982_v16 }
 0xa11   :  { %v1206_v40 = vmul.f32 %v1205_v57, %v1982_v16  ;;  %v339_v14 = vadd.f32 %v2326_v6, %v332_v37  ;;  %v1227_v48 = vmul.f32 %v1226_v11, %v1982_v16  ;;  %v1220_v22 = vmul.f32 %v1219_v35, %v1982_v16  ;;  %v1597_v37 = vld [vmem:[#allocation8 + $0x8] sm:$0xff]  }
 0xa12   :  { %1201 = vrot.lane.b32.xlu0 %v1199_v4, %s1881_s22  ;;  %1194 = vrot.lane.b32.xlu1 %v1192_v61, %s1880_s21  ;;  %v1233_v27 = vmul.f32 %v1741_v13, %v1737_v24  ;;  %v482_v30 = vadd.f32 %v2396_v42, %v2269_v20  ;;  %v1335_v6 = vmul.f32 %v1334_v54, %v1982_v16 }
 0xa13   :  { %v346_v5 = vadd.f32 %v2344_v34, %v339_v14  ;;  %v1341_v51 = vmul.f32 %v1739_v60, %v2620_v53  ;;  %v625_v34 = vadd.f32 %v2412_v28, %v2306_v38  ;;  %v1349_v42 = vmul.f32 %v1348_v46, %v1982_v16 }
 0xa14   :  { %v1234_v50 = vmul.f32 %v1233_v27, %v1982_v16  ;;  %v489_v24 = vadd.f32 %v2402_v62, %v482_v30  ;;  %v1362_v53 = vmul.f32 %v1739_v60, %v2629_v21  ;;  %v1356_v38 = vmul.f32 %v1355_v41, %v1982_v16 }
 0xa15   :  { %v353_v63 = vadd.f32 %v2346_v29, %v346_v5  ;;  %v1342_v20 = vmul.f32 %v1341_v51, %v1982_v16  ;;  %v632_v62 = vadd.f32 %v2414_v19, %v625_v34  ;;  %v1377_v13 = vmul.f32 %v1376_v12, %v1982_v16 }
 0xa16   :  { %1215 = vrot.lane.b32.xlu0 %v1213_v8, %s1879_s20  ;;  %1208 = vrot.lane.b32.xlu1 %v1206_v40, %s1882_s23  ;;  %v496_v18 = vadd.f32 %v2386_v23, %v489_v24  ;;  %v1363_v28 = vmul.f32 %v1362_v53, %v1982_v16  ;;  %v1596_v40 = vld [vmem:[#allocation8] sm:$0xff]  }
 0xa17   :  { %v360_v29 = vadd.f32 %v2348_v44, %v353_v63  ;;  %v639_v23 = vadd.f32 %v2390_v39, %v632_v62  ;;  %v1370_v44 = vmul.f32 %v1369_v9, %v1982_v16  ;;  %1557 = vmatpush3.bf16.msra.mxu0 %v1596_v40 }
 0xa18   :  { %v503_v21 = vadd.f32 %v2404_v43, %v496_v18  ;;  %1558 = vmatprep.subr.bf16.mxu0 %v1866_v0 }
 0xa19   :  { %v367_v59 = vadd.f32 %v2350_v3, %v360_v29  ;;  %v646_v32 = vadd.f32 %v2416_v55, %v639_v23  ;;  %v810_v3 = vadd.f32 %v2445_v49, %v2439_v26 }
 0xa1a   :  { %1229 = vrot.lane.b32.xlu0 %v1227_v48, %s1877_s18  ;;  %1222 = vrot.lane.b32.xlu1 %v1220_v22, %s1878_s19  ;;  %v510_v19 = vadd.f32 %v2406_v17, %v503_v21 }
 0xa1b   :  { %v653_v43 = vadd.f32 %v2418_v45, %v646_v32  ;;  %v374_v17 = vadd.f32 %v2352_v47, %v367_v59  ;;  %1559 = vmatpush3.bf16.msra.mxu0 %v1597_v37 }
 0xa1c   :  { %v517_v33 = vadd.f32 %v2408_v52, %v510_v19 }
 0xa1d   :  { %v660_v60 = vadd.f32 %v2420_v56, %v653_v43 }
 0xa1e   :  { %1236 = vrot.lane.b32.xlu1 %v1234_v50, %s1876_s17  ;;  %1337 = vrot.lane.b32.xlu0 %v1335_v6, %s1880_s21  ;;  %v524_v39 = vadd.f32 %v2410_v1, %v517_v33 }
 0xa1f   :  { %v667_v16 = vadd.f32 %v2422_v58, %v660_v60 }
 0xa22   :  { %1344 = vrot.lane.b32.xlu1 %v1342_v20, %s1881_s22  ;;  %1351 = vrot.lane.b32.xlu0 %v1349_v42, %s1882_s23 }
 0xa26   :  { %1358 = vrot.lane.b32.xlu1 %v1356_v38, %s1879_s20  ;;  %1365 = vrot.lane.b32.xlu0 %v1363_v28, %s1878_s19 }
 0xa2a   :  { %1372 = vrot.lane.b32.xlu1 %v1370_v44, %s1877_s18  ;;  %1379 = vrot.lane.b32.xlu0 %v1377_v13, %s1876_s17 }
 0xa2e   :  { %1384 = vrot.lane.b32.xlu1 %v374_v17, %s1861_s25  ;;  %1388 = vrot.lane.b32.xlu0 %v524_v39, %s1875_s16  ;;  %s1883_s25 = smov [#allocation10]  }
 0xa2f   :  { %s1495_s0 = sshll.u32 %s1883_s25, 4  ;;  %s1496_s0 = int_to_ptr.vmem [resolvable:$true] %s1495_s0 }
 0xa30   :  { %s1830_s24 = scalar_lea.vmem %s1496_s0, 128  ;;  %p1835_p5 = scmp.lt.s32.totalorder %s1496_s0, %s1496_s0 }
 0xa31   :  { %p1831_p4 = scmp.ne.s32.totalorder %s1496_s0, %s1830_s24  ;;  %p1836_p6 = scmp.lt.s32.totalorder %s1830_s24, %s1830_s24 }
 0xa32   :  { %1392 = vrot.lane.b32.xlu1 %v667_v16, %s1874_s15  ;;  %1396 = vrot.lane.b32.xlu0 %v810_v3, %s1873_s14 }
 0xa33   :  { %p1837_p7 = por %p1836_p6, %p1835_p5 }
 0xa35   :  { %p1838_p8 = pnand %p1837_p7, %p1831_p4 }
 0xa36   :  { %1400 = vrot.lane.b32.xlu1 %v2447_v15, %s1872_s1 }
 0xa68   :  { %v1052_v52 = vpop.permute.xlu1 %1051  ;;  %v1059_v1 = vpop.permute.xlu0 %1058 }
 0xa69   :  { %v1054_v47 = vadd.f32 %v1052_v52, %v2652_v10 }
 0xa6b   :  { %v1061_v55 = vadd.f32 %v1059_v1, %v1054_v47 }
 0xa6c   :  { %v1066_v45 = vpop.permute.xlu1 %1065  ;;  %v1080_v2 = vpop.permute.xlu0 %1079 }
 0xa6d   :  { %v1068_v56 = vadd.f32 %v1066_v45, %v1061_v55 }
 0xa70   :  { %v1073_v36 = vpop.permute.xlu1 %1072  ;;  %v1094_v49 = vpop.permute.xlu0 %1093 }
 0xa71   :  { %v1075_v58 = vadd.f32 %v1073_v36, %v1068_v56 }
 0xa73   :  { %v1082_v4 = vadd.f32 %v1080_v2, %v1075_v58 }
 0xa74   :  { %v1087_v61 = vpop.permute.xlu1 %1086 }
 0xa75   :  { %v1089_v26 = vadd.f32 %v1087_v61, %v1082_v4 }
 0xa77   :  { %v1096_v25 = vadd.f32 %v1094_v49, %v1089_v26 }
 0xa79   :  { %1404 = vrot.lane.b32.xlu0 %v1096_v25, %s1870_s12 }
 0xa84   :  { %v1195_v57 = vpop.permute.xlu1 %1194  ;;  %v1202_v8 = vpop.permute.xlu0 %1201 }
 0xa85   :  { %v1197_v15 = vadd.f32 %v1195_v57, %v2670_v7 }
 0xa87   :  { %v1204_v10 = vadd.f32 %v1202_v8, %v1197_v15 }
 0xa88   :  { %v1209_v11 = vpop.permute.xlu1 %1208  ;;  %v1216_v35 = vpop.permute.xlu0 %1215 }
 0xa89   :  { %v1211_v14 = vadd.f32 %v1209_v11, %v1204_v10 }
 0xa8b   :  { %v1218_v48 = vadd.f32 %v1216_v35, %v1211_v14 }
 0xa8c   :  { %v1223_v22 = vpop.permute.xlu1 %1222  ;;  %v1230_v27 = vpop.permute.xlu0 %1229 }
 0xa8d   :  { %v1225_v54 = vadd.f32 %v1223_v22, %v1218_v48 }
 0xa8f   :  { %v1232_v5 = vadd.f32 %v1230_v27, %v1225_v54 }
 0xa90   :  { %v1237_v30 = vpop.permute.xlu1 %1236  ;;  %v1338_v50 = vpop.permute.xlu0 %1337 }
 0xa91   :  { %v1239_v6 = vadd.f32 %v1237_v30, %v1232_v5  ;;  %v1340_v7 = vadd.f32 %v1338_v50, %v2665_v31 }
 0xa93   :  { %1408 = vrot.lane.b32.xlu1 %v1239_v6, %s1871_s13 }
 0xa94   :  { %v1345_v51 = vpop.permute.xlu1 %1344  ;;  %v1352_v46 = vpop.permute.xlu0 %1351 }
 0xa95   :  { %v1347_v24 = vadd.f32 %v1345_v51, %v1340_v7 }
 0xa97   :  { %v1354_v63 = vadd.f32 %v1352_v46, %v1347_v24 }
 0xa98   :  { %v1359_v34 = vpop.permute.xlu1 %1358  ;;  %v1366_v20 = vpop.permute.xlu0 %1365 }
 0xa99   :  { %v1361_v0 = vadd.f32 %v1359_v34, %v1354_v63 }
 0xa9b   :  { %v1368_v42 = vadd.f32 %v1366_v20, %v1361_v0 }
 0xa9c   :  { %v1373_v41 = vpop.permute.xlu1 %1372  ;;  %v1380_v18 = vpop.permute.xlu0 %1379 }
 0xa9d   :  { %v1375_v53 = vadd.f32 %v1373_v41, %v1368_v42 }
 0xa9f   :  { %v1382_v62 = vadd.f32 %v1380_v18, %v1375_v53 }
 0xaa0   :  { %v1385_v29 = vpop.permute.xlu1 %1384  ;;  %v1389_v38 = vpop.permute.xlu0 %1388 }
 0xaa1   :  { %1412 = vrot.lane.b32.xlu0 %v1382_v62, %s1868_s3  ;;  %v1415_v9 = vsel %vm232_vm3, %v1385_v29, %v1389_v38 }
 0xaa4   :  { %v1393_v28 = vpop.permute.xlu1 %1392  ;;  %v1397_v31 = vpop.permute.xlu0 %1396 }
 0xaa5   :  { %v1417_v21 = vsel %vm1416_vm4, %v1415_v9, %v1393_v28 }
 0xaa6   :  { %v1419_v19 = vsel %vm1418_vm5, %v1417_v21, %v1397_v31 }
 0xaa8   :  { %v1401_v12 = vpop.permute.xlu1 %1400 }
 0xaa9   :  { %v1421_v13 = vsel %vm1420_vm6, %v1419_v19, %v1401_v12 }
 0xaeb   :  { %v1405_v23 = vpop.permute.xlu0 %1404 }
 0xaec   :  { %v1423_v59 = vsel %vm1422_vm7, %v1421_v13, %v1405_v23 }
 0xb05   :  { %v1409_v44 = vpop.permute.xlu1 %1408 }
 0xb06   :  { %v1425_v33 = vsel %vm1424_vm8, %v1423_v59, %v1409_v44 }
 0xb13   :  { %v1413_v32 = vpop.permute.xlu0 %1412 }
 0xb14   :  { %v1427_v39 = vsel %vm1426_vm9, %v1425_v33, %v1413_v32 }
 0xb15   :  { %v1428_v43 = vpack.c.bf16 %v1427_v39, %v1427_v39 }
 0xb17   :  { %1561 = vmatmul.mubr.msk.bf16.vlgmr.msra.gmra.mrb[4].mxu0 %vm90_vm1, %v1428_v43 }
 0xbea   :  { %v1482_v17 = vpop.f32.mrb[4].mxu0 }
 0xbeb   :  { %1488 = vst.msk [vmem:[#allocation10] sm:$0xff] %vm90_vm1, %v1482_v17  ;;  %v1562_v60 = vpop.f32.mrb[5].mxu0 }
 0xbec   :  { %v1485_v16 = vpop.f32.mrb[6].mxu0 }
 0xbed   :  { %1841 = shalt.err (!%p1838_p8)
}
 0xbee   :  { %s1842_s29 = scalar_lea.hbm %s2763_s4, 128 }
 0xbef   :  { %p1843_p9 = scmp.ne.s32.totalorder %s2763_s4, %s1842_s29  ;;  %p1846_p10 = scmp.lt.u32.totalorder %s1842_s29, %s2763_s4 }
 0xbf1   :  { %p1848_p11 = pnand %p1846_p10, %p1843_p9 }
 0xbf3   :  { %1851 = shalt.err (!%p1848_p11)
}
 0xbf4   :  { %1498 = dma.vmem_to_hbm [thread:$0]  %s1496_s0, 128, %s2763_s4, [#allocation4]   ;;  %v1563_v3 = vpop.f32.mrb[7].mxu0 }
 0xbf5   :  { %1858 = dma.done.wait [#allocation4], 128  }
 0xbf6   :  { %1859 = vsyncadd [#allocation4], 4294967168 }
 0xbf7   :  { %1502 = vsyncpa [#allocation3], 1 }
 0xbf8   :  { %1503 = vsyncpa [#allocation6], 1 }
 0xbf9   :  { %1504 = vsyncpa [#allocation9], 1 }
 0xbfa   :  { %1505 = vsyncpa [#allocation4], 1 }

</bundles_post_ra>
